<compile_context>
chip_gen: v5e
topology: v5e:2x2
jax: 0.10.0
libtpu: 0.0.40
codegen_flags: <defaults>
</compile_context>

<pallas_src>
import math
import functools

import jax
import jax.numpy as jnp
from jax.experimental import pallas as pl
from jax.experimental.pallas import tpu as pltpu


def painn_update_kernel(x_ref, vec_ref,
                        wv_ref,              # vec_proj weight (H, 2H), no bias
                        w1_ref, b1_ref,      # xvec_proj[0]: (2H, H), (1, H)
                        w2_ref, b2_ref,      # xvec_proj[2]: (H, 3H), (1, 3H)
                        dx_ref, dvec_ref,
                        *, H, inv_sqrt_h, inv_sqrt_2, compute_dtype):
    f32 = jnp.float32
    cdt = compute_dtype

    xb = x_ref[...].astype(cdt)                 # (tn, H)
    wv = wv_ref[...]                            # (H, 2H), already compute dtype

    # vec_proj per xyz axis: lane-aligned slices of the (tn, 3H) slab.
    v1 = []
    vec_dot = None
    v2_sq = None
    for a in range(3):
        va = vec_ref[:, a * H:(a + 1) * H].astype(cdt)        # (tn, H)
        pa = jnp.dot(va, wv, preferred_element_type=f32)      # (tn, 2H)
        v1a = pa[:, :H]
        v2a = pa[:, H:]
        vec_dot = v1a * v2a if vec_dot is None else vec_dot + v1a * v2a
        v2_sq = v2a * v2a if v2_sq is None else v2_sq + v2a * v2a
        # Only consumer of v1a is the final xv3 * v1[a]; keep it narrow to cut
        # live-intermediate VMEM (no-op when compute_dtype == float32).
        v1.append(v1a.astype(cdt))

    vec_dot = vec_dot * inv_sqrt_h                            # (tn, H)
    v2norm = jnp.sqrt(v2_sq + 1e-8)                           # (tn, H)

    # xvec_proj[0]: Linear(2H, H) on cat([x, |vec2|]) -- single K=2H matmul.
    cat = jnp.concatenate([xb, v2norm.astype(cdt)], axis=-1)  # (tn, 2H) lane concat
    h = jnp.dot(cat, w1_ref[...], preferred_element_type=f32) + b1_ref[...]
    # ScaledSiLU: silu(h) * (1 / 0.6)
    act = h * jax.nn.sigmoid(h) * (1.0 / 0.6)

    # xvec_proj[2]: single Linear(H, 3H); slice the lane-dense output.
    xh = jnp.dot(act.astype(cdt), w2_ref[...], preferred_element_type=f32) + b2_ref[...]
    xv1 = xh[:, :H]
    xv2 = xh[:, H:2 * H]
    xv3 = xh[:, 2 * H:]

    dx_ref[...] = ((xv1 + xv2 * vec_dot) * inv_sqrt_2).astype(dx_ref.dtype)
    for a in range(3):
        dvec_ref[:, a * H:(a + 1) * H] = (xv3 * v1[a].astype(f32)).astype(dvec_ref.dtype)


def _vmem_capacity_bytes():
    try:
        cap = int(getattr(pltpu.get_tpu_info(), "vmem_capacity_bytes"))
        if cap > 0:
            return cap
    except Exception:
        pass
    return 128 * 1024 * 1024   # v5e/v6e default


def painn_update(x, vec, params, *, tile_n=1024,
                 compute_dtype=jnp.bfloat16,
                 vmem_limit_bytes=None):
    """PaiNNUpdate forward.  Outputs follow the input dtypes, so passing
    bf16 x/vec halves HBM traffic on this memory-bound kernel."""
    N, H = x.shape
    assert vec.shape == (N, 3, H)
    assert H % 128 == 0, (
        f"hidden_channels={H} must be a multiple of 128 for lane-aligned "
        "slices / unmasked stores (pad the feature dim otherwise).")
    wv, w1, b1, w2, b2 = params      # (H,2H), (2H,H), (1,H), (H,3H), (1,3H)

    cdt = compute_dtype
    wv_c = wv.astype(cdt)
    w1_c = w1.astype(cdt)
    w2_c = w2.astype(cdt)
    b1_f = b1.reshape(1, H).astype(jnp.float32)
    b2_f = b2.reshape(1, 3 * H).astype(jnp.float32)

    vec2d = vec.reshape(N, 3 * H)    # free row-major reshape (no copy)

    # Generation-aware VMEM budget and tile caps (v7x: 64 MiB/TC; v5e/v6e: 128 MiB).
    vmem_cap = _vmem_capacity_bytes()
    if vmem_cap <= 96 * 1024 * 1024:           # v7x-like
        max_tile = 2048
        default_limit = 48 * 1024 * 1024
    else:                                       # v5e / v6e
        max_tile = 4096
        default_limit = 96 * 1024 * 1024
    if vmem_limit_bytes is None:
        vmem_limit_bytes = default_limit
    vmem_limit_bytes = min(int(vmem_limit_bytes), vmem_cap)

    # Tile selection: as big as the roofline wants, but keep >= 2 (target ~4)
    # grid steps so both v7x TensorCores get work and the pipeline hides DMA.
    if N <= 8:
        tile_n = N
    else:
        tile_n = min(tile_n, max_tile)
        tile_n = min(tile_n, max(256, (N // 4 // 8) * 8))
        tile_n = min(tile_n, N)
        tile_n = max(8, (tile_n // 8) * 8)
    grid = (pl.cdiv(N, tile_n),)

    row = lambda i: (i, 0)
    const = lambda i: (0, 0)

    kern = functools.partial(
        painn_update_kernel, H=H,
        inv_sqrt_h=1.0 / math.sqrt(H), inv_sqrt_2=1.0 / math.sqrt(2.0),
        compute_dtype=cdt)

    wbytes = sum(int(a.size) * a.dtype.itemsize
                 for a in (wv_c, w1_c, w2_c, b1_f, b2_f))
    cost = pl.CostEstimate(
        flops=22 * N * H * H,                     # (6 + 2 + 3) NH^2 MACs * 2
        transcendentals=2 * N * H,                # sigmoid + sqrt per row element
        bytes_accessed=2 * (int(x.size) * x.dtype.itemsize
                            + int(vec.size) * vec.dtype.itemsize) + wbytes)

    dx, dvec2d = pl.pallas_call(
        kern,
        grid=grid,
        in_specs=[
            pl.BlockSpec((tile_n, H), row),        # x
            pl.BlockSpec((tile_n, 3 * H), row),    # vec (as lane-dense (N, 3H))
            pl.BlockSpec((H, 2 * H), const),       # vec_proj weight (fused)
            pl.BlockSpec((2 * H, H), const),       # xvec_proj[0] weight (fused K=2H)
            pl.BlockSpec((1, H), const),           # xvec_proj[0] bias
            pl.BlockSpec((H, 3 * H), const),       # xvec_proj[2] weight (fused)
            pl.BlockSpec((1, 3 * H), const),       # xvec_proj[2] bias
        ],
        out_specs=[
            pl.BlockSpec((tile_n, H), row),        # dx
            pl.BlockSpec((tile_n, 3 * H), row),    # dvec (as (N, 3H))
        ],
        out_shape=[
            jax.ShapeDtypeStruct((N, H), x.dtype),
            jax.ShapeDtypeStruct((N, 3 * H), vec.dtype),
        ],
        compiler_params=pltpu.CompilerParams(
            dimension_semantics=("parallel",),
            vmem_limit_bytes=vmem_limit_bytes),
        cost_estimate=cost,
    )(x, vec2d, wv_c, w1_c, b1_f, w2_c, b2_f)

    return dx, dvec2d.reshape(N, 3, H)   # free reshape back to (N, 3, H)


def make_params(key, H, dtype=jnp.float32):
    """Deterministic xavier_uniform weights (zero biases), (in, out) layout."""
    k1, k2, k3 = jax.random.split(key, 3)
    b = math.sqrt(6.0 / (H + 2 * H))
    wv = jax.random.uniform(k1, (H, 2 * H), dtype, minval=-b, maxval=b)
    b = math.sqrt(6.0 / (2 * H + H))
    w1 = jax.random.uniform(k2, (2 * H, H), dtype, minval=-b, maxval=b)
    b1 = jnp.zeros((1, H), dtype)
    b = math.sqrt(6.0 / (H + 3 * H))
    w2 = jax.random.uniform(k3, (H, 3 * H), dtype, minval=-b, maxval=b)
    b2 = jnp.zeros((1, 3 * H), dtype)
    return wv, w1, b1, w2, b2


def painn_update_ref(x, vec, params, *, compute_dtype=jnp.float32):
    """Pure-JAX reference matching the PyTorch forward.

    compute_dtype controls the matmul-operand dtype (to mirror the kernel's
    bf16-on-MXU path with f32 accumulation); all other math is f32.
    """
    wv, w1, b1, w2, b2 = params
    N, _, H = vec.shape
    cdt = compute_dtype
    f32 = jnp.float32

    vp = jnp.dot(vec.reshape(N * 3, H).astype(cdt), wv.astype(cdt),
                 preferred_element_type=f32).reshape(N, 3, 2 * H)
    v1, v2 = vp[..., :H], vp[..., H:]
    vec_dot = (v1 * v2).sum(axis=1) * (1.0 / math.sqrt(H))
    v2norm = jnp.sqrt((v2 ** 2).sum(axis=1) + 1e-8)
    cat = jnp.concatenate([x.astype(f32), v2norm], axis=-1)
    h = jnp.dot(cat.astype(cdt), w1.astype(cdt), preferred_element_type=f32) + b1
    a = h * jax.nn.sigmoid(h) * (1.0 / 0.6)
    xh = jnp.dot(a.astype(cdt), w2.astype(cdt), preferred_element_type=f32) + b2
    xv1, xv2, xv3 = xh[:, :H], xh[:, H:2 * H], xh[:, 2 * H:]
    dx = (xv1 + xv2 * vec_dot) * (1.0 / math.sqrt(2.0))
    dvec = xv3[:, None, :] * v1
    return dx, dvec


if __name__ == "__main__":
    # Small but MXU-friendly demo shape (typical PaiNN hidden_channels=128).
    N, H = 512, 128
    key = jax.random.PRNGKey(0)
    kx, kv, kp = jax.random.split(key, 3)

    x = jax.random.normal(kx, (N, H), jnp.float32)
    vec = jax.random.normal(kv, (N, 3, H), jnp.float32)
    params = make_params(kp, H)

    # 1) f32 compute path: structural sanity vs. pure-JAX f32 reference.
    #    (loose tolerance covers matmul-precision path differences between the
    #     Mosaic kernel and XLA's default f32 dot lowering)
    dx32, dvec32 = painn_update(x, vec, params, compute_dtype=jnp.float32)
    jax.block_until_ready((dx32, dvec32))
    dx_ref, dvec_ref = painn_update_ref(x, vec, params, compute_dtype=jnp.float32)
    assert jnp.allclose(dx32, dx_ref, atol=2e-2, rtol=2e-2)
    assert jnp.allclose(dvec32, dvec_ref, atol=2e-2, rtol=2e-2)

    # 2) Default bf16-MXU path vs. a matmul-dtype-matched reference.
    dxb, dvecb = painn_update(x, vec, params)
    jax.block_until_ready((dxb, dvecb))
    dx_refb, dvec_refb = painn_update_ref(x, vec, params,
                                          compute_dtype=jnp.bfloat16)
    assert jnp.allclose(dxb, dx_refb, atol=2e-2, rtol=2e-2)
    assert jnp.allclose(dvecb, dvec_refb, atol=2e-2, rtol=2e-2)

    # 3) bf16-I/O path (halves HBM traffic on this memory-bound kernel):
    #    outputs follow input dtypes; verify it runs and stays finite.
    x16 = x.astype(jnp.bfloat16)
    vec16 = vec.astype(jnp.bfloat16)
    dx16, dvec16 = painn_update(x16, vec16, params)
    jax.block_until_ready((dx16, dvec16))
    assert dx16.dtype == jnp.bfloat16 and dvec16.dtype == jnp.bfloat16
    assert bool(jnp.isfinite(dx16.astype(jnp.float32)).all())
    assert bool(jnp.isfinite(dvec16.astype(jnp.float32)).all())

    print("KERNEL_OK")
</pallas_src>

<mosaic_0001>
module attributes {stable_mosaic.version = 11 : i64} {
  func.func @painn_update_kernel(%arg0: i32, %arg1: memref<256x128xf32, #tpu.memory_space<vmem>>, %arg2: memref<256x384xf32, #tpu.memory_space<vmem>>, %arg3: memref<128x256xf32, #tpu.memory_space<vmem>>, %arg4: memref<256x128xf32, #tpu.memory_space<vmem>>, %arg5: memref<1x128xf32, #tpu.memory_space<vmem>>, %arg6: memref<128x384xf32, #tpu.memory_space<vmem>>, %arg7: memref<1x384xf32, #tpu.memory_space<vmem>>, %arg8: memref<256x128xf32, #tpu.memory_space<vmem>>, %arg9: memref<256x384xf32, #tpu.memory_space<vmem>>) attributes {dimension_semantics = [#tpu.dimension_semantics<parallel>], iteration_bounds = array<i64: 2>, scalar_prefetch = 0 : i64, scratch_operands = 0 : i64, tpu.core_type = #tpu.core_type<tc>, window_params = [{transform_indices = @transform_0, window_bounds = array<i64: 256, 128>}, {transform_indices = @transform_1, window_bounds = array<i64: 256, 384>}, {pipeline_mode = #tpu.pipeline_mode<synchronous>, transform_indices = @transform_2, window_bounds = array<i64: 128, 256>}, {pipeline_mode = #tpu.pipeline_mode<synchronous>, transform_indices = @transform_3, window_bounds = array<i64: 256, 128>}, {pipeline_mode = #tpu.pipeline_mode<synchronous>, transform_indices = @transform_4, window_bounds = array<i64: 1, 128>}, {pipeline_mode = #tpu.pipeline_mode<synchronous>, transform_indices = @transform_5, window_bounds = array<i64: 128, 384>}, {pipeline_mode = #tpu.pipeline_mode<synchronous>, transform_indices = @transform_6, window_bounds = array<i64: 1, 384>}, {transform_indices = @transform_7, window_bounds = array<i64: 256, 128>}, {transform_indices = @transform_8, window_bounds = array<i64: 256, 384>}]} {
    %c0 = arith.constant 0 : index
    %c0_0 = arith.constant 0 : index
    %0 = vector.load %arg1[%c0, %c0_0] : memref<256x128xf32, #tpu.memory_space<vmem>>, vector<256x128xf32>
    %c0_1 = arith.constant 0 : index
    %c0_2 = arith.constant 0 : index
    %1 = vector.load %arg3[%c0_1, %c0_2] : memref<128x256xf32, #tpu.memory_space<vmem>>, vector<128x256xf32>
    %c0_3 = arith.constant 0 : index
    %c0_4 = arith.constant 0 : index
    %2 = vector.load %arg2[%c0_3, %c0_4] : memref<256x384xf32, #tpu.memory_space<vmem>>, vector<256x128xf32>
    %cst = arith.constant dense<0.000000e+00> : vector<256x256xf32>
    %3 = tpu.matmul %2, %1, %cst {dimension_numbers = #tpu.dot_dimension_numbers<[1], [0], [0], [1], [0, 0, 1, 1], [], []>} : vector<256x128xf32>, vector<128x256xf32>, vector<256x256xf32> -> vector<256x256xf32>
    %4 = vector.extract_strided_slice %3 {offsets = [0, 0], sizes = [256, 128], strides = [1, 1]} : vector<256x256xf32> to vector<256x128xf32>
    %5 = vector.extract_strided_slice %3 {offsets = [0, 128], sizes = [256, 128], strides = [1, 1]} : vector<256x256xf32> to vector<256x128xf32>
    %6 = arith.mulf %4, %5 : vector<256x128xf32>
    %7 = arith.mulf %5, %5 : vector<256x128xf32>
    %c0_5 = arith.constant 0 : index
    %c128 = arith.constant 128 : index
    %8 = vector.load %arg2[%c0_5, %c128] : memref<256x384xf32, #tpu.memory_space<vmem>>, vector<256x128xf32>
    %cst_6 = arith.constant dense<0.000000e+00> : vector<256x256xf32>
    %9 = tpu.matmul %8, %1, %cst_6 {dimension_numbers = #tpu.dot_dimension_numbers<[1], [0], [0], [1], [0, 0, 1, 1], [], []>} : vector<256x128xf32>, vector<128x256xf32>, vector<256x256xf32> -> vector<256x256xf32>
    %10 = vector.extract_strided_slice %9 {offsets = [0, 0], sizes = [256, 128], strides = [1, 1]} : vector<256x256xf32> to vector<256x128xf32>
    %11 = vector.extract_strided_slice %9 {offsets = [0, 128], sizes = [256, 128], strides = [1, 1]} : vector<256x256xf32> to vector<256x128xf32>
    %12 = arith.mulf %10, %11 : vector<256x128xf32>
    %13 = arith.addf %6, %12 : vector<256x128xf32>
    %14 = arith.mulf %11, %11 : vector<256x128xf32>
    %15 = arith.addf %7, %14 : vector<256x128xf32>
    %c0_7 = arith.constant 0 : index
    %c256 = arith.constant 256 : index
    %16 = vector.load %arg2[%c0_7, %c256] : memref<256x384xf32, #tpu.memory_space<vmem>>, vector<256x128xf32>
    %cst_8 = arith.constant dense<0.000000e+00> : vector<256x256xf32>
    %17 = tpu.matmul %16, %1, %cst_8 {dimension_numbers = #tpu.dot_dimension_numbers<[1], [0], [0], [1], [0, 0, 1, 1], [], []>} : vector<256x128xf32>, vector<128x256xf32>, vector<256x256xf32> -> vector<256x256xf32>
    %18 = vector.extract_strided_slice %17 {offsets = [0, 0], sizes = [256, 128], strides = [1, 1]} : vector<256x256xf32> to vector<256x128xf32>
    %19 = vector.extract_strided_slice %17 {offsets = [0, 128], sizes = [256, 128], strides = [1, 1]} : vector<256x256xf32> to vector<256x128xf32>
    %20 = arith.mulf %18, %19 : vector<256x128xf32>
    %21 = arith.addf %13, %20 : vector<256x128xf32>
    %22 = arith.mulf %19, %19 : vector<256x128xf32>
    %23 = arith.addf %15, %22 : vector<256x128xf32>
    %cst_9 = arith.constant 0.0883883461 : f32
    %24 = vector.broadcast %cst_9 : f32 to vector<256x128xf32>
    %25 = arith.mulf %21, %24 : vector<256x128xf32>
    %cst_10 = arith.constant 9.99999993E-9 : f32
    %26 = vector.broadcast %cst_10 : f32 to vector<256x128xf32>
    %27 = arith.addf %23, %26 : vector<256x128xf32>
    %28 = math.sqrt %27 : vector<256x128xf32>
    %29 = tpu.concatenate %0, %28 in 1 : vector<256x128xf32>, vector<256x128xf32> -> vector<256x256xf32>
    %c0_11 = arith.constant 0 : index
    %c0_12 = arith.constant 0 : index
    %30 = vector.load %arg4[%c0_11, %c0_12] : memref<256x128xf32, #tpu.memory_space<vmem>>, vector<256x128xf32>
    %cst_13 = arith.constant dense<0.000000e+00> : vector<256x128xf32>
    %31 = tpu.matmul %29, %30, %cst_13 {dimension_numbers = #tpu.dot_dimension_numbers<[1], [0], [0], [1], [0, 0, 1, 1], [], []>} : vector<256x256xf32>, vector<256x128xf32>, vector<256x128xf32> -> vector<256x128xf32>
    %c0_14 = arith.constant 0 : index
    %c0_15 = arith.constant 0 : index
    %32 = vector.load %arg5[%c0_14, %c0_15] : memref<1x128xf32, #tpu.memory_space<vmem>>, vector<1x128xf32>
    %33 = vector.broadcast %32 : vector<1x128xf32> to vector<256x128xf32>
    %34 = arith.addf %31, %33 : vector<256x128xf32>
    %35 = arith.negf %34 : vector<256x128xf32>
    %36 = math.exp %35 : vector<256x128xf32>
    %cst_16 = arith.constant 1.000000e+00 : f32
    %37 = vector.broadcast %cst_16 : f32 to vector<256x128xf32>
    %38 = arith.addf %37, %36 : vector<256x128xf32>
    %39 = arith.divf %37, %38 : vector<256x128xf32>
    %40 = arith.mulf %34, %39 : vector<256x128xf32>
    %cst_17 = arith.constant 1.66666663 : f32
    %41 = vector.broadcast %cst_17 : f32 to vector<256x128xf32>
    %42 = arith.mulf %40, %41 : vector<256x128xf32>
    %c0_18 = arith.constant 0 : index
    %c0_19 = arith.constant 0 : index
    %43 = vector.load %arg6[%c0_18, %c0_19] : memref<128x384xf32, #tpu.memory_space<vmem>>, vector<128x384xf32>
    %cst_20 = arith.constant dense<0.000000e+00> : vector<256x384xf32>
    %44 = tpu.matmul %42, %43, %cst_20 {dimension_numbers = #tpu.dot_dimension_numbers<[1], [0], [0], [1], [0, 0, 1, 1], [], []>} : vector<256x128xf32>, vector<128x384xf32>, vector<256x384xf32> -> vector<256x384xf32>
    %c0_21 = arith.constant 0 : index
    %c0_22 = arith.constant 0 : index
    %45 = vector.load %arg7[%c0_21, %c0_22] : memref<1x384xf32, #tpu.memory_space<vmem>>, vector<1x384xf32>
    %46 = vector.broadcast %45 : vector<1x384xf32> to vector<256x384xf32>
    %47 = arith.addf %44, %46 : vector<256x384xf32>
    %48 = vector.extract_strided_slice %47 {offsets = [0, 0], sizes = [256, 128], strides = [1, 1]} : vector<256x384xf32> to vector<256x128xf32>
    %49 = vector.extract_strided_slice %47 {offsets = [0, 128], sizes = [256, 128], strides = [1, 1]} : vector<256x384xf32> to vector<256x128xf32>
    %50 = vector.extract_strided_slice %47 {offsets = [0, 256], sizes = [256, 128], strides = [1, 1]} : vector<256x384xf32> to vector<256x128xf32>
    %51 = arith.mulf %49, %25 : vector<256x128xf32>
    %52 = arith.addf %48, %51 : vector<256x128xf32>
    %cst_23 = arith.constant 0.707106769 : f32
    %53 = vector.broadcast %cst_23 : f32 to vector<256x128xf32>
    %54 = arith.mulf %52, %53 : vector<256x128xf32>
    %c0_24 = arith.constant 0 : index
    %c0_25 = arith.constant 0 : index
    %55 = vector.load %arg8[%c0_24, %c0_25] : memref<256x128xf32, #tpu.memory_space<vmem>>, vector<256x128xf32>
    tpu.vector_store %arg8[%c0_24, %c0_25], %54 {strides = array<i32>} : memref<256x128xf32, #tpu.memory_space<vmem>>, vector<256x128xf32>,
    %56 = arith.mulf %50, %4 : vector<256x128xf32>
    %c0_26 = arith.constant 0 : index
    %c0_27 = arith.constant 0 : index
    %57 = vector.load %arg9[%c0_26, %c0_27] : memref<256x384xf32, #tpu.memory_space<vmem>>, vector<256x128xf32>
    tpu.vector_store %arg9[%c0_26, %c0_27], %56 {strides = array<i32>} : memref<256x384xf32, #tpu.memory_space<vmem>>, vector<256x128xf32>,
    %58 = arith.mulf %50, %10 : vector<256x128xf32>
    %c0_28 = arith.constant 0 : index
    %c128_29 = arith.constant 128 : index
    %59 = vector.load %arg9[%c0_28, %c128_29] : memref<256x384xf32, #tpu.memory_space<vmem>>, vector<256x128xf32>
    tpu.vector_store %arg9[%c0_28, %c128_29], %58 {strides = array<i32>} : memref<256x384xf32, #tpu.memory_space<vmem>>, vector<256x128xf32>,
    %60 = arith.mulf %50, %18 : vector<256x128xf32>
    %c0_30 = arith.constant 0 : index
    %c256_31 = arith.constant 256 : index
    %61 = vector.load %arg9[%c0_30, %c256_31] : memref<256x384xf32, #tpu.memory_space<vmem>>, vector<256x128xf32>
    tpu.vector_store %arg9[%c0_30, %c256_31], %60 {strides = array<i32>} : memref<256x384xf32, #tpu.memory_space<vmem>>, vector<256x128xf32>,
    return
  }
  func.func @transform_0(%arg0: i32) -> (i32, i32) {
    %c0_i32 = arith.constant 0 : i32
    %c0_i32_0 = arith.constant 0 : i32
    return %arg0, %c0_i32 : i32, i32
  }
  func.func @transform_1(%arg0: i32) -> (i32, i32) {
    %c0_i32 = arith.constant 0 : i32
    %c0_i32_0 = arith.constant 0 : i32
    return %arg0, %c0_i32 : i32, i32
  }
  func.func @transform_2(%arg0: i32) -> (i32, i32) {
    %c0_i32 = arith.constant 0 : i32
    %c0_i32_0 = arith.constant 0 : i32
    %c0_i32_1 = arith.constant 0 : i32
    return %c0_i32, %c0_i32_0 : i32, i32
  }
  func.func @transform_3(%arg0: i32) -> (i32, i32) {
    %c0_i32 = arith.constant 0 : i32
    %c0_i32_0 = arith.constant 0 : i32
    %c0_i32_1 = arith.constant 0 : i32
    return %c0_i32, %c0_i32_0 : i32, i32
  }
  func.func @transform_4(%arg0: i32) -> (i32, i32) {
    %c0_i32 = arith.constant 0 : i32
    %c0_i32_0 = arith.constant 0 : i32
    %c0_i32_1 = arith.constant 0 : i32
    return %c0_i32, %c0_i32_0 : i32, i32
  }
  func.func @transform_5(%arg0: i32) -> (i32, i32) {
    %c0_i32 = arith.constant 0 : i32
    %c0_i32_0 = arith.constant 0 : i32
    %c0_i32_1 = arith.constant 0 : i32
    return %c0_i32, %c0_i32_0 : i32, i32
  }
  func.func @transform_6(%arg0: i32) -> (i32, i32) {
    %c0_i32 = arith.constant 0 : i32
    %c0_i32_0 = arith.constant 0 : i32
    %c0_i32_1 = arith.constant 0 : i32
    return %c0_i32, %c0_i32_0 : i32, i32
  }
  func.func @transform_7(%arg0: i32) -> (i32, i32) {
    %c0_i32 = arith.constant 0 : i32
    %c0_i32_0 = arith.constant 0 : i32
    return %arg0, %c0_i32 : i32, i32
  }
  func.func @transform_8(%arg0: i32) -> (i32, i32) {
    %c0_i32 = arith.constant 0 : i32
    %c0_i32_0 = arith.constant 0 : i32
    return %arg0, %c0_i32 : i32, i32
  }
}

</mosaic_0001>

<bundles_post_ra>
// kernel: tpu_custom_call.1
= control target key start
LH: loop header
LB: loop body
LE: loop exit
PB: predicated region body
PF: predicated region fallthrough
CT: control target
= control target key end

     0   :  { %s7598_s0 = inlined_call_operand.hbm [shape: f32[512,128], index: 0, kind: input, shape index: {}]   ;;  %s7599_s1 = inlined_call_operand.hbm [shape: f32[512,384], index: 1, kind: input, shape index: {}]   ;;  %s7600_s2 = inlined_call_operand.hbm [shape: f32[128,256], index: 2, kind: input, shape index: {}]   ;;  %s7601_s3 = inlined_call_operand.hbm [shape: f32[256,128], index: 3, kind: input, shape index: {}]   ;;  %s7602_s4 = inlined_call_operand.vmem [shape: f32[1,128], index: 4, kind: input, shape index: {}]   ;;  %s7603_s5 = inlined_call_operand.hbm [shape: f32[128,384], index: 5, kind: input, shape index: {}]   ;;  %s7604_s6 = inlined_call_operand.vmem [shape: f32[1,384], index: 6, kind: input, shape index: {}]   ;;  %s7605_s7 = inlined_call_operand.hbm [shape: f32[512,128], index: 7, kind: output, shape index: {0}]   ;;  %s7606_s8 = inlined_call_operand.hbm [shape: f32[512,384], index: 8, kind: output, shape index: {1}]  }
   0x1   :  { %7794 = sst [smem:[#allocation208_spill]] %s7600_s2 }
   0x2   :  { %7795 = sst [smem:[#allocation209_spill]] %s7601_s3 }
   0x3   :  { %7796 = sst [smem:[#allocation210_spill]] %s7603_s5 }
   0x4   :  { %14 = vsyncpa [#allocation3], 0 }
   0x5   :  { %16 = vsyncpa [#allocation3 + $0x1], 0 }
   0x6   :  { %17 = vsyncpa [#allocation6], 0 }
   0x7   :  { %19 = vsyncpa [#allocation6 + $0x1], 0 }
   0x8   :  { %20 = vsyncpa [#allocation9], 0 }
   0x9   :  { %21 = vsyncpa [#allocation4], 0 }
   0xa   :  { %23 = vsyncpa [#allocation4 + $0x1], 0 }
   0xb   :  { %24 = vsyncpa [#allocation13], 0 }
   0xc   :  { %26 = vsyncpa [#allocation13 + $0x1], 0  ;;  %s4608_s27 = smov 0   ;;  %s4610_s28 = smov 0  }
   0xd   :  { %s4612_s29 = smov 0   ;;  %s4614_s30 = smov 0  }
   0xe LB: > { %7797 = sst [smem:[#allocation20_spill]] %s4536_s27  ;;  %s4629_s9 = sadd.s32 4294967295, %s4548_s30   ;;  %s4548_s30 = sphi %s4614_s30, %s8242_s30   ;;  %s4544_s29 = sphi %s4612_s29, %s8244_s29   ;;  %s4540_s28 = sphi %s4610_s28, %s8246_s28   ;;  %s4536_s27 = sphi %s4608_s27, %s8245_s27  }
   0xf   : > { %7798 = sst [smem:[#allocation21_spill]] %s4544_s29  ;;  %s3884_s10 = sadd.s32 4294967294, %s4548_s30  }
  0x10   : > { %7799 = sst [smem:[#allocation22_spill]] %s4548_s30  ;;  %p52_p0 = scmp.ne.s32.totalorder %s4540_s28, %s4536_s27 }
  0x11   : > { %p53_p1 = scmp.eq.s32.totalorder %s4629_s9, 0  ;;  %p207_p2 = scmp.eq.s32.totalorder %s4629_s9, 1 }
  0x12   : > { %p213_p3 = scmp.eq.s32.totalorder %s3884_s10, 1  ;;  %p3885_p5 = scmp.ge.s32.totalorder %s4548_s30, 1 }
  0x13   : > { %p4638_p4 = por %p53_p1, %p52_p0  ;;  %p246_p7 = scmp.lt.s32.totalorder %s4548_s30, 3 }
  0x14   : > { %p4643_p6 = por %p213_p3, %p52_p0  ;;  %s7803_s2 = sld [smem:[#allocation208_spill]] }
  0x15   : > { %p4651_p8 = pnand %p3885_p5, %p246_p7  ;;  %s4550_s17 = smov [#allocation7]  }
  0x16   : > { %s7801_s12 = scalar_select %p4643_p6, 1, 0 }
  0x17   : > { %p4016_p9 = pneg %p4651_p8  ;;  %s259_s18 = sshll.u32 %s4550_s17, 4  ;;  %s260_s18 = int_to_ptr.vmem [resolvable:$true] %s259_s18 }
  0x18   : > { %7802 = sst [smem:[#allocation23_spill]] %s7801_s12  ;;  %s4551_s23 = smov 256  }
  0x19   : > { %p4659_p10 = pnand %p4016_p9, %p53_p1  ;;  %s7806_s3 = sld [smem:[#allocation209_spill]] }
  0x1a   : > { %s257_s15 = sshll.u32 %s7803_s2, 4  ;;  %s4552_s24 = smov 16   ;;  %s258_s15 = int_to_ptr.hbm [resolvable:$true] %s257_s15 }
  0x1b   : > { %4019 = dma.hbm_to_vmem [thread:$0]  (!%p4659_p10), %s258_s15, 4096, %s260_s18, [#allocation6], %s4551_s23, %s4551_s23, %s4552_s24  }
  0x1c   : > { %s4553_s25 = smov [#allocation8]   ;;  %s7609_s10 = smov 128  }
  0x1d   : > { %s273_s26 = sshll.u32 %s4553_s25, 4  ;;  %s7610_s13 = smov 8   ;;  %s274_s26 = int_to_ptr.vmem [resolvable:$true] %s273_s26 }
  0x1e   : > { %s7807_s5 = sld [smem:[#allocation210_spill]]  ;;  %s4556_s18 = smov [#allocation10]  }
  0x1f   : > { %s271_s22 = sshll.u32 %s7806_s3, 4  ;;  %s290_s20 = sshll.u32 %s4556_s18, 4  ;;  %s272_s22 = int_to_ptr.hbm [resolvable:$true] %s271_s22  ;;  %s291_s20 = int_to_ptr.vmem [resolvable:$true] %s290_s20 }
  0x20   : > { %4022 = dma.hbm_to_vmem [thread:$0]  (!%p4659_p10), %s272_s22, 4096, %s274_s26, [#allocation9], %s7609_s10, %s7609_s10, %s7610_s13  }
  0x21   : > { %s7607_s21 = smov 384   ;;  %s7608_s23 = smov 24  }
  0x22   : > { %s4683_s22 = sadd.s32 1, %s4548_s30   ;;  %s39_s25 = sadd.s32 1, %s4544_s29 }
  0x23   : > { %7808 = sst [smem:[#allocation24_spill]] %s4683_s22  ;;  %s36_s24 = ssub.s32 %s4548_s30, %s4683_s22 }
  0x24   : > { %s288_s15 = sshll.u32 %s7807_s5, 4  ;;  %p37_p12 = scmp.eq.s32.totalorder %s36_s24, 0  ;;  %s289_s15 = int_to_ptr.hbm [resolvable:$true] %s288_s15 }
  0x25   : > { %4025 = dma.hbm_to_vmem [thread:$0]  (!%p4659_p10), %s289_s15, 6144, %s291_s20, [#allocation9], %s7607_s21, %s7607_s21, %s7608_s23  }
  0x26   : > { %p46_p13 = scmp.ne.s32.totalorder %s4544_s29, %s4540_s28  ;;  %p47_p0 = scmp.eq.s32.totalorder %s4548_s30, 0 }
  0x27   : > { %p4043_p3 = scmp.lt.s32.totalorder %s4548_s30, 2  ;;  %s4702_s14 = sand.u32 1, %s4544_s29  }
  0x28   : > { %s4693_s26 = scalar_select %p37_p12, %s4544_s29, %s39_s25  }
  0x29   : > { %p48_p5 = por %p47_p0, %p46_p13  ;;  %p4697_p7 = por %p207_p2, %p46_p13 }
  0x2a   : > { %7809 = sst [smem:[#allocation25_spill]] %s4693_s26  ;;  %s3942_s17 = sshll.u32 %s4548_s30, 8 }
  0x2b   : > { %s3890_s15 = sshll.u32 %s4702_s14, 8  ;;  %s316_s24 = scalar_lea.hbm %s7598_s0, %s3942_s17 }
  0x2c   : > { %s317_s21 = sshll.u32 %s316_s24, 4  ;;  %s311_s25 = scalar_lea.vmem [#allocation2], %s3890_s15  ;;  %s318_s21 = int_to_ptr.hbm [resolvable:$true] %s317_s21 }
  0x2d   : > { %s319_s23 = sshll.u32 %s311_s25, 4  ;;  %p4711_p2 = pnand %p4043_p3, %p48_p5  ;;  %s320_s23 = int_to_ptr.vmem [resolvable:$true] %s319_s23 }
  0x2e   : > { %s329_s13 = sand.u32 1, %s4548_s30   ;;  %s3992_s2 = smul.u32 768, %s4702_s14 }
  0x2f   : > { %s3993_s3 = smul.u32 768, %s4548_s30  ;;  %s308_s5 = scalar_lea.sflag [#allocation3], %s4702_s14 }
  0x30   : > { %s4378_s26 = sshra.s32 %s318_s21, 4  ;;  %p4382_p10 = pneg %p4711_p2  ;;  %s4379_s26 = int_to_ptr.hbm [resolvable:$true] %s4378_s26 }
  0x31   : > { %s4380_s18 = scalar_lea.hbm %s4379_s26, 256  ;;  %s4385_s20 = scalar_lea.hbm %s7598_s0, 512 }
  0x32   : > { %p4381_p9 = scmp.ne.s32.totalorder %s4379_s26, %s4380_s18  ;;  %p4386_p0 = scmp.lt.s32.totalorder %s4379_s26, %s7598_s0 }
  0x33   : > { %p4387_p3 = scmp.lt.s32.totalorder %s4385_s20, %s4380_s18 }
  0x34   : > { %p4383_p12 = pnand %p4382_p10, %p4381_p9 }
  0x35   : > { %p4388_p5 = por %p4387_p3, %p4386_p0 }
  0x36   : > { %p4384_p13 = pneg %p4383_p12 }
  0x38   : > { %p4389_p11 = pnand %p4388_p5, %p4384_p13 }
  0x3a   : > { %4392 = shalt.err (!%p4389_p11)
}
  0x3b   : > { %s7812_s14 = smov 8   ;;  %s7813_s29 = smov 128  }
  0x3c   : > { %4029 = dma.hbm_to_vmem [thread:$0]  (!%p4711_p2), %s318_s21, 4096, %s320_s23, %s308_s5, %s7813_s29, %s7813_s29, %s7812_s14  }
  0x3d   : > { %s339_s17 = scalar_lea.hbm %s7599_s1, %s3993_s3  ;;  %s333_s12 = scalar_lea.vmem [#allocation5], %s3992_s2 }
  0x3e   : > { %s340_s15 = sshll.u32 %s339_s17, 4  ;;  %s342_s27 = sshll.u32 %s333_s12, 4  ;;  %s341_s15 = int_to_ptr.hbm [resolvable:$true] %s340_s15  ;;  %s343_s27 = int_to_ptr.vmem [resolvable:$true] %s342_s27 }
  0x3f   : > { %s330_s26 = scalar_lea.sflag [#allocation6], %s329_s13  ;;  %s4408_s18 = sshra.s32 %s341_s15, 4  ;;  %s4409_s18 = int_to_ptr.hbm [resolvable:$true] %s4408_s18 }
  0x40   : > { %s4410_s20 = scalar_lea.hbm %s4409_s18, 768  ;;  %s4415_s29 = scalar_lea.hbm %s7599_s1, 1536 }
  0x41   : > { %p4411_p11 = scmp.ne.s32.totalorder %s4409_s18, %s4410_s20  ;;  %p4416_p13 = scmp.lt.s32.totalorder %s4409_s18, %s7599_s1 }
  0x42   : > { %p4417_p0 = scmp.lt.s32.totalorder %s4415_s29, %s4410_s20 }
  0x43   : > { %p4413_p9 = pnand %p4411_p11, %p4382_p10 }
  0x44   : > { %p4418_p3 = por %p4417_p0, %p4416_p13 }
  0x45   : > { %p4414_p12 = pneg %p4413_p9 }
  0x47   : > { %p4419_p5 = pnand %p4418_p3, %p4414_p12 }
  0x49   : > { %4422 = shalt.err (!%p4419_p5)
}
  0x4a   : > { %s7814_s2 = smov 24   ;;  %s7815_s12 = smov 384  }
  0x4b   : > { %4032 = dma.hbm_to_vmem [thread:$0]  (!%p4711_p2), %s341_s15, 12288, %s343_s27, %s330_s26, %s7815_s12, %s7815_s12, %s7814_s2  }
  0x4c   : > { %354 = sbr.rel (%p4651_p8) target bundleno = 1142 (0x476), region = 48 }
  0x51   : > { %s4755_s13 = sand.u32 1, %s4540_s28  }
  0x52   : > { %s3897_s21 = sshll.u32 %s4755_s13, 8  ;;  %s357_s23 = scalar_lea.sflag [#allocation3], %s4755_s13 }
  0x53   : > { %s4761_s22 = scalar_lea.vmem [#allocation2], %s3897_s21 }
  0x54   : > { %4511 = dma.done.wait (%p4638_p4), %s357_s23, 4096  }
  0x55   : > { %4513 = vsyncadd (%p4638_p4), %s357_s23, 4294963200  ;;  %s366_s27 = sand.u32 1, %s4629_s9   ;;  %s3994_s16 = smul.u32 768, %s4755_s13 }
  0x56   : > { %s367_s10 = scalar_lea.sflag [#allocation6], %s366_s27 }
  0x57   : > { %s4771_s25 = scalar_lea.vmem [#allocation5], %s3994_s16 }
  0x58   : > { %4515 = dma.done.wait (%p4638_p4), %s367_s10, 12288  }
  0x59   : > { %4517 = vsyncadd (%p4638_p4), %s367_s10, 4294955008 }
  0x5a   : > { %4519 = dma.done.wait (%p53_p1), [#allocation6], 4096  }
  0x5b   : > { %4521 = vsyncadd (%p53_p1), [#allocation6], 4294963200 }
  0x5c   : > { %4523 = dma.done.wait (%p53_p1), [#allocation9], 10240  }
  0x5d   : > { %4525 = vsyncadd (%p53_p1), [#allocation9], 4294957056  ;;  %v4785_v0 = vld [vmem:[#allocation7 + $0xf0] sm:$0xff]  ;;  %v4787_v1 = vld [vmem:[#allocation7 + $0xe0] sm:$0xff]  ;;  %s6848_s20 = scalar_lea.vmem [#allocation11], %s3897_s21  ;;  %s6860_s24 = scalar_lea.vmem [#allocation12], %s3994_s16 }
  0x5e   : > { %3944 = vmatpush.msra.mxu3 %v4785_v0  ;;  %529 = vmatpush.msra.mxu0 %v4785_v0  ;;  %v4791_v2 = vld [vmem:[#allocation7 + $0xf8] sm:$0xff]  ;;  %v4793_v3 = vld [vmem:[#allocation7 + $0xd0] sm:$0xff]  ;;  %v4796_v4 = vld [vmem:[#allocation7 + $0xe8] sm:$0xff]  ;;  %s3943_s30 = sshll.u32 %s4629_s9, 8  ;;  %s3995_s21 = smul.u32 768, %s4629_s9 }
  0x5f   : > { %642 = vmatpush.msra.mxu1 %v4791_v2  ;;  %851 = vmatpush.msra.mxu2 %v4785_v0  ;;  %v4801_v5 = vld [vmem:[#allocation7 + $0xd8] sm:$0xff]  ;;  %v4803_v6 = vld [vmem:[#allocation7 + $0xc0] sm:$0xff]  ;;  %v4809_v7 = vld [vmem:[#allocation7 + $0xc8] sm:$0xff]  ;;  %s3705_s12 = scalar_lea.hbm %s7605_s7, %s3943_s30  ;;  %s3706_s23 = sshll.u32 %s6848_s20, 4  ;;  %s7541_s23 = int_to_ptr.vmem [resolvable:$true] %s3706_s23 }
  0x60   : > { %3945 = vmatpush.msra.mxu3 %v4787_v1  ;;  %530 = vmatpush.msra.mxu0 %v4787_v1  ;;  %v4811_v8 = vld [vmem:[#allocation7 + $0xb0] sm:$0xff]  ;;  %v4817_v9 = vld [vmem:[#allocation7 + $0xb8] sm:$0xff]  ;;  %v4819_v10 = vld [vmem:[#allocation7 + $0xa0] sm:$0xff]  ;;  %s7538_s9 = scalar_lea.hbm %s7606_s8, %s3995_s21  ;;  %s3724_s10 = sshll.u32 %s6860_s24, 4  ;;  %s3725_s10 = int_to_ptr.vmem [resolvable:$true] %s3724_s10 }
  0x61   : > { %643 = vmatpush.msra.mxu1 %v4796_v4  ;;  %852 = vmatpush.msra.mxu2 %v4787_v1  ;;  %v4825_v11 = vld [vmem:[#allocation7 + $0xa8] sm:$0xff]  ;;  %v4827_v12 = vld [vmem:[#allocation7 + $0x90] sm:$0xff]  ;;  %v4833_v13 = vld [vmem:[#allocation7 + $0x98] sm:$0xff]  ;;  %s3689_s11 = scalar_lea.sflag [#allocation4], %s4755_s13  ;;  %s4458_s18 = scalar_lea.hbm %s7605_s7, 512 }
  0x62   : > { %3946 = vmatpush.msra.mxu3 %v4793_v3  ;;  %531 = vmatpush.msra.mxu0 %v4793_v3  ;;  %v4835_v14 = vld [vmem:[#allocation7 + $0x80] sm:$0xff]  ;;  %v4841_v15 = vld [vmem:[#allocation7 + $0x88] sm:$0xff]  ;;  %v4843_v16 = vld [vmem:[#allocation7 + $0x70] sm:$0xff] }
  0x63   : > { %644 = vmatpush.msra.mxu1 %v4801_v5  ;;  %853 = vmatpush.msra.mxu2 %v4793_v3  ;;  %v4849_v17 = vld [vmem:[#allocation7 + $0x78] sm:$0xff]  ;;  %v4851_v18 = vld [vmem:[#allocation7 + $0x60] sm:$0xff]  ;;  %v4857_v19 = vld [vmem:[#allocation7 + $0x68] sm:$0xff] }
  0x64   : > { %3947 = vmatpush.msra.mxu3 %v4803_v6  ;;  %532 = vmatpush.msra.mxu0 %v4803_v6  ;;  %v4859_v20 = vld [vmem:[#allocation7 + $0x50] sm:$0xff]  ;;  %v4865_v21 = vld [vmem:[#allocation7 + $0x58] sm:$0xff]  ;;  %v4867_v22 = vld [vmem:[#allocation7 + $0x40] sm:$0xff] }
  0x65   : > { %645 = vmatpush.msra.mxu1 %v4809_v7  ;;  %854 = vmatpush.msra.mxu2 %v4803_v6  ;;  %v4873_v23 = vld [vmem:[#allocation7 + $0x48] sm:$0xff]  ;;  %v4875_v24 = vld [vmem:[#allocation7 + $0x30] sm:$0xff]  ;;  %v4881_v25 = vld [vmem:[#allocation7 + $0x38] sm:$0xff] }
  0x66   : > { %3948 = vmatpush.msra.mxu3 %v4811_v8  ;;  %533 = vmatpush.msra.mxu0 %v4811_v8  ;;  %v4883_v26 = vld [vmem:[#allocation7 + $0x20] sm:$0xff]  ;;  %v4889_v27 = vld [vmem:[#allocation7 + $0x28] sm:$0xff]  ;;  %v4891_v28 = vld [vmem:[#allocation7 + $0x10] sm:$0xff] }
  0x67   : > { %646 = vmatpush.msra.mxu1 %v4817_v9  ;;  %855 = vmatpush.msra.mxu2 %v4811_v8  ;;  %v4897_v29 = vld [vmem:[#allocation7 + $0x18] sm:$0xff]  ;;  %v4899_v30 = vld [vmem:[#allocation7] sm:$0xff]  ;;  %v4908_v32 = vld [vmem:[#allocation7 + $0x8] sm:$0xff] }
  0x68   : > { %3949 = vmatpush.msra.mxu3 %v4819_v10  ;;  %534 = vmatpush.msra.mxu0 %v4819_v10  ;;  %v4905_v31 = vld [vmem:[%s4771_s25 + $0x240] sm:$0xff]  ;;  %v4923_v34 = vld [vmem:[%s4771_s25 + $0x258] sm:$0xff]  ;;  %v4939_v36 = vld [vmem:[%s4771_s25 + $0x270] sm:$0xff] }
  0x69   : > { %647 = vmatpush.msra.mxu1 %v4825_v11  ;;  %856 = vmatpush.msra.mxu2 %v4819_v10  ;;  %v497_v33 = vld [vmem:[%s4771_s25] sm:$0xff]  ;;  %v498_v35 = vld [vmem:[%s4771_s25 + $0x18] sm:$0xff]  ;;  %v499_v37 = vld [vmem:[%s4771_s25 + $0x30] sm:$0xff] }
  0x6a   : > { %3950 = vmatpush.msra.mxu3 %v4827_v12  ;;  %535 = vmatpush.msra.mxu0 %v4827_v12  ;;  %v4955_v38 = vld [vmem:[%s4771_s25 + $0x288] sm:$0xff]  ;;  %v4971_v40 = vld [vmem:[%s4771_s25 + $0x2a0] sm:$0xff]  ;;  %v4986_v42 = vld [vmem:[%s4771_s25 + $0x2b8] sm:$0xff] }
  0x6b   : > { %648 = vmatpush.msra.mxu1 %v4833_v13  ;;  %857 = vmatpush.msra.mxu2 %v4827_v12  ;;  %v500_v39 = vld [vmem:[%s4771_s25 + $0x48] sm:$0xff]  ;;  %v501_v41 = vld [vmem:[%s4771_s25 + $0x60] sm:$0xff]  ;;  %v502_v43 = vld [vmem:[%s4771_s25 + $0x78] sm:$0xff] }
  0x6c   : > { %3951 = vmatpush.msra.mxu3 %v4835_v14  ;;  %536 = vmatpush.msra.mxu0 %v4835_v14  ;;  %v527_v44 = vld [vmem:[%s4771_s25 + $0x2d0] sm:$0xff]  ;;  %v528_v46 = vld [vmem:[%s4771_s25 + $0x2e8] sm:$0xff]  ;;  %v505_v48 = vld [vmem:[%s4771_s25 + $0xc0] sm:$0xff] }
  0x6d   : > { %649 = vmatpush.msra.mxu1 %v4841_v15  ;;  %858 = vmatpush.msra.mxu2 %v4835_v14  ;;  %v503_v45 = vld [vmem:[%s4771_s25 + $0x90] sm:$0xff]  ;;  %v504_v47 = vld [vmem:[%s4771_s25 + $0xa8] sm:$0xff]  ;;  %v506_v49 = vld [vmem:[%s4771_s25 + $0xd8] sm:$0xff] }
  0x6e   : > { %3952 = vmatpush.msra.mxu3 %v4843_v16  ;;  %537 = vmatpush.msra.mxu0 %v4843_v16  ;;  %v507_v50 = vld [vmem:[%s4771_s25 + $0xf0] sm:$0xff]  ;;  %v508_v51 = vld [vmem:[%s4771_s25 + $0x108] sm:$0xff]  ;;  %v509_v52 = vld [vmem:[%s4771_s25 + $0x120] sm:$0xff] }
  0x6f   : > { %650 = vmatpush.msra.mxu1 %v4849_v17  ;;  %859 = vmatpush.msra.mxu2 %v4843_v16  ;;  %v510_v53 = vld [vmem:[%s4771_s25 + $0x138] sm:$0xff]  ;;  %v511_v54 = vld [vmem:[%s4771_s25 + $0x150] sm:$0xff]  ;;  %v512_v55 = vld [vmem:[%s4771_s25 + $0x168] sm:$0xff] }
  0x70   : > { %3953 = vmatpush.msra.mxu3 %v4851_v18  ;;  %538 = vmatpush.msra.mxu0 %v4851_v18  ;;  %v5042_v56 = vld [vmem:[%s4771_s25 + $0x248] sm:$0xff]  ;;  %v513_v57 = vld [vmem:[%s4771_s25 + $0x180] sm:$0xff]  ;;  %v2054_v62 = vld [vmem:[#allocation8 + $0x78] sm:$0xff] }
  0x71   : > { %651 = vmatpush.msra.mxu1 %v4857_v19  ;;  %860 = vmatpush.msra.mxu2 %v4851_v18  ;;  %v5053_v61 = vld [vmem:[%s4771_s25 + $0x8] sm:$0xff]  ;;  %v5057_v63 = vld [vmem:[%s4771_s25 + $0x260] sm:$0xff] }
  0x72   : > { %3954 = vmatpush.msra.mxu3 %v4859_v20  ;;  %539 = vmatpush.msra.mxu0 %v4859_v20 }
  0x73   : > { %652 = vmatpush.msra.mxu1 %v4865_v21  ;;  %861 = vmatpush.msra.mxu2 %v4859_v20 }
  0x74   : > { %3955 = vmatpush.msra.mxu3 %v4867_v22  ;;  %540 = vmatpush.msra.mxu0 %v4867_v22 }
  0x75   : > { %653 = vmatpush.msra.mxu1 %v4873_v23  ;;  %862 = vmatpush.msra.mxu2 %v4867_v22 }
  0x76   : > { %3956 = vmatpush.msra.mxu3 %v4875_v24  ;;  %541 = vmatpush.msra.mxu0 %v4875_v24 }
  0x77   : > { %654 = vmatpush.msra.mxu1 %v4881_v25  ;;  %863 = vmatpush.msra.mxu2 %v4875_v24 }
  0x78   : > { %3957 = vmatpush.msra.mxu3 %v4883_v26  ;;  %542 = vmatpush.msra.mxu0 %v4883_v26 }
  0x79   : > { %655 = vmatpush.msra.mxu1 %v4889_v27  ;;  %864 = vmatpush.msra.mxu2 %v4883_v26 }
  0x7a   : > { %3958 = vmatpush.msra.mxu3 %v4891_v28  ;;  %543 = vmatpush.msra.mxu0 %v4891_v28 }
  0x7b   : > { %656 = vmatpush.msra.mxu1 %v4897_v29  ;;  %865 = vmatpush.msra.mxu2 %v4891_v28 }
  0x7c   : > { %3959 = vmatpush.msra.mxu3 %v4899_v30  ;;  %544 = vmatpush.msra.mxu0 %v4899_v30 }
  0x7d   : > { %617 = vmatmul.f32.vlgmr.msra.gmra.mxu3 %v4905_v31  ;;  %657 = vmatpush.msra.mxu1 %v4908_v32 }
  0x7e   : > { %3960 = vmatpush.msrb.mxu3 %v4791_v2  ;;  %545 = vmatmul.f32.vlgmr.msra.gmra.mxu0 %v497_v33 }
  0x7f   : > { %658 = vmatmul.f32.vlgmr.msra.gmra.mxu1 %v497_v33  ;;  %866 = vmatpush.msra.mxu2 %v4899_v30  ;;  %v519_v33 = vld [vmem:[%s4771_s25 + $0x210] sm:$0xff] }
  0x80   : > { %3961 = vmatpush.msrb.mxu3 %v4796_v4  ;;  %1350 = vmatpush.msrb.mxu1 %v4791_v2 }
  0x81   : > { %1237 = vmatpush.msrb.mxu0 %v4785_v0  ;;  %867 = vmatmul.f32.vlgmr.msra.gmra.mxu2 %v5053_v61 }
  0x82   : > { %3962 = vmatpush.msrb.mxu3 %v4801_v5  ;;  %1351 = vmatpush.msrb.mxu1 %v4796_v4 }
  0x83   : > { %1238 = vmatpush.msrb.mxu0 %v4787_v1  ;;  %2075 = vmatpush.msrb.mxu2 %v2054_v62  ;;  %v1207_v62 = vld [vmem:[%s4771_s25 + $0x40] sm:$0xff] }
  0x84   : > { %3963 = vmatpush.msrb.mxu3 %v4809_v7  ;;  %1352 = vmatpush.msrb.mxu1 %v4801_v5 }
  0x85   : > { %620 = vmatmul.f32.gmra.mxu3 %v4923_v34  ;;  %1239 = vmatpush.msrb.mxu0 %v4793_v3 }
  0x86   : > { %548 = vmatmul.f32.gmra.mxu0 %v498_v35  ;;  %3964 = vmatpush.msrb.mxu3 %v4817_v9 }
  0x87   : > { %661 = vmatmul.f32.gmra.mxu1 %v498_v35  ;;  %1240 = vmatpush.msrb.mxu0 %v4803_v6  ;;  %v2069_v35 = vld [vmem:[#allocation8 + $0xf0] sm:$0xff] }
  0x88   : > { %3965 = vmatpush.msrb.mxu3 %v4825_v11  ;;  %1353 = vmatpush.msrb.mxu1 %v4809_v7 }
  0x89   : > { %1241 = vmatpush.msrb.mxu0 %v4811_v8 }
  0x8a   : > { %3966 = vmatpush.msrb.mxu3 %v4833_v13  ;;  %1354 = vmatpush.msrb.mxu1 %v4817_v9 }
  0x8b   : > { %1242 = vmatpush.msrb.mxu0 %v4819_v10 }
  0x8c   : > { %3967 = vmatpush.msrb.mxu3 %v4841_v15  ;;  %1355 = vmatpush.msrb.mxu1 %v4825_v11 }
  0x8d   : > { %623 = vmatmul.f32.gmra.mxu3 %v4939_v36  ;;  %1243 = vmatpush.msrb.mxu0 %v4827_v12 }
  0x8e   : > { %551 = vmatmul.f32.gmra.mxu0 %v499_v37  ;;  %3968 = vmatpush.msrb.mxu3 %v4849_v17 }
  0x8f   : > { %664 = vmatmul.f32.gmra.mxu1 %v499_v37  ;;  %1244 = vmatpush.msrb.mxu0 %v4835_v14  ;;  %v5139_v37 = vld [vmem:[%s4771_s25 + $0x98] sm:$0xff] }
  0x90   : > { %3969 = vmatpush.msrb.mxu3 %v4857_v19  ;;  %1356 = vmatpush.msrb.mxu1 %v4833_v13 }
  0x91   : > { %1245 = vmatpush.msrb.mxu0 %v4843_v16 }
  0x92   : > { %3970 = vmatpush.msrb.mxu3 %v4865_v21  ;;  %1357 = vmatpush.msrb.mxu1 %v4841_v15 }
  0x93   : > { %1246 = vmatpush.msrb.mxu0 %v4851_v18 }
  0x94   : > { %3971 = vmatpush.msrb.mxu3 %v4873_v23  ;;  %1358 = vmatpush.msrb.mxu1 %v4849_v17 }
  0x95   : > { %626 = vmatmul.f32.gmra.mxu3 %v4955_v38  ;;  %1247 = vmatpush.msrb.mxu0 %v4859_v20 }
  0x96   : > { %554 = vmatmul.f32.gmra.mxu0 %v500_v39  ;;  %3972 = vmatpush.msrb.mxu3 %v4881_v25 }
  0x97   : > { %667 = vmatmul.f32.gmra.mxu1 %v500_v39  ;;  %1248 = vmatpush.msrb.mxu0 %v4867_v22 }
  0x98   : > { %3973 = vmatpush.msrb.mxu3 %v4889_v27  ;;  %1359 = vmatpush.msrb.mxu1 %v4857_v19 }
  0x99   : > { %1249 = vmatpush.msrb.mxu0 %v4875_v24 }
  0x9a   : > { %3974 = vmatpush.msrb.mxu3 %v4897_v29  ;;  %1360 = vmatpush.msrb.mxu1 %v4865_v21 }
  0x9b   : > { %1250 = vmatpush.msrb.mxu0 %v4883_v26 }
  0x9c   : > { %3975 = vmatpush.msrb.mxu3 %v4908_v32  ;;  %1361 = vmatpush.msrb.mxu1 %v4873_v23 }
  0x9d   : > { %629 = vmatmul.f32.gmra.mxu3 %v4971_v40  ;;  %1251 = vmatpush.msrb.mxu0 %v4891_v28 }
  0x9e   : > { %557 = vmatmul.f32.gmra.mxu0 %v501_v41  ;;  %3976 = vmatpush.msra.mxu3 %v4785_v0  ;;  %v514_v0 = vld [vmem:[%s4771_s25 + $0x198] sm:$0xff] }
  0x9f   : > { %670 = vmatmul.f32.gmra.mxu1 %v501_v41  ;;  %1252 = vmatpush.msrb.mxu0 %v4899_v30  ;;  %v520_v41 = vld [vmem:[%s4771_s25 + $0x228] sm:$0xff] }
  0xa0   : > { %3977 = vmatpush.msra.mxu3 %v4787_v1  ;;  %1362 = vmatpush.msrb.mxu1 %v4881_v25 }
  0xa2   : > { %3978 = vmatpush.msra.mxu3 %v4793_v3  ;;  %1363 = vmatpush.msrb.mxu1 %v4889_v27  ;;  %v5066_v3 = vld [vmem:[%s4771_s25 + $0x20] sm:$0xff] }
  0xa3   : > { %870 = vmatmul.f32.gmra.mxu2 %v5066_v3 }
  0xa4   : > { %3979 = vmatpush.msra.mxu3 %v4803_v6  ;;  %1364 = vmatpush.msrb.mxu1 %v4897_v29  ;;  %v515_v6 = vld [vmem:[%s4771_s25 + $0x1b0] sm:$0xff] }
  0xa5   : > { %632 = vmatmul.f32.gmra.mxu3 %v4986_v42 }
  0xa6   : > { %560 = vmatmul.f32.gmra.mxu0 %v502_v43  ;;  %3980 = vmatpush.msra.mxu3 %v4811_v8  ;;  %v2053_v8 = vld [vmem:[#allocation8 + $0x70] sm:$0xff] }
  0xa7   : > { %673 = vmatmul.f32.gmra.mxu1 %v502_v43  ;;  %2076 = vmatpush.msrb.mxu2 %v2053_v8 }
  0xa8   : > { %3981 = vmatpush.msra.mxu3 %v4819_v10  ;;  %1365 = vmatpush.msrb.mxu1 %v4908_v32  ;;  %v5081_v10 = vld [vmem:[%s4771_s25 + $0x38] sm:$0xff] }
  0xaa   : > { %3982 = vmatpush.msra.mxu3 %v4827_v12  ;;  %v516_v12 = vld [vmem:[%s4771_s25 + $0x1c8] sm:$0xff] }
  0xab   : > { %873 = vmatmul.f32.gmra.mxu2 %v5081_v10 }
  0xac   : > { %3983 = vmatpush.msra.mxu3 %v4835_v14 }
  0xad   : > { %635 = vmatmul.f32.gmra.mxu3 %v527_v44 }
  0xae   : > { %563 = vmatmul.f32.gmra.mxu0 %v503_v45  ;;  %3984 = vmatpush.msra.mxu3 %v4843_v16  ;;  %v5096_v16 = vld [vmem:[%s4771_s25 + $0x50] sm:$0xff] }
  0xaf   : > { %676 = vmatmul.f32.gmra.mxu1 %v503_v45  ;;  %v1205_v45 = vld [vmem:[%s4771_s25 + $0x10] sm:$0xff] }
  0xb0   : > { %3985 = vmatpush.msra.mxu3 %v4851_v18  ;;  %v5100_v18 = vld [vmem:[%s4771_s25 + $0x2a8] sm:$0xff] }
  0xb2   : > { %3986 = vmatpush.msra.mxu3 %v4859_v20 }
  0xb3   : > { %876 = vmatmul.f32.gmra.mxu2 %v5096_v16 }
  0xb4   : > { %3987 = vmatpush.msra.mxu3 %v4867_v22 }
  0xb5   : > { %638 = vmatmul.f32.gmra.mxu3 %v528_v46 }
  0xb6   : > { %566 = vmatmul.f32.gmra.mxu0 %v504_v47  ;;  %3988 = vmatpush.msra.mxu3 %v4875_v24  ;;  %v5111_v24 = vld [vmem:[%s4771_s25 + $0x68] sm:$0xff] }
  0xb7   : > { %679 = vmatmul.f32.gmra.mxu1 %v504_v47 }
  0xb8   : > { %3989 = vmatpush.msra.mxu3 %v4883_v26  ;;  %v518_v26 = vld [vmem:[%s4771_s25 + $0x1f8] sm:$0xff] }
  0xba   : > { %3990 = vmatpush.msra.mxu3 %v4891_v28  ;;  %v2051_v28 = vld [vmem:[#allocation8 + $0x60] sm:$0xff] }
  0xbb   : > { %879 = vmatmul.f32.gmra.mxu2 %v5111_v24 }
  0xbc   : > { %3991 = vmatpush.msra.mxu3 %v4899_v30 }
  0xbd   : > { %730 = vmatmul.f32.vlgmr.msrb.gmra.mxu3 %v4905_v31  ;;  %v5126_v31 = vld [vmem:[%s4771_s25 + $0x80] sm:$0xff] }
  0xbe   : > { %569 = vmatmul.f32.gmra.mxu0 %v505_v48  ;;  %964 = vmatpush.msrb.mxu3 %v4791_v2 }
  0xbf   : > { %682 = vmatmul.f32.gmra.mxu1 %v505_v48  ;;  %v2068_v48 = vld [vmem:[#allocation8 + $0xe8] sm:$0xff] }
  0xc0   : > { %965 = vmatpush.msrb.mxu3 %v4796_v4 }
  0xc2   : > { %966 = vmatpush.msrb.mxu3 %v4801_v5  ;;  %v5072_v5 = vld [vmem:[%s4771_s25 + $0x278] sm:$0xff] }
  0xc3   : > { %882 = vmatmul.f32.gmra.mxu2 %v5126_v31 }
  0xc4   : > { %967 = vmatpush.msrb.mxu3 %v4809_v7 }
  0xc5   : > { %733 = vmatmul.f32.gmra.mxu3 %v4923_v34 }
  0xc6   : > { %572 = vmatmul.f32.gmra.mxu0 %v506_v49  ;;  %968 = vmatpush.msrb.mxu3 %v4817_v9 }
  0xc7   : > { %685 = vmatmul.f32.gmra.mxu1 %v506_v49  ;;  %v2049_v49 = vld [vmem:[#allocation8 + $0x50] sm:$0xff] }
  0xc8   : > { %969 = vmatpush.msrb.mxu3 %v4825_v11  ;;  %v5085_v11 = vld [vmem:[%s4771_s25 + $0x290] sm:$0xff] }
  0xca   : > { %970 = vmatpush.msrb.mxu3 %v4833_v13 }
  0xcb   : > { %885 = vmatmul.f32.gmra.mxu2 %v5139_v37 }
  0xcc   : > { %971 = vmatpush.msrb.mxu3 %v4841_v15 }
  0xcd   : > { %736 = vmatmul.f32.gmra.mxu3 %v4939_v36 }
  0xce   : > { %575 = vmatmul.f32.gmra.mxu0 %v507_v50  ;;  %972 = vmatpush.msrb.mxu3 %v4849_v17  ;;  %v2052_v17 = vld [vmem:[#allocation8 + $0x68] sm:$0xff] }
  0xcf   : > { %688 = vmatmul.f32.gmra.mxu1 %v507_v50  ;;  %2077 = vmatpush.msrb.mxu2 %v2052_v17  ;;  %v1208_v17 = vld [vmem:[%s4771_s25 + $0x58] sm:$0xff] }
  0xd0   : > { %973 = vmatpush.msrb.mxu3 %v4857_v19  ;;  %v517_v19 = vld [vmem:[%s4771_s25 + $0x1e0] sm:$0xff] }
  0xd1   : > { %2078 = vmatpush.msrb.mxu2 %v2051_v28 }
  0xd2   : > { %974 = vmatpush.msrb.mxu3 %v4865_v21  ;;  %v2070_v21 = vld [vmem:[#allocation8 + $0xf8] sm:$0xff] }
  0xd4   : > { %975 = vmatpush.msrb.mxu3 %v4873_v23 }
  0xd5   : > { %739 = vmatmul.f32.gmra.mxu3 %v4955_v38  ;;  %v2050_v38 = vld [vmem:[#allocation8 + $0x58] sm:$0xff] }
  0xd6   : > { %578 = vmatmul.f32.gmra.mxu0 %v508_v51  ;;  %976 = vmatpush.msrb.mxu3 %v4881_v25  ;;  %v5114_v25 = vld [vmem:[%s4771_s25 + $0x2c0] sm:$0xff] }
  0xd7   : > { %691 = vmatmul.f32.gmra.mxu1 %v508_v51  ;;  %2079 = vmatpush.msrb.mxu2 %v2050_v38  ;;  %v5166_v51 = vld [vmem:[%s4771_s25 + $0xc8] sm:$0xff] }
  0xd8   : > { %977 = vmatpush.msrb.mxu3 %v4889_v27 }
  0xd9   : > { %2080 = vmatpush.msrb.mxu2 %v2049_v49 }
  0xda   : > { %978 = vmatpush.msrb.mxu3 %v4897_v29 }
  0xdc   : > { %979 = vmatpush.msrb.mxu3 %v4908_v32  ;;  %v5129_v32 = vld [vmem:[%s4771_s25 + $0x2d8] sm:$0xff] }
  0xdd   : > { %742 = vmatmul.f32.gmra.mxu3 %v4971_v40  ;;  %v5144_v40 = vld [vmem:[%s4771_s25 + $0x2f0] sm:$0xff] }
  0xde   : > { %581 = vmatmul.f32.gmra.mxu0 %v509_v52 }
  0xdf   : > { %694 = vmatmul.f32.gmra.mxu1 %v509_v52  ;;  %v1206_v52 = vld [vmem:[%s4771_s25 + $0x28] sm:$0xff] }
  0xe5   : > { %745 = vmatmul.f32.gmra.mxu3 %v4986_v42 }
  0xe6   : > { %584 = vmatmul.f32.gmra.mxu0 %v510_v53 }
  0xe7   : > { %697 = vmatmul.f32.gmra.mxu1 %v510_v53 }
  0xed   : > { %748 = vmatmul.f32.gmra.mxu3 %v527_v44  ;;  %v5154_v44 = vld [vmem:[%s4771_s25 + $0xb0] sm:$0xff] }
  0xee   : > { %587 = vmatmul.f32.gmra.mxu0 %v511_v54  ;;  %888 = vmatmul.f32.gmra.mxu2 %v5154_v44 }
  0xef   : > { %700 = vmatmul.f32.gmra.mxu1 %v511_v54 }
  0xf5   : > { %751 = vmatmul.f32.gmra.mxu3 %v528_v46 }
  0xf6   : > { %590 = vmatmul.f32.gmra.mxu0 %v512_v55  ;;  %891 = vmatmul.f32.gmra.mxu2 %v5166_v51 }
  0xf7   : > { %703 = vmatmul.f32.gmra.mxu1 %v512_v55 }
  0xfb   : > { %v5050_v60 = vpop.f32.mrf.mxu0 }
  0xfc   : > { %v5045_v58 = vpop.f32.mrf.mxu1  ;;  %7818 = vst [vmem:[#allocation28_spill] sm:$0xff] %v5050_v60  ;;  %v5314_v60 = vld [vmem:[%s4771_s25 + $0x1e8] sm:$0xff] }
  0xfd   : > { %7816 = vst [vmem:[#allocation26_spill] sm:$0xff] %v5045_v58  ;;  %939 = vmatmul.f32.vlgmr.msra.gmra.mxu3 %v5042_v56 }
  0xfe   : > { %593 = vmatmul.f32.gmra.mxu0 %v513_v57  ;;  %2188 = vmatpush.msra.mxu3 %v2070_v21 }
  0xff   : > { %706 = vmatmul.f32.gmra.mxu1 %v513_v57  ;;  %v5178_v57 = vld [vmem:[%s4771_s25 + $0xe0] sm:$0xff] }
 0x100   : > { %v5048_v59 = vpop.f32.mrf.mxu3  ;;  %2189 = vmatpush.msra.mxu3 %v2069_v35  ;;  %894 = vmatmul.f32.gmra.mxu2 %v5178_v57 }
 0x101   : > { %7817 = vst [vmem:[#allocation27_spill] sm:$0xff] %v5048_v59 }
 0x102   : > { %2190 = vmatpush.msra.mxu3 %v2068_v48  ;;  %v1210_v48 = vld [vmem:[%s4771_s25 + $0x88] sm:$0xff] }
 0x103   : > { %v5069_v4 = vpop.f32.mrf.mxu0 }
 0x104   : > { %v5060_v1 = vpop.f32.mrf.mxu1  ;;  %7821 = vst [vmem:[#allocation31_spill] sm:$0xff] %v5069_v4 }
 0x105   : > { %7819 = vst [vmem:[#allocation29_spill] sm:$0xff] %v5060_v1  ;;  %942 = vmatmul.f32.gmra.mxu3 %v5057_v63 }
 0x106   : > { %596 = vmatmul.f32.gmra.mxu0 %v514_v0 }
 0x107   : > { %709 = vmatmul.f32.gmra.mxu1 %v514_v0 }
 0x108   : > { %v5063_v2 = vpop.f32.mrf.mxu3 }
 0x109   : > { %7820 = vst [vmem:[#allocation30_spill] sm:$0xff] %v5063_v2 }
 0x10b   : > { %v5088_v13 = vpop.f32.mrf.mxu0 }
 0x10c   : > { %v5075_v7 = vpop.f32.mrf.mxu1  ;;  %7824 = vst [vmem:[#allocation34_spill] sm:$0xff] %v5088_v13 }
 0x10d   : > { %7822 = vst [vmem:[#allocation32_spill] sm:$0xff] %v5075_v7  ;;  %945 = vmatmul.f32.gmra.mxu3 %v5072_v5 }
 0x10e   : > { %599 = vmatmul.f32.gmra.mxu0 %v515_v6 }
 0x10f   : > { %712 = vmatmul.f32.gmra.mxu1 %v515_v6 }
 0x110   : > { %v5078_v9 = vpop.f32.mrf.mxu3 }
 0x111   : > { %7823 = vst [vmem:[#allocation33_spill] sm:$0xff] %v5078_v9 }
 0x113   : > { %v5106_v22 = vpop.f32.mrf.mxu0 }
 0x114   : > { %v5090_v14 = vpop.f32.mrf.mxu1  ;;  %7828 = vst [vmem:[#allocation38_spill] sm:$0xff] %v5106_v22 }
 0x115   : > { %7825 = vst [vmem:[#allocation35_spill] sm:$0xff] %v5090_v14  ;;  %948 = vmatmul.f32.gmra.mxu3 %v5085_v11 }
 0x116   : > { %602 = vmatmul.f32.gmra.mxu0 %v516_v12 }
 0x117   : > { %715 = vmatmul.f32.gmra.mxu1 %v516_v12  ;;  %v5190_v12 = vld [vmem:[%s4771_s25 + $0xf8] sm:$0xff] }
 0x118   : > { %v5093_v15 = vpop.f32.mrf.mxu3  ;;  %897 = vmatmul.f32.gmra.mxu2 %v5190_v12 }
 0x119   : > { %7826 = vst [vmem:[#allocation36_spill] sm:$0xff] %v5093_v15 }
 0x11b   : > { %v5121_v29 = vpop.f32.mrf.mxu0 }
 0x11c   : > { %v5103_v20 = vpop.f32.mrf.mxu1  ;;  %7831 = vst [vmem:[#allocation41_spill] sm:$0xff] %v5121_v29  ;;  %v2042_v29 = vld [vmem:[#allocation8 + $0x18] sm:$0xff] }
 0x11d   : > { %7827 = vst [vmem:[#allocation37_spill] sm:$0xff] %v5103_v20  ;;  %951 = vmatmul.f32.gmra.mxu3 %v5100_v18 }
 0x11e   : > { %605 = vmatmul.f32.gmra.mxu0 %v517_v19 }
 0x11f   : > { %718 = vmatmul.f32.gmra.mxu1 %v517_v19 }
 0x120   : > { %v5108_v23 = vpop.f32.mrf.mxu3 }
 0x121   : > { %7829 = vst [vmem:[#allocation39_spill] sm:$0xff] %v5108_v23 }
 0x123   : > { %v5141_v39 = vpop.f32.mrf.mxu0 }
 0x124   : > { %v5118_v27 = vpop.f32.mrf.mxu1  ;;  %7835 = vst [vmem:[#allocation45_spill] sm:$0xff] %v5141_v39 }
 0x125   : > { %7830 = vst [vmem:[#allocation40_spill] sm:$0xff] %v5118_v27  ;;  %954 = vmatmul.f32.gmra.mxu3 %v5114_v25 }
 0x126   : > { %608 = vmatmul.f32.gmra.mxu0 %v518_v26 }
 0x127   : > { %721 = vmatmul.f32.gmra.mxu1 %v518_v26  ;;  %v5200_v26 = vld [vmem:[%s4771_s25 + $0x110] sm:$0xff] }
 0x128   : > { %v5123_v30 = vpop.f32.mrf.mxu3  ;;  %900 = vmatmul.f32.gmra.mxu2 %v5200_v26 }
 0x129   : > { %7832 = vst [vmem:[#allocation42_spill] sm:$0xff] %v5123_v30 }
 0x12b   : > { %v5158_v46 = vpop.f32.mrf.mxu0 }
 0x12c   : > { %v5133_v34 = vpop.f32.mrf.mxu1  ;;  %7838 = vst [vmem:[#allocation48_spill] sm:$0xff] %v5158_v46 }
 0x12d   : > { %7833 = vst [vmem:[#allocation43_spill] sm:$0xff] %v5133_v34  ;;  %957 = vmatmul.f32.gmra.mxu3 %v5129_v32 }
 0x12e   : > { %611 = vmatmul.f32.gmra.mxu0 %v519_v33 }
 0x12f   : > { %724 = vmatmul.f32.gmra.mxu1 %v519_v33  ;;  %v1209_v33 = vld [vmem:[%s4771_s25 + $0x70] sm:$0xff] }
 0x130   : > { %v5136_v36 = vpop.f32.mrf.mxu3 }
 0x131   : > { %7834 = vst [vmem:[#allocation44_spill] sm:$0xff] %v5136_v36  ;;  %v3018_v36 = vld [vmem:[#allocation10 + $0x168] sm:$0xff] }
 0x132   : > { %3029 = vmatpush.msra.mxu0 %v3018_v36  ;;  %v1224_v36 = vld [vmem:[%s4771_s25 + $0x1d8] sm:$0xff] }
 0x133   : > { %v5173_v54 = vpop.f32.mrf.mxu0 }
 0x134   : > { %v5148_v42 = vpop.f32.mrf.mxu1  ;;  %7840 = vst [vmem:[#allocation50_spill] sm:$0xff] %v5173_v54  ;;  %v2043_v54 = vld [vmem:[#allocation8 + $0x20] sm:$0xff] }
 0x135   : > { %7836 = vst [vmem:[#allocation46_spill] sm:$0xff] %v5148_v42  ;;  %960 = vmatmul.f32.gmra.mxu3 %v5144_v40 }
 0x136   : > { %614 = vmatmul.f32.gmra.mxu0 %v520_v41 }
 0x137   : > { %727 = vmatmul.f32.gmra.mxu1 %v520_v41  ;;  %v5212_v41 = vld [vmem:[%s4771_s25 + $0x128] sm:$0xff] }
 0x138   : > { %v5151_v43 = vpop.f32.mrf.mxu3  ;;  %903 = vmatmul.f32.gmra.mxu2 %v5212_v41 }
 0x139   : > { %7837 = vst [vmem:[#allocation47_spill] sm:$0xff] %v5151_v43 }
 0x13b   : > { %v5185_v6 = vpop.f32.mrf.mxu0 }
 0x13c   : > { %v5160_v47 = vpop.f32.mrf.mxu1  ;;  %7842 = vst [vmem:[#allocation52_spill] sm:$0xff] %v5185_v6 }
 0x13d   : > { %980 = vmatmul.f32.vlgmr.msrb.gmra.mxu3 %v5053_v61  ;;  %v2048_v61 = vld [vmem:[#allocation8 + $0x48] sm:$0xff] }
 0x13e   : > { %1253 = vmatmul.f32.vlgmr.msrb.gmra.mxu0 %v1205_v45  ;;  %2081 = vmatpush.msrb.mxu2 %v2048_v61  ;;  %v5224_v61 = vld [vmem:[%s4771_s25 + $0x140] sm:$0xff] }
 0x13f   : > { %1366 = vmatmul.f32.vlgmr.msrb.gmra.mxu1 %v1205_v45  ;;  %v2046_v45 = vld [vmem:[#allocation8 + $0x38] sm:$0xff] }
 0x140   : > { %v5163_v50 = vpop.f32.mrf.mxu3  ;;  %906 = vmatmul.f32.gmra.mxu2 %v5224_v61 }
 0x143   : > { %v5202_v28 = vpop.f32.mrf.mxu0 }
 0x144   : > { %v5170_v53 = vpop.f32.mrf.mxu1  ;;  %7844 = vst [vmem:[#allocation54_spill] sm:$0xff] %v5202_v28 }
 0x145   : > { %7839 = vst [vmem:[#allocation49_spill] sm:$0xff] %v5170_v53  ;;  %983 = vmatmul.f32.gmra.mxu3 %v5066_v3  ;;  %v2067_v3 = vld [vmem:[#allocation8 + $0xe0] sm:$0xff] }
 0x146   : > { %1256 = vmatmul.f32.gmra.mxu0 %v1206_v52  ;;  %2191 = vmatpush.msra.mxu3 %v2067_v3 }
 0x147   : > { %1369 = vmatmul.f32.gmra.mxu1 %v1206_v52 }
 0x148   : > { %v5175_v55 = vpop.f32.mrf.mxu3 }
 0x14b   : > { %v5216_v49 = vpop.f32.mrf.mxu0 }
 0x14c   : > { %v5182_v0 = vpop.f32.mrf.mxu1  ;;  %7847 = vst [vmem:[#allocation57_spill] sm:$0xff] %v5216_v49 }
 0x14d   : > { %7841 = vst [vmem:[#allocation51_spill] sm:$0xff] %v5182_v0  ;;  %986 = vmatmul.f32.gmra.mxu3 %v5081_v10  ;;  %v2047_v10 = vld [vmem:[#allocation8 + $0x40] sm:$0xff] }
 0x14e   : > { %1259 = vmatmul.f32.gmra.mxu0 %v1207_v62  ;;  %2082 = vmatpush.msrb.mxu2 %v2047_v10  ;;  %v2045_v10 = vld [vmem:[#allocation8 + $0x30] sm:$0xff] }
 0x14f   : > { %1372 = vmatmul.f32.gmra.mxu1 %v1207_v62  ;;  %v1211_v62 = vld [vmem:[%s4771_s25 + $0xa0] sm:$0xff] }
 0x150   : > { %v5187_v8 = vpop.f32.mrf.mxu3  ;;  %2083 = vmatpush.msrb.mxu2 %v2046_v45  ;;  %v1212_v45 = vld [vmem:[%s4771_s25 + $0xb8] sm:$0xff] }
 0x152   : > { %2084 = vmatpush.msrb.mxu2 %v2045_v10  ;;  %v2044_v10 = vld [vmem:[#allocation8 + $0x28] sm:$0xff] }
 0x154   : > { %v5194_v19 = vpop.f32.mrf.mxu1  ;;  %2085 = vmatpush.msrb.mxu2 %v2044_v10  ;;  %v1214_v10 = vld [vmem:[%s4771_s25 + $0xe8] sm:$0xff] }
 0x155   : > { %7843 = vst [vmem:[#allocation53_spill] sm:$0xff] %v5194_v19  ;;  %989 = vmatmul.f32.gmra.mxu3 %v5096_v16  ;;  %v2066_v16 = vld [vmem:[#allocation8 + $0xd8] sm:$0xff] }
 0x156   : > { %1262 = vmatmul.f32.gmra.mxu0 %v1208_v17  ;;  %2192 = vmatpush.msra.mxu3 %v2066_v16  ;;  %v5236_v16 = vld [vmem:[%s4771_s25 + $0x158] sm:$0xff] }
 0x157   : > { %1375 = vmatmul.f32.gmra.mxu1 %v1208_v17  ;;  %v2065_v17 = vld [vmem:[#allocation8 + $0xd0] sm:$0xff]  ;;  %909 = vmatmul.f32.gmra.mxu2 %v5236_v16 }
 0x158   : > { %v5197_v21 = vpop.f32.mrf.mxu3  ;;  %2193 = vmatpush.msra.mxu3 %v2065_v17  ;;  %2086 = vmatpush.msrb.mxu2 %v2043_v54 }
 0x15a   : > { %2087 = vmatpush.msrb.mxu2 %v2042_v29  ;;  %v1217_v29 = vld [vmem:[%s4771_s25 + $0x130] sm:$0xff] }
 0x15c   : > { %v5206_v35 = vpop.f32.mrf.mxu1 }
 0x15d   : > { %7845 = vst [vmem:[#allocation55_spill] sm:$0xff] %v5206_v35  ;;  %992 = vmatmul.f32.gmra.mxu3 %v5111_v24 }
 0x15e   : > { %1265 = vmatmul.f32.gmra.mxu0 %v1209_v33 }
 0x15f   : > { %1378 = vmatmul.f32.gmra.mxu1 %v1209_v33  ;;  %v5231_v33 = vpop.f32.mrf.mxu0 }
 0x160   : > { %v5209_v38 = vpop.f32.mrf.mxu3  ;;  %7851 = vst [vmem:[#allocation61_spill] sm:$0xff] %v5231_v33  ;;  %v1213_v33 = vld [vmem:[%s4771_s25 + $0xd0] sm:$0xff] }
 0x161   : > { %7846 = vst [vmem:[#allocation56_spill] sm:$0xff] %v5209_v38 }
 0x164   : > { %v5218_v52 = vpop.f32.mrf.mxu1 }
 0x165   : > { %7848 = vst [vmem:[#allocation58_spill] sm:$0xff] %v5218_v52  ;;  %995 = vmatmul.f32.gmra.mxu3 %v5126_v31 }
 0x166   : > { %1268 = vmatmul.f32.gmra.mxu0 %v1210_v48 }
 0x167   : > { %1381 = vmatmul.f32.gmra.mxu1 %v1210_v48 }
 0x168   : > { %v5221_v24 = vpop.f32.mrf.mxu3 }
 0x169   : > { %7849 = vst [vmem:[#allocation59_spill] sm:$0xff] %v5221_v24 }
 0x16c   : > { %v5228_v3 = vpop.f32.mrf.mxu1 }
 0x16d   : > { %7850 = vst [vmem:[#allocation60_spill] sm:$0xff] %v5228_v3  ;;  %998 = vmatmul.f32.gmra.mxu3 %v5139_v37  ;;  %v5243_v37 = vpop.f32.mrf.mxu0 }
 0x16e   : > { %1271 = vmatmul.f32.gmra.mxu0 %v1211_v62  ;;  %7854 = vst [vmem:[#allocation64_spill] sm:$0xff] %v5243_v37  ;;  %v5258_v37 = vld [vmem:[%s4771_s25 + $0x188] sm:$0xff] }
 0x16f   : > { %1384 = vmatmul.f32.gmra.mxu1 %v1211_v62  ;;  %v5248_v62 = vld [vmem:[%s4771_s25 + $0x170] sm:$0xff] }
 0x170   : > { %v5233_v31 = vpop.f32.mrf.mxu3  ;;  %912 = vmatmul.f32.gmra.mxu2 %v5248_v62 }
 0x171   : > { %7852 = vst [vmem:[#allocation62_spill] sm:$0xff] %v5233_v31 }
 0x174   : > { %v5240_v48 = vpop.f32.mrf.mxu1 }
 0x175   : > { %7853 = vst [vmem:[#allocation63_spill] sm:$0xff] %v5240_v48  ;;  %1001 = vmatmul.f32.gmra.mxu3 %v5154_v44  ;;  %v2064_v44 = vld [vmem:[#allocation8 + $0xc8] sm:$0xff]  ;;  %v5260_v28 = vpop.f32.mrf.mxu0 }
 0x176   : > { %1274 = vmatmul.f32.gmra.mxu0 %v1212_v45  ;;  %2194 = vmatpush.msra.mxu3 %v2064_v44  ;;  %7858 = vst [vmem:[#allocation68_spill] sm:$0xff] %v5260_v28  ;;  %v5272_v44 = vld [vmem:[%s4771_s25 + $0x1a0] sm:$0xff] }
 0x177   : > { %1387 = vmatmul.f32.gmra.mxu1 %v1212_v45  ;;  %v1215_v28 = vld [vmem:[%s4771_s25 + $0x100] sm:$0xff] }
 0x178   : > { %v5245_v17 = vpop.f32.mrf.mxu3  ;;  %915 = vmatmul.f32.gmra.mxu2 %v5258_v37 }
 0x179   : > { %7855 = vst [vmem:[#allocation65_spill] sm:$0xff] %v5245_v17  ;;  %v1218_v17 = vld [vmem:[%s4771_s25 + $0x148] sm:$0xff] }
 0x17c   : > { %v5252_v49 = vpop.f32.mrf.mxu1 }
 0x17d   : > { %7856 = vst [vmem:[#allocation66_spill] sm:$0xff] %v5252_v49  ;;  %1004 = vmatmul.f32.gmra.mxu3 %v5166_v51  ;;  %v5267_v51 = vpop.f32.mrf.mxu2  ;;  %v5276_v46 = vpop.f32.mrf.mxu0 }
 0x17e   : > { %1277 = vmatmul.f32.gmra.mxu0 %v1213_v33  ;;  %7860 = vst [vmem:[#allocation70_spill] sm:$0xff] %v5267_v51  ;;  %v2063_v51 = vld [vmem:[#allocation8 + $0xc0] sm:$0xff] }
 0x17f   : > { %1390 = vmatmul.f32.gmra.mxu1 %v1213_v33  ;;  %7862 = vst [vmem:[#allocation72_spill] sm:$0xff] %v5276_v46  ;;  %2195 = vmatpush.msra.mxu3 %v2063_v51  ;;  %v1216_v46 = vld [vmem:[%s4771_s25 + $0x118] sm:$0xff]  ;;  %v5300_v51 = vld [vmem:[%s4771_s25 + $0x1d0] sm:$0xff] }
 0x180   : > { %v5255_v45 = vpop.f32.mrf.mxu3  ;;  %918 = vmatmul.f32.gmra.mxu2 %v5272_v44 }
 0x181   : > { %7857 = vst [vmem:[#allocation67_spill] sm:$0xff] %v5255_v45 }
 0x184   : > { %v5264_v6 = vpop.f32.mrf.mxu1 }
 0x185   : > { %7859 = vst [vmem:[#allocation69_spill] sm:$0xff] %v5264_v6  ;;  %1007 = vmatmul.f32.gmra.mxu3 %v5178_v57  ;;  %v5281_v39 = vpop.f32.mrf.mxu2  ;;  %v5293_v22 = vpop.f32.mrf.mxu0 }
 0x186   : > { %1280 = vmatmul.f32.gmra.mxu0 %v1214_v10  ;;  %7864 = vst [vmem:[#allocation74_spill] sm:$0xff] %v5281_v39 }
 0x187   : > { %1393 = vmatmul.f32.gmra.mxu1 %v1214_v10  ;;  %v5286_v10 = vld [vmem:[%s4771_s25 + $0x1b8] sm:$0xff]  ;;  %7867 = vst [vmem:[#allocation77_spill] sm:$0xff] %v5293_v22 }
 0x188   : > { %v5269_v33 = vpop.f32.mrf.mxu3  ;;  %921 = vmatmul.f32.gmra.mxu2 %v5286_v10 }
 0x189   : > { %7861 = vst [vmem:[#allocation71_spill] sm:$0xff] %v5269_v33 }
 0x18c   : > { %v5279_v57 = vpop.f32.mrf.mxu1 }
 0x18d   : > { %1010 = vmatmul.f32.gmra.mxu3 %v5190_v12  ;;  %7863 = vst [vmem:[#allocation73_spill] sm:$0xff] %v5279_v57  ;;  %v5291_v12 = vpop.f32.mrf.mxu2 }
 0x18e   : > { %1283 = vmatmul.f32.gmra.mxu0 %v1215_v28  ;;  %7866 = vst [vmem:[#allocation76_spill] sm:$0xff] %v5291_v12  ;;  %v2041_v12 = vld [vmem:[#allocation8 + $0x10] sm:$0xff] }
 0x18f   : > { %1396 = vmatmul.f32.gmra.mxu1 %v1215_v28  ;;  %2088 = vmatpush.msrb.mxu2 %v2041_v12 }
 0x190   : > { %v5283_v54 = vpop.f32.mrf.mxu3  ;;  %924 = vmatmul.f32.gmra.mxu2 %v5300_v51 }
 0x191   : > { %7865 = vst [vmem:[#allocation75_spill] sm:$0xff] %v5283_v54 }
 0x194   : > { %v5295_v39 = vpop.f32.mrf.mxu1 }
 0x195   : > { %1013 = vmatmul.f32.gmra.mxu3 %v5200_v26  ;;  %7868 = vst [vmem:[#allocation78_spill] sm:$0xff] %v5295_v39  ;;  %v2062_v26 = vld [vmem:[#allocation8 + $0xb8] sm:$0xff]  ;;  %v5305_v13 = vpop.f32.mrf.mxu2 }
 0x196   : > { %1286 = vmatmul.f32.gmra.mxu0 %v1216_v46  ;;  %7870 = vst [vmem:[#allocation80_spill] sm:$0xff] %v5305_v13  ;;  %2196 = vmatpush.msra.mxu3 %v2062_v26  ;;  %v5326_v26 = vld [vmem:[%s4771_s25 + $0x200] sm:$0xff] }
 0x197   : > { %1399 = vmatmul.f32.gmra.mxu1 %v1216_v46  ;;  %v5307_v46 = vpop.f32.mrf.mxu0  ;;  %v1219_v13 = vld [vmem:[%s4771_s25 + $0x160] sm:$0xff] }
 0x198   : > { %v5297_v28 = vpop.f32.mrf.mxu3  ;;  %7871 = vst [vmem:[#allocation81_spill] sm:$0xff] %v5307_v46  ;;  %927 = vmatmul.f32.gmra.mxu2 %v5314_v60 }
 0x199   : > { %7869 = vst [vmem:[#allocation79_spill] sm:$0xff] %v5297_v28 }
 0x19c   : > { %v5311_v4 = vpop.f32.mrf.mxu1 }
 0x19d   : > { %1016 = vmatmul.f32.gmra.mxu3 %v5212_v41  ;;  %7873 = vst [vmem:[#allocation83_spill] sm:$0xff] %v5311_v4  ;;  %v5319_v41 = vpop.f32.mrf.mxu2 }
 0x19e   : > { %1289 = vmatmul.f32.gmra.mxu0 %v1217_v29  ;;  %7874 = vst [vmem:[#allocation84_spill] sm:$0xff] %v5319_v41  ;;  %v2061_v41 = vld [vmem:[#allocation8 + $0xb0] sm:$0xff] }
 0x19f   : > { %1402 = vmatmul.f32.gmra.mxu1 %v1217_v29  ;;  %v5323_v12 = vpop.f32.mrf.mxu0  ;;  %2197 = vmatpush.msra.mxu3 %v2061_v41  ;;  %v5352_v41 = vld [vmem:[%s4771_s25 + $0x230] sm:$0xff] }
 0x1a0   : > { %v5309_v22 = vpop.f32.mrf.mxu3  ;;  %7876 = vst [vmem:[#allocation86_spill] sm:$0xff] %v5323_v12  ;;  %930 = vmatmul.f32.gmra.mxu2 %v5326_v26  ;;  %v5338_v12 = vld [vmem:[%s4771_s25 + $0x218] sm:$0xff] }
 0x1a1   : > { %7872 = vst [vmem:[#allocation82_spill] sm:$0xff] %v5309_v22 }
 0x1a4   : > { %v5328_v46 = vpop.f32.mrf.mxu1 }
 0x1a5   : > { %1019 = vmatmul.f32.gmra.mxu3 %v5224_v61  ;;  %7877 = vst [vmem:[#allocation87_spill] sm:$0xff] %v5328_v46  ;;  %v5333_v61 = vpop.f32.mrf.mxu2  ;;  %v1220_v46 = vld [vmem:[%s4771_s25 + $0x178] sm:$0xff] }
 0x1a6   : > { %1292 = vmatmul.f32.gmra.mxu0 %v1218_v17  ;;  %7878 = vst [vmem:[#allocation88_spill] sm:$0xff] %v5333_v61  ;;  %v2039_v61 = vld [vmem:[#allocation8] sm:$0xff] }
 0x1a7   : > { %1405 = vmatmul.f32.gmra.mxu1 %v1218_v17  ;;  %v2040_v17 = vld [vmem:[#allocation8 + $0x8] sm:$0xff]  ;;  %v5342_v31 = vpop.f32.mrf.mxu0 }
 0x1a8   : > { %v5321_v29 = vpop.f32.mrf.mxu3  ;;  %2089 = vmatpush.msrb.mxu2 %v2040_v17  ;;  %7880 = vst [vmem:[#allocation90_spill] sm:$0xff] %v5342_v31 }
 0x1a9   : > { %7875 = vst [vmem:[#allocation85_spill] sm:$0xff] %v5321_v29  ;;  %933 = vmatmul.f32.gmra.mxu2 %v5338_v12 }
 0x1aa   : > { %2090 = vmatpush.msrb.mxu2 %v2039_v61  ;;  %v433_v61 = vld [vmem:[%s4761_s22] sm:$0xff] }
 0x1ad   : > { %1022 = vmatmul.f32.gmra.mxu3 %v5236_v16  ;;  %v5344_v16 = vpop.f32.mrf.mxu1 }
 0x1ae   : > { %1295 = vmatmul.f32.gmra.mxu0 %v1219_v13  ;;  %7881 = vst [vmem:[#allocation91_spill] sm:$0xff] %v5344_v16 }
 0x1af   : > { %1408 = vmatmul.f32.gmra.mxu1 %v1219_v13  ;;  %v5347_v13 = vpop.f32.mrf.mxu2  ;;  %v5357_v31 = vpop.f32.mrf.mxu0 }
 0x1b0   : > { %v5335_v43 = vpop.f32.mrf.mxu3  ;;  %7882 = vst [vmem:[#allocation92_spill] sm:$0xff] %v5347_v13 }
 0x1b1   : > { %7879 = vst [vmem:[#allocation89_spill] sm:$0xff] %v5335_v43  ;;  %v1221_v43 = vld [vmem:[%s4771_s25 + $0x190] sm:$0xff]  ;;  %936 = vmatmul.f32.gmra.mxu2 %v5352_v41 }
 0x1b2   : > { %7884 = vst [vmem:[#allocation94_spill] sm:$0xff] %v5357_v31  ;;  %v3020_v31 = vld [vmem:[#allocation10 + $0x178] sm:$0xff] }
 0x1b3   : > { %3255 = vmatpush.msra.mxu2 %v3020_v31  ;;  %v435_v31 = vld [vmem:[%s4761_s22 + $0x10] sm:$0xff] }
 0x1b5   : > { %1025 = vmatmul.f32.gmra.mxu3 %v5248_v62  ;;  %v5361_v13 = vpop.f32.mrf.mxu1 }
 0x1b6   : > { %1298 = vmatmul.f32.gmra.mxu0 %v1220_v46  ;;  %7886 = vst [vmem:[#allocation96_spill] sm:$0xff] %v5361_v13 }
 0x1b7   : > { %1411 = vmatmul.f32.gmra.mxu1 %v1220_v46  ;;  %v5359_v62 = vpop.f32.mrf.mxu2  ;;  %v2060_v46 = vld [vmem:[#allocation8 + $0xa8] sm:$0xff]  ;;  %v5370_v13 = vpop.f32.mrf.mxu0 }
 0x1b8   : > { %v5349_v17 = vpop.f32.mrf.mxu3  ;;  %7885 = vst [vmem:[#allocation95_spill] sm:$0xff] %v5359_v62  ;;  %2198 = vmatpush.msra.mxu3 %v2060_v46  ;;  %v3019_v62 = vld [vmem:[#allocation10 + $0x170] sm:$0xff] }
 0x1b9   : > { %7883 = vst [vmem:[#allocation93_spill] sm:$0xff] %v5349_v17  ;;  %v1222_v17 = vld [vmem:[%s4771_s25 + $0x1a8] sm:$0xff]  ;;  %2091 = vmatmul.f32.vlgmr.msrb.gmra.mxu2 %v433_v61  ;;  %3142 = vmatpush.msra.mxu1 %v3019_v62 }
 0x1ba   : > { %7889 = vst [vmem:[#allocation99_spill] sm:$0xff] %v5370_v13  ;;  %v434_v61 = vld [vmem:[%s4761_s22 + $0x8] sm:$0xff] }
 0x1bd   : > { %1028 = vmatmul.f32.gmra.mxu3 %v5258_v37  ;;  %v5374_v46 = vpop.f32.mrf.mxu1 }
 0x1be   : > { %1301 = vmatmul.f32.gmra.mxu0 %v1221_v43  ;;  %7891 = vst [vmem:[#allocation101_spill] sm:$0xff] %v5374_v46 }
 0x1bf   : > { %1414 = vmatmul.f32.gmra.mxu1 %v1221_v43  ;;  %v5368_v37 = vpop.f32.mrf.mxu2  ;;  %v5383_v29 = vpop.f32.mrf.mxu0 }
 0x1c0   : > { %v5363_v16 = vpop.f32.mrf.mxu3  ;;  %7888 = vst [vmem:[#allocation98_spill] sm:$0xff] %v5368_v37  ;;  %v2059_v37 = vld [vmem:[#allocation8 + $0xa0] sm:$0xff] }
 0x1c1   : > { %7887 = vst [vmem:[#allocation97_spill] sm:$0xff] %v5363_v16  ;;  %2094 = vmatmul.f32.gmra.mxu2 %v434_v61  ;;  %2199 = vmatpush.msra.mxu3 %v2059_v37  ;;  %v3017_v61 = vld [vmem:[#allocation10 + $0x160] sm:$0xff]  ;;  %v436_v37 = vld [vmem:[%s4761_s22 + $0x18] sm:$0xff] }
 0x1c2   : > { %7894 = vst [vmem:[#allocation104_spill] sm:$0xff] %v5383_v29  ;;  %3256 = vmatpush.msra.mxu2 %v3017_v61  ;;  %v1225_v29 = vld [vmem:[%s4771_s25 + $0x1f0] sm:$0xff]  ;;  %v437_v61 = vld [vmem:[%s4761_s22 + $0x20] sm:$0xff] }
 0x1c5   : > { %1031 = vmatmul.f32.gmra.mxu3 %v5272_v44  ;;  %v1223_v44 = vld [vmem:[%s4771_s25 + $0x1c0] sm:$0xff]  ;;  %v5386_v62 = vpop.f32.mrf.mxu1 }
 0x1c6   : > { %1304 = vmatmul.f32.gmra.mxu0 %v1222_v17  ;;  %7895 = vst [vmem:[#allocation105_spill] sm:$0xff] %v5386_v62 }
 0x1c7   : > { %1417 = vmatmul.f32.gmra.mxu1 %v1222_v17  ;;  %v5379_v17 = vpop.f32.mrf.mxu2 }
 0x1c8   : > { %v5372_v43 = vpop.f32.mrf.mxu3  ;;  %7892 = vst [vmem:[#allocation102_spill] sm:$0xff] %v5379_v17  ;;  %v3015_v17 = vld [vmem:[#allocation10 + $0x150] sm:$0xff] }
 0x1c9   : > { %7890 = vst [vmem:[#allocation100_spill] sm:$0xff] %v5372_v43  ;;  %2097 = vmatmul.f32.gmra.mxu2 %v435_v31  ;;  %3030 = vmatpush.msra.mxu0 %v3015_v17  ;;  %v5396_v31 = vpop.f32.mrf.mxu0  ;;  %v1226_v17 = vld [vmem:[%s4771_s25 + $0x208] sm:$0xff] }
 0x1ca   : > { %7898 = vst [vmem:[#allocation108_spill] sm:$0xff] %v5396_v31  ;;  %v3013_v31 = vld [vmem:[#allocation10 + $0x140] sm:$0xff] }
 0x1cd   : > { %1034 = vmatmul.f32.gmra.mxu3 %v5286_v10 }
 0x1ce   : > { %1307 = vmatmul.f32.gmra.mxu0 %v1223_v44 }
 0x1cf   : > { %1420 = vmatmul.f32.gmra.mxu1 %v1223_v44  ;;  %v5390_v10 = vpop.f32.mrf.mxu2  ;;  %v3016_v44 = vld [vmem:[#allocation10 + $0x158] sm:$0xff] }
 0x1d0   : > { %v5381_v13 = vpop.f32.mrf.mxu3  ;;  %7896 = vst [vmem:[#allocation106_spill] sm:$0xff] %v5390_v10  ;;  %3143 = vmatpush.msra.mxu1 %v3016_v44  ;;  %v2058_v10 = vld [vmem:[#allocation8 + $0x98] sm:$0xff] }
 0x1d1   : > { %7893 = vst [vmem:[#allocation103_spill] sm:$0xff] %v5381_v13  ;;  %2100 = vmatmul.f32.gmra.mxu2 %v436_v37  ;;  %2200 = vmatpush.msra.mxu3 %v2058_v10  ;;  %v5408_v44 = vpop.f32.mrf.mxu0  ;;  %v438_v10 = vld [vmem:[%s4761_s22 + $0x28] sm:$0xff] }
 0x1d2   : > { %7902 = vst [vmem:[#allocation112_spill] sm:$0xff] %v5408_v44  ;;  %3144 = vmatpush.msra.mxu1 %v3013_v31  ;;  %v439_v31 = vld [vmem:[%s4761_s22 + $0x30] sm:$0xff] }
 0x1d5   : > { %1037 = vmatmul.f32.gmra.mxu3 %v5300_v51  ;;  %v5398_v51 = vpop.f32.mrf.mxu1 }
 0x1d6   : > { %1310 = vmatmul.f32.gmra.mxu0 %v1224_v36  ;;  %7899 = vst [vmem:[#allocation109_spill] sm:$0xff] %v5398_v51 }
 0x1d7   : > { %1423 = vmatmul.f32.gmra.mxu1 %v1224_v36  ;;  %v5401_v36 = vpop.f32.mrf.mxu2 }
 0x1d8   : > { %v5392_v4 = vpop.f32.mrf.mxu3  ;;  %7900 = vst [vmem:[#allocation110_spill] sm:$0xff] %v5401_v36  ;;  %v3012_v36 = vld [vmem:[#allocation10 + $0x138] sm:$0xff] }
 0x1d9   : > { %7897 = vst [vmem:[#allocation107_spill] sm:$0xff] %v5392_v4  ;;  %2103 = vmatmul.f32.gmra.mxu2 %v437_v61  ;;  %3031 = vmatpush.msra.mxu0 %v3012_v36  ;;  %v5421_v44 = vpop.f32.mrf.mxu0  ;;  %v1228_v36 = vld [vmem:[%s4771_s25 + $0x238] sm:$0xff] }
 0x1da   : > { %7907 = vst [vmem:[#allocation117_spill] sm:$0xff] %v5421_v44  ;;  %v440_v44 = vld [vmem:[%s4761_s22 + $0x38] sm:$0xff] }
 0x1dd   : > { %1040 = vmatmul.f32.gmra.mxu3 %v5314_v60  ;;  %v5412_v60 = vpop.f32.mrf.mxu1 }
 0x1de   : > { %1313 = vmatmul.f32.gmra.mxu0 %v1225_v29  ;;  %7904 = vst [vmem:[#allocation114_spill] sm:$0xff] %v5412_v60 }
 0x1df   : > { %1426 = vmatmul.f32.gmra.mxu1 %v1225_v29  ;;  %v5410_v37 = vpop.f32.mrf.mxu2  ;;  %v3014_v29 = vld [vmem:[#allocation10 + $0x148] sm:$0xff] }
 0x1e0   : > { %v5403_v24 = vpop.f32.mrf.mxu3  ;;  %7903 = vst [vmem:[#allocation113_spill] sm:$0xff] %v5410_v37  ;;  %3257 = vmatpush.msra.mxu2 %v3014_v29  ;;  %v3011_v29 = vld [vmem:[#allocation10 + $0x130] sm:$0xff] }
 0x1e1   : > { %7901 = vst [vmem:[#allocation111_spill] sm:$0xff] %v5403_v24  ;;  %2106 = vmatmul.f32.gmra.mxu2 %v438_v10  ;;  %v3010_v10 = vld [vmem:[#allocation10 + $0x128] sm:$0xff] }
 0x1e2   : > { %3258 = vmatpush.msra.mxu2 %v3011_v29  ;;  %3145 = vmatpush.msra.mxu1 %v3010_v10  ;;  %v441_v29 = vld [vmem:[%s4761_s22 + $0x40] sm:$0xff]  ;;  %v1230_v10 = vld [vmem:[%s4771_s25 + $0x268] sm:$0xff] }
 0x1e5   : > { %1043 = vmatmul.f32.gmra.mxu3 %v5326_v26  ;;  %v1227_v26 = vld [vmem:[%s4771_s25 + $0x220] sm:$0xff]  ;;  %v5425_v39 = vpop.f32.mrf.mxu1 }
 0x1e6   : > { %1316 = vmatmul.f32.gmra.mxu0 %v1226_v17  ;;  %7909 = vst [vmem:[#allocation119_spill] sm:$0xff] %v5425_v39 }
 0x1e7   : > { %1429 = vmatmul.f32.gmra.mxu1 %v1226_v17  ;;  %v5419_v61 = vpop.f32.mrf.mxu2  ;;  %v2057_v17 = vld [vmem:[#allocation8 + $0x90] sm:$0xff] }
 0x1e8   : > { %v5414_v30 = vpop.f32.mrf.mxu3  ;;  %7906 = vst [vmem:[#allocation116_spill] sm:$0xff] %v5419_v61  ;;  %2201 = vmatpush.msra.mxu3 %v2057_v17  ;;  %v5434_v17 = vpop.f32.mrf.mxu0 }
 0x1e9   : > { %7905 = vst [vmem:[#allocation115_spill] sm:$0xff] %v5414_v30  ;;  %2109 = vmatmul.f32.gmra.mxu2 %v439_v31 }
 0x1ea   : > { %7912 = vst [vmem:[#allocation122_spill] sm:$0xff] %v5434_v17 }
 0x1ed   : > { %1046 = vmatmul.f32.gmra.mxu3 %v5338_v12  ;;  %v5437_v31 = vpop.f32.mrf.mxu1 }
 0x1ee   : > { %1319 = vmatmul.f32.gmra.mxu0 %v1227_v26  ;;  %7913 = vst [vmem:[#allocation123_spill] sm:$0xff] %v5437_v31 }
 0x1ef   : > { %1432 = vmatmul.f32.gmra.mxu1 %v1227_v26  ;;  %v5430_v12 = vpop.f32.mrf.mxu2  ;;  %v3009_v26 = vld [vmem:[#allocation10 + $0x120] sm:$0xff] }
 0x1f0   : > { %v5423_v37 = vpop.f32.mrf.mxu3  ;;  %7910 = vst [vmem:[#allocation120_spill] sm:$0xff] %v5430_v12  ;;  %3032 = vmatpush.msra.mxu0 %v3009_v26  ;;  %v2056_v12 = vld [vmem:[#allocation8 + $0x88] sm:$0xff]  ;;  %v5447_v26 = vpop.f32.mrf.mxu0 }
 0x1f1   : > { %7908 = vst [vmem:[#allocation118_spill] sm:$0xff] %v5423_v37  ;;  %2112 = vmatmul.f32.gmra.mxu2 %v440_v44  ;;  %2202 = vmatpush.msra.mxu3 %v2056_v12  ;;  %v3008_v44 = vld [vmem:[#allocation10 + $0x118] sm:$0xff]  ;;  %v1141_v12 = vmul.f32 %v5363_v16, %v5363_v16 }
 0x1f2   : > { %7916 = vst [vmem:[#allocation126_spill] sm:$0xff] %v5447_v26  ;;  %3259 = vmatpush.msra.mxu2 %v3008_v44  ;;  %v442_v26 = vld [vmem:[%s4761_s22 + $0x48] sm:$0xff] }
 0x1f5   : > { %1049 = vmatmul.f32.gmra.mxu3 %v5352_v41  ;;  %v1229_v41 = vld [vmem:[%s4771_s25 + $0x250] sm:$0xff]  ;;  %v5449_v17 = vpop.f32.mrf.mxu1 }
 0x1f6   : > { %1322 = vmatmul.f32.gmra.mxu0 %v1228_v36  ;;  %7917 = vst [vmem:[#allocation127_spill] sm:$0xff] %v5449_v17 }
 0x1f7   : > { %1435 = vmatmul.f32.gmra.mxu1 %v1228_v36  ;;  %v5441_v36 = vpop.f32.mrf.mxu2 }
 0x1f8   : > { %v5432_v61 = vpop.f32.mrf.mxu3  ;;  %7914 = vst [vmem:[#allocation124_spill] sm:$0xff] %v5441_v36  ;;  %v3006_v36 = vld [vmem:[#allocation10 + $0x108] sm:$0xff]  ;;  %v5465_v16 = vpop.f32.mrf.mxu0 }
 0x1f9   : > { %7911 = vst [vmem:[#allocation121_spill] sm:$0xff] %v5432_v61  ;;  %2115 = vmatmul.f32.gmra.mxu2 %v441_v29  ;;  %3033 = vmatpush.msra.mxu0 %v3006_v36  ;;  %v787_v29 = vmul.f32 %v5045_v58, %v5045_v58 }
 0x1fa   : > { %7920 = vst [vmem:[#allocation130_spill] sm:$0xff] %v5465_v16 }
 0x1fd   : > { %1052 = vmatmul.f32.gmra.mxu3 %v5042_v56  ;;  %v5469_v36 = vpop.f32.mrf.mxu1 }
 0x1fe   : > { %1325 = vmatmul.f32.gmra.mxu0 %v1229_v41  ;;  %7922 = vst [vmem:[#allocation132_spill] sm:$0xff] %v5469_v36 }
 0x1ff   : > { %1438 = vmatmul.f32.gmra.mxu1 %v1229_v41  ;;  %v5452_v56 = vpop.f32.mrf.mxu2  ;;  %v3007_v41 = vld [vmem:[#allocation10 + $0x110] sm:$0xff] }
 0x200   : > { %v5443_v22 = vpop.f32.mrf.mxu3  ;;  %7918 = vst [vmem:[#allocation128_spill] sm:$0xff] %v5452_v56  ;;  %3146 = vmatpush.msra.mxu1 %v3007_v41  ;;  %v1527_v56 = vmul.f32 %v5374_v46, %v5374_v46  ;;  %v2055_v41 = vld [vmem:[#allocation8 + $0x80] sm:$0xff]  ;;  %v3003_v46 = vld [vmem:[#allocation10 + $0xf0] sm:$0xff] }
 0x201   : > { %7915 = vst [vmem:[#allocation125_spill] sm:$0xff] %v5443_v22  ;;  %2118 = vmatmul.f32.gmra.mxu2 %v442_v26  ;;  %v1142_v26 = vmul.f32 %v5372_v43, %v5372_v43  ;;  %2203 = vmatpush.msra.mxu3 %v2055_v41  ;;  %v3004_v41 = vld [vmem:[#allocation10 + $0xf8] sm:$0xff] }
 0x202   : > { %3147 = vmatpush.msra.mxu1 %v3004_v41  ;;  %3034 = vmatpush.msra.mxu0 %v3003_v46 }
 0x205   : > { %1055 = vmatmul.f32.gmra.mxu3 %v5057_v63  ;;  %v1231_v63 = vld [vmem:[%s4771_s25 + $0x280] sm:$0xff] }
 0x206   : > { %1328 = vmatmul.f32.gmra.mxu0 %v1230_v10 }
 0x207   : > { %1441 = vmatmul.f32.gmra.mxu1 %v1230_v10  ;;  %v1173_v10 = vadd.f32 %v1141_v12, %v787_v29  ;;  %v5467_v44 = vpop.f32.mrf.mxu2  ;;  %v788_v12 = vmul.f32 %v5060_v1, %v5060_v1  ;;  %v1232_v29 = vld [vmem:[%s4771_s25 + $0x298] sm:$0xff] }
 0x208   : > { %v5456_v38 = vpop.f32.mrf.mxu3  ;;  %7921 = vst [vmem:[#allocation131_spill] sm:$0xff] %v5467_v44 }
 0x209   : > { %7919 = vst [vmem:[#allocation129_spill] sm:$0xff] %v5456_v38  ;;  %v1559_v58 = vadd.f32 %v1527_v56, %v1173_v10  ;;  %v1174_v44 = vadd.f32 %v1142_v26, %v788_v12  ;;  %v3005_v10 = vld [vmem:[#allocation10 + $0x100] sm:$0xff]  ;;  %v789_v12 = vmul.f32 %v5075_v7, %v5075_v7 }
 0x20a   : > { %3260 = vmatpush.msra.mxu2 %v3005_v10  ;;  %v1529_v10 = vmul.f32 %v5398_v51, %v5398_v51  ;;  %v445_v51 = vld [vmem:[%s4761_s22 + $0x60] sm:$0xff] }
 0x20b   : > { %v5479_v16 = vadd.f32 1e-08, %v1559_v58  ;;  %v1143_v58 = vmul.f32 %v5381_v13, %v5381_v13 }
 0x20d   : > { %1058 = vmatmul.f32.gmra.mxu3 %v5072_v5  ;;  %v443_v5 = vld [vmem:[%s4761_s22 + $0x50] sm:$0xff]  ;;  %4094 = vrsqrt.f32 %v5479_v16  ;;  %vm1662_vm0 = vcmp.eq.f32.partialorder %v5479_v16, inf  ;;  %vm1664_vm1 = vcmp.eq.f32.partialorder %v5479_v16, 0.0 }
 0x20e   : > { %1331 = vmatmul.f32.gmra.mxu0 %v1231_v63  ;;  %2121 = vmatmul.f32.gmra.mxu2 %v443_v5  ;;  %v5488_v5 = vpop.f32.mrf.mxu0 }
 0x20f   : > { %1444 = vmatmul.f32.gmra.mxu1 %v1231_v63  ;;  %v1528_v63 = vmul.f32 %v5386_v62, %v5386_v62  ;;  %v5484_v56 = vpop.f32.mrf.mxu2  ;;  %7925 = vst [vmem:[#allocation135_spill] sm:$0xff] %v5488_v5  ;;  %v1144_v62 = vmul.f32 %v5392_v4, %v5392_v4 }
 0x210   : > { %v5473_v23 = vpop.f32.mrf.mxu3  ;;  %7924 = vst [vmem:[#allocation134_spill] sm:$0xff] %v5484_v56  ;;  %v1233_v56 = vld [vmem:[%s4771_s25 + $0x2b0] sm:$0xff] }
 0x211   : > { %7923 = vst [vmem:[#allocation133_spill] sm:$0xff] %v5473_v23  ;;  %v1560_v43 = vadd.f32 %v1528_v63, %v1174_v44  ;;  %v1175_v63 = vadd.f32 %v1143_v58, %v789_v12  ;;  %v790_v58 = vmul.f32 %v5090_v14, %v5090_v14  ;;  %v3001_v14 = vld [vmem:[#allocation10 + $0xe0] sm:$0xff] }
 0x212   : > { %3148 = vmatpush.msra.mxu1 %v3001_v14 }
 0x213   : > { %v5499_v44 = vadd.f32 1e-08, %v1560_v43  ;;  %v4095_v41 = vpop.eup %4094  ;;  %v1561_v5 = vadd.f32 %v1529_v10, %v1175_v63  ;;  %v1176_v63 = vadd.f32 %v1144_v62, %v790_v58  ;;  %v1530_v10 = vmul.f32 %v5412_v60, %v5412_v60 }
 0x214   : > { %v1656_v43 = vmul.f32 %v4095_v41, %v5479_v16  ;;  %v1145_v62 = vmul.f32 %v5403_v24, %v5403_v24  ;;  %v1531_v24 = vmul.f32 %v5425_v39, %v5425_v39  ;;  %v1236_v39 = vld [vmem:[%s4771_s25 + $0x2f8] sm:$0xff] }
 0x215   : > { %1061 = vmatmul.f32.gmra.mxu3 %v5085_v11  ;;  %v5493_v11 = vpop.f32.mrf.mxu1  ;;  %4096 = vrsqrt.f32 %v5499_v44  ;;  %v1562_v1 = vadd.f32 %v1530_v10, %v1176_v63  ;;  %vm1674_vm2 = vcmp.eq.f32.partialorder %v5499_v44, inf  ;;  %vm1676_vm3 = vcmp.eq.f32.partialorder %v5499_v44, 0.0 }
 0x216   : > { %1334 = vmatmul.f32.gmra.mxu0 %v1232_v29  ;;  %7927 = vst [vmem:[#allocation137_spill] sm:$0xff] %v5493_v11  ;;  %v5514_v12 = vpop.f32.mrf.mxu0  ;;  %v1657_v4 = vmul.f32 %v4095_v41, %v1656_v43  ;;  %v791_v43 = vmul.f32 %v5103_v20, %v5103_v20 }
 0x217   : > { %1447 = vmatmul.f32.gmra.mxu1 %v1232_v29  ;;  %v444_v29 = vld [vmem:[%s4761_s22 + $0x58] sm:$0xff]  ;;  %v5504_v46 = vpop.f32.mrf.mxu2  ;;  %7930 = vst [vmem:[#allocation140_spill] sm:$0xff] %v5514_v12  ;;  %v3002_v12 = vld [vmem:[#allocation10 + $0xe8] sm:$0xff]  ;;  %v5540_v63 = vadd.f32 1e-08, %v1562_v1 }
 0x218   : > { %v5490_v26 = vpop.f32.mrf.mxu3  ;;  %2124 = vmatmul.f32.gmra.mxu2 %v444_v29  ;;  %7928 = vst [vmem:[#allocation138_spill] sm:$0xff] %v5504_v46  ;;  %v5520_v46 = vadd.f32 1e-08, %v1561_v5  ;;  %v3000_v5 = vld [vmem:[#allocation10 + $0xd8] sm:$0xff]  ;;  %v1177_v10 = vadd.f32 %v1145_v62, %v791_v43  ;;  %v1146_v43 = vmul.f32 %v5414_v30, %v5414_v30 }
 0x219   : > { %7926 = vst [vmem:[#allocation136_spill] sm:$0xff] %v5490_v26  ;;  %3261 = vmatpush.msra.mxu2 %v3002_v12  ;;  %3035 = vmatpush.msra.mxu0 %v3000_v5  ;;  %vm1698_vm6 = vcmp.eq.f32.partialorder %v5540_v63, inf  ;;  %vm1700_vm7 = vcmp.eq.f32.partialorder %v5540_v63, 0.0 }
 0x21a   : > { %4098 = vrsqrt.f32 %v5520_v46  ;;  %v1563_v62 = vadd.f32 %v1531_v24, %v1177_v10  ;;  %v1532_v10 = vmul.f32 %v5437_v31, %v5437_v31  ;;  %vm1686_vm4 = vcmp.eq.f32.partialorder %v5520_v46, inf }
 0x21b   : > { %v5525_v13 = vpop.eup %4096  ;;  %4100 = vrsqrt.f32 %v5540_v63  ;;  %vm1688_vm5 = vcmp.eq.f32.partialorder %v5520_v46, 0.0 }
 0x21c   : > { %v5565_v20 = vadd.f32 1e-08, %v1563_v62  ;;  %v2999_v62 = vld [vmem:[#allocation10 + $0xd0] sm:$0xff] }
 0x21d   : > { %1064 = vmatmul.f32.gmra.mxu3 %v5100_v18  ;;  %v5516_v18 = vpop.f32.mrf.mxu1  ;;  %3262 = vmatpush.msra.mxu2 %v2999_v62  ;;  %v448_v62 = vld [vmem:[%s4761_s22 + $0x78] sm:$0xff] }
 0x21e   : > { %1337 = vmatmul.f32.gmra.mxu0 %v1233_v56  ;;  %7931 = vst [vmem:[#allocation141_spill] sm:$0xff] %v5516_v18  ;;  %v5544_v12 = vpop.f32.mrf.mxu0  ;;  %4102 = vrsqrt.f32 %v5565_v20  ;;  %vm1710_vm8 = vcmp.eq.f32.partialorder %v5565_v20, inf  ;;  %vm1712_vm9 = vcmp.eq.f32.partialorder %v5565_v20, 0.0 }
 0x21f   : > { %1450 = vmatmul.f32.gmra.mxu1 %v1233_v56  ;;  %v1234_v56 = vld [vmem:[%s4771_s25 + $0x2c8] sm:$0xff]  ;;  %v5527_v7 = vpop.f32.mrf.mxu2  ;;  %7934 = vst [vmem:[#allocation144_spill] sm:$0xff] %v5544_v12 }
 0x220   : > { %v5508_v29 = vpop.f32.mrf.mxu3  ;;  %2127 = vmatmul.f32.gmra.mxu2 %v445_v51  ;;  %7932 = vst [vmem:[#allocation142_spill] sm:$0xff] %v5527_v7  ;;  %v1668_v51 = vmul.f32 %v5525_v13, %v5499_v44  ;;  %v446_v7 = vld [vmem:[%s4761_s22 + $0x68] sm:$0xff]  ;;  %v5550_v60 = vpop.eup %4098 }
 0x221   : > { %7929 = vst [vmem:[#allocation139_spill] sm:$0xff] %v5508_v29 }
 0x222   : > { %v1669_v5 = vmul.f32 %v5525_v13, %v1668_v51  ;;  %v792_v51 = vmul.f32 %v5118_v27, %v5118_v27 }
 0x224   : > { %v1178_v24 = vadd.f32 %v1146_v43, %v792_v51  ;;  %v2998_v43 = vld [vmem:[#allocation10 + $0xc8] sm:$0xff] }
 0x225   : > { %1067 = vmatmul.f32.gmra.mxu3 %v5114_v25  ;;  %v1658_v25 = vmul.f32 0.5, %v1657_v4  ;;  %v5546_v14 = vpop.f32.mrf.mxu1  ;;  %3149 = vmatpush.msra.mxu1 %v2998_v43 }
 0x226   : > { %1340 = vmatmul.f32.gmra.mxu0 %v1234_v56  ;;  %7935 = vst [vmem:[#allocation145_spill] sm:$0xff] %v5546_v14  ;;  %v5574_v30 = vpop.f32.mrf.mxu0 }
 0x227   : > { %1453 = vmatmul.f32.gmra.mxu1 %v1234_v56  ;;  %v1235_v56 = vld [vmem:[%s4771_s25 + $0x2e0] sm:$0xff]  ;;  %v1659_v4 = vsub.f32 1.5, %v1658_v25  ;;  %v5552_v1 = vpop.f32.mrf.mxu2  ;;  %v1680_v25 = vmul.f32 %v5550_v60, %v5520_v46  ;;  %7938 = vst [vmem:[#allocation148_spill] sm:$0xff] %v5574_v30  ;;  %s3726_s25 = sshll.u32 %s7538_s9, 4  ;;  %s3727_s25 = int_to_ptr.hbm [resolvable:$true] %s3726_s25 }
 0x228   : > { %v5531_v58 = vpop.f32.mrf.mxu3  ;;  %2130 = vmatmul.f32.gmra.mxu2 %v446_v7  ;;  %7936 = vst [vmem:[#allocation146_spill] sm:$0xff] %v5552_v1  ;;  %v5572_v1 = vpop.eup %4100 }
 0x229   : > { %7933 = vst [vmem:[#allocation143_spill] sm:$0xff] %v5531_v58  ;;  %v1660_v12 = vmul.f32 %v4095_v41, %v1659_v4  ;;  %v5601_v31 = vpop.eup %4102 }
 0x22b   : > { %v1661_v41 = vmul.f32 %v1660_v12, %v5479_v16  ;;  %v1147_v12 = vmul.f32 %v5423_v37, %v5423_v37 }
 0x22d   : > { %1070 = vmatmul.f32.gmra.mxu3 %v5129_v32  ;;  %v1670_v32 = vmul.f32 0.5, %v1669_v5  ;;  %v1681_v5 = vmul.f32 %v5550_v60, %v1680_v25  ;;  %v5576_v27 = vpop.f32.mrf.mxu1 }
 0x22e   : > { %1343 = vmatmul.f32.gmra.mxu0 %v1235_v56  ;;  %7939 = vst [vmem:[#allocation149_spill] sm:$0xff] %v5576_v27 }
 0x22f   : > { %1456 = vmatmul.f32.gmra.mxu1 %v1235_v56  ;;  %v447_v56 = vld [vmem:[%s4761_s22 + $0x70] sm:$0xff]  ;;  %v1671_v4 = vsub.f32 1.5, %v1670_v32  ;;  %v5578_v51 = vpop.f32.mrf.mxu2  ;;  %v1682_v30 = vmul.f32 0.5, %v1681_v5 }
 0x230   : > { %v5556_v7 = vpop.f32.mrf.mxu3  ;;  %2133 = vmatmul.f32.gmra.mxu2 %v447_v56  ;;  %7940 = vst [vmem:[#allocation150_spill] sm:$0xff] %v5578_v51  ;;  %v2997_v56 = vld [vmem:[#allocation10 + $0xc0] sm:$0xff]  ;;  %v1692_v51 = vmul.f32 %v5572_v1, %v5540_v63 }
 0x231   : > { %7937 = vst [vmem:[#allocation147_spill] sm:$0xff] %v5556_v7  ;;  %v1672_v25 = vmul.f32 %v5525_v13, %v1671_v4  ;;  %3036 = vmatpush.msra.mxu0 %v2997_v56  ;;  %v1683_v5 = vsub.f32 1.5, %v1682_v30 }
 0x232   : > { %v1693_v56 = vmul.f32 %v5572_v1, %v1692_v51 }
 0x233   : > { %v1673_v4 = vmul.f32 %v1672_v25, %v5499_v44  ;;  %v1684_v51 = vmul.f32 %v5550_v60, %v1683_v5 }
 0x234   : > { %v1694_v25 = vmul.f32 0.5, %v1693_v56 }
 0x235   : > { %1073 = vmatmul.f32.gmra.mxu3 %v5144_v40  ;;  %v1564_v40 = vadd.f32 %v1532_v10, %v1178_v24  ;;  %v793_v24 = vmul.f32 %v5133_v34, %v5133_v34  ;;  %v1665_v10 = vand.u32 2147483648, %v5479_v16  ;;  %v1675_v30 = vsel %vm1674_vm2, %v5499_v44, %v1673_v4 }
 0x236   : > { %1346 = vmatmul.f32.gmra.mxu0 %v1236_v39  ;;  %v1534_v4 = vmul.f32 %v5469_v36, %v5469_v36  ;;  %v1685_v60 = vmul.f32 %v1684_v51, %v5520_v46  ;;  %v1695_v5 = vsub.f32 1.5, %v1694_v25  ;;  %v2992_v36 = vld [vmem:[#allocation10 + $0x98] sm:$0xff] }
 0x237   : > { %1459 = vmatmul.f32.gmra.mxu1 %v1236_v39  ;;  %v1663_v39 = vsel %vm1662_vm0, %v5479_v16, %v1661_v41  ;;  %v5595_v43 = vadd.f32 1e-08, %v1564_v40  ;;  %v1179_v37 = vadd.f32 %v1147_v12, %v793_v24  ;;  %v1533_v41 = vmul.f32 %v5449_v17, %v5449_v17  ;;  %v5603_v34 = vpop.f32.mrf.mxu2  ;;  %v2996_v17 = vld [vmem:[#allocation10 + $0xb8] sm:$0xff] }
 0x238   : > { %v5582_v32 = vpop.f32.mrf.mxu3  ;;  %v1666_v13 = vsel %vm1664_vm1, %v1665_v10, %v1663_v39  ;;  %2136 = vmatmul.f32.gmra.mxu2 %v448_v62  ;;  %7942 = vst [vmem:[#allocation152_spill] sm:$0xff] %v5603_v34  ;;  %v1148_v40 = vmul.f32 %v5432_v61, %v5432_v61  ;;  %v5611_v39 = vpop.f32.mrf.mxu1  ;;  %v1704_v24 = vmul.f32 %v5601_v31, %v5565_v20  ;;  %v1677_v10 = vand.u32 2147483648, %v5499_v44  ;;  %v449_v62 = vld [vmem:[%s4761_s22 + $0x80] sm:$0xff] }
 0x239   : > { %7941 = vst [vmem:[#allocation151_spill] sm:$0xff] %v5582_v32  ;;  %v1565_v16 = vadd.f32 %v1533_v41, %v1179_v37  ;;  %4104 = vrsqrt.f32 %v5595_v43  ;;  %v794_v37 = vmul.f32 %v5148_v42, %v5148_v42  ;;  %v1149_v44 = vmul.f32 %v5443_v22, %v5443_v22  ;;  %3263 = vmatpush.msra.mxu2 %v2996_v17  ;;  %v450_v17 = vld [vmem:[%s4761_s22 + $0x88] sm:$0xff] }
 0x23a   : > { %7944 = vst [vmem:[#allocation154_spill] sm:$0xff] %v5611_v39  ;;  %v1678_v34 = vsel %vm1676_vm3, %v1677_v10, %v1675_v30  ;;  %v1705_v56 = vmul.f32 %v5601_v31, %v1704_v24  ;;  %v795_v30 = vmul.f32 %v5160_v47, %v5160_v47  ;;  %v1687_v51 = vsel %vm1686_vm4, %v5520_v46, %v1685_v60 }
 0x23b   : > { %v5622_v41 = vadd.f32 1e-08, %v1565_v16  ;;  %v2995_v16 = vld [vmem:[#allocation10 + $0xb0] sm:$0xff]  ;;  %v1696_v25 = vmul.f32 %v5572_v1, %v1695_v5  ;;  %vm1722_vm10 = vcmp.eq.f32.partialorder %v5595_v43, inf  ;;  %vm1724_vm11 = vcmp.eq.f32.partialorder %v5595_v43, 0.0 }
 0x23c   : > { %3150 = vmatpush.msra.mxu1 %v2995_v16  ;;  %v1706_v24 = vmul.f32 0.5, %v1705_v56 }
 0x23d   : > { %2204 = vmatmul.f32.vlgmr.msra.gmra.mxu3 %v1666_v13  ;;  %v1180_v13 = vadd.f32 %v1148_v40, %v794_v37  ;;  %v2994_v40 = vld [vmem:[#allocation10 + $0xa8] sm:$0xff]  ;;  %4106 = vrsqrt.f32 %v5622_v41  ;;  %v1697_v1 = vmul.f32 %v1696_v25, %v5540_v63  ;;  %vm1734_vm12 = vcmp.eq.f32.partialorder %v5622_v41, inf }
 0x23e   : > { %3037 = vmatpush.msra.mxu0 %v2994_v40  ;;  %v1707_v5 = vsub.f32 1.5, %v1706_v24  ;;  %3151 = vmatpush.msra.mxu1 %v2992_v36  ;;  %vm1736_vm13 = vcmp.eq.f32.partialorder %v5622_v41, 0.0 }
 0x23f   : > { %v5628_v61 = vpop.eup %4104  ;;  %v5632_v42 = vpop.f32.mrf.mxu2  ;;  %v1566_v37 = vadd.f32 %v1534_v4, %v1180_v13  ;;  %v1535_v13 = vmul.f32 %v5493_v11, %v5493_v11  ;;  %v1689_v4 = vand.u32 2147483648, %v5520_v46  ;;  %v1150_v46 = vmul.f32 %v5456_v38, %v5456_v38 }
 0x240   : > { %v5607_v12 = vpop.f32.mrf.mxu3  ;;  %2139 = vmatmul.f32.gmra.mxu2 %v449_v62  ;;  %v1716_v10 = vmul.f32 %v5628_v61, %v5595_v43  ;;  %v1181_v62 = vadd.f32 %v1149_v44, %v795_v30  ;;  %v5647_v22 = vpop.f32.mrf.mxu1 }
 0x241   : > { %7943 = vst [vmem:[#allocation153_spill] sm:$0xff] %v5607_v12  ;;  %v5651_v16 = vadd.f32 1e-08, %v1566_v37  ;;  %v1690_v60 = vsel %vm1688_vm5, %v1689_v4, %v1687_v51  ;;  %v1699_v37 = vsel %vm1698_vm6, %v5540_v63, %v1697_v1  ;;  %v1708_v51 = vmul.f32 %v5601_v31, %v1707_v5  ;;  %v451_v4 = vld [vmem:[%s4761_s22 + $0x90] sm:$0xff] }
 0x242   : > { %7946 = vst [vmem:[#allocation156_spill] sm:$0xff] %v5647_v22  ;;  %v1717_v56 = vmul.f32 %v5628_v61, %v1716_v10  ;;  %v1567_v40 = vadd.f32 %v1535_v13, %v1181_v62  ;;  %v796_v10 = vmul.f32 %v5170_v53, %v5170_v53  ;;  %v1701_v13 = vand.u32 2147483648, %v5540_v63  ;;  %v2993_v63 = vld [vmem:[#allocation10 + $0xa0] sm:$0xff] }
 0x243   : > { %v5655_v44 = vpop.eup %4106  ;;  %4108 = vrsqrt.f32 %v5651_v16  ;;  %v1709_v5 = vmul.f32 %v1708_v51, %v5565_v20  ;;  %3264 = vmatpush.msra.mxu2 %v2993_v63  ;;  %vm1746_vm14 = vcmp.eq.f32.partialorder %v5651_v16, inf  ;;  %vm1748_vm15 = vcmp.eq.f32.partialorder %v5651_v16, 0.0 }
 0x244   : > { %v1718_v25 = vmul.f32 0.5, %v1717_v56  ;;  %v1728_v24 = vmul.f32 %v5655_v44, %v5622_v41  ;;  %v5671_v62 = vadd.f32 1e-08, %v1567_v40  ;;  %v1702_v1 = vsel %vm1700_vm7, %v1701_v13, %v1699_v37 }
 0x245   : > { %2207 = vmatmul.f32.gmra.mxu3 %v1678_v34  ;;  %v1151_v13 = vmul.f32 %v5473_v23, %v5473_v23  ;;  %v1711_v51 = vsel %vm1710_vm8, %v5565_v20, %v1709_v5  ;;  %v452_v23 = vld [vmem:[%s4761_s22 + $0x98] sm:$0xff] }
 0x246   : > { %v1719_v56 = vsub.f32 1.5, %v1718_v25  ;;  %v1729_v40 = vmul.f32 %v5655_v44, %v1728_v24  ;;  %4110 = vrsqrt.f32 %v5671_v62  ;;  %vm1758_vm0 = vcmp.eq.f32.partialorder %v5671_v62, inf }
 0x247   : > { %v5657_v30 = vpop.f32.mrf.mxu2  ;;  %vm1760_vm1 = vcmp.eq.f32.partialorder %v5671_v62, 0.0 }
 0x248   : > { %v5636_v34 = vpop.f32.mrf.mxu3  ;;  %2142 = vmatmul.f32.gmra.mxu2 %v450_v17  ;;  %v1182_v17 = vadd.f32 %v1150_v46, %v796_v10  ;;  %v5678_v31 = vpop.f32.mrf.mxu1  ;;  %v2991_v10 = vld [vmem:[#allocation10 + $0x90] sm:$0xff]  ;;  %v1720_v25 = vmul.f32 %v5628_v61, %v1719_v56  ;;  %v1730_v24 = vmul.f32 0.5, %v1729_v40  ;;  %v1537_v61 = vmul.f32 %v5546_v14, %v5546_v14 }
 0x249   : > { %7945 = vst [vmem:[#allocation155_spill] sm:$0xff] %v5636_v34  ;;  %v5682_v38 = vpop.eup %4108  ;;  %3038 = vmatpush.msra.mxu0 %v2991_v10 }
 0x24a   : > { %7948 = vst [vmem:[#allocation158_spill] sm:$0xff] %v5678_v31  ;;  %v1721_v40 = vmul.f32 %v1720_v25, %v5595_v43  ;;  %v1731_v63 = vsub.f32 1.5, %v1730_v24 }
 0x24c   : > { %v1723_v25 = vsel %vm1722_vm10, %v5595_v43, %v1721_v40  ;;  %v1732_v24 = vmul.f32 %v5655_v44, %v1731_v63 }
 0x24d   : > { %2210 = vmatmul.f32.gmra.mxu3 %v1690_v60  ;;  %v1536_v60 = vmul.f32 %v5516_v18, %v5516_v18  ;;  %v5701_v18 = vpop.eup %4110 }
 0x24e   : > { %v1733_v40 = vmul.f32 %v1732_v24, %v5622_v41 }
 0x24f   : > { %v5685_v46 = vpop.f32.mrf.mxu2  ;;  %v1568_v37 = vadd.f32 %v1536_v60, %v1182_v17  ;;  %v797_v17 = vmul.f32 %v5182_v0, %v5182_v0  ;;  %v1713_v60 = vand.u32 2147483648, %v5565_v20  ;;  %v1152_v20 = vmul.f32 %v5490_v26, %v5490_v26  ;;  %v453_v26 = vld [vmem:[%s4761_s22 + $0xa0] sm:$0xff] }
 0x250   : > { %v5661_v11 = vpop.f32.mrf.mxu3  ;;  %2145 = vmatmul.f32.gmra.mxu2 %v451_v4  ;;  %v5711_v0 = vpop.f32.mrf.mxu1 }
 0x251   : > { %7947 = vst [vmem:[#allocation157_spill] sm:$0xff] %v5661_v11  ;;  %v5703_v36 = vadd.f32 1e-08, %v1568_v37  ;;  %v1183_v5 = vadd.f32 %v1151_v13, %v797_v17  ;;  %v1714_v56 = vsel %vm1712_vm9, %v1713_v60, %v1711_v51  ;;  %v1752_v37 = vmul.f32 %v5701_v18, %v5671_v62 }
 0x252   : > { %7950 = vst [vmem:[#allocation160_spill] sm:$0xff] %v5711_v0  ;;  %v1725_v60 = vand.u32 2147483648, %v5595_v43  ;;  %v2989_v43 = vld [vmem:[#allocation10 + $0x80] sm:$0xff] }
 0x253   : > { %v1569_v17 = vadd.f32 %v1537_v61, %v1183_v5  ;;  %4112 = vrsqrt.f32 %v5703_v36  ;;  %v1538_v5 = vmul.f32 %v5576_v27, %v5576_v27  ;;  %v1753_v61 = vmul.f32 %v5701_v18, %v1752_v37  ;;  %v2990_v27 = vld [vmem:[#allocation10 + $0x88] sm:$0xff]  ;;  %v2988_v37 = vld [vmem:[#allocation10 + $0x78] sm:$0xff]  ;;  %3152 = vmatpush.msra.mxu1 %v2989_v43 }
 0x254   : > { %v1726_v53 = vsel %vm1724_vm11, %v1725_v60, %v1723_v25  ;;  %3265 = vmatpush.msra.mxu2 %v2990_v27  ;;  %v1735_v25 = vsel %vm1734_vm12, %v5622_v41, %v1733_v40  ;;  %3039 = vmatpush.msra.mxu0 %v2988_v37  ;;  %v1737_v27 = vand.u32 2147483648, %v5622_v41  ;;  %v454_v43 = vld [vmem:[%s4761_s22 + $0xa8] sm:$0xff]  ;;  %vm1770_vm2 = vcmp.eq.f32.partialorder %v5703_v36, inf }
 0x255   : > { %2213 = vmatmul.f32.gmra.mxu3 %v1702_v1  ;;  %v1740_v1 = vmul.f32 %v5682_v38, %v5651_v16  ;;  %v5731_v14 = vadd.f32 1e-08, %v1569_v17  ;;  %vm1772_vm3 = vcmp.eq.f32.partialorder %v5703_v36, 0.0 }
 0x257   : > { %v1741_v10 = vmul.f32 %v5682_v38, %v1740_v1  ;;  %v5715_v13 = vpop.f32.mrf.mxu2  ;;  %4114 = vrsqrt.f32 %v5731_v14  ;;  %vm1782_vm4 = vcmp.eq.f32.partialorder %v5731_v14, inf  ;;  %vm1784_vm5 = vcmp.eq.f32.partialorder %v5731_v14, 0.0 }
 0x258   : > { %v5689_v4 = vpop.f32.mrf.mxu3  ;;  %2148 = vmatmul.f32.gmra.mxu2 %v452_v23  ;;  %v798_v23 = vmul.f32 %v5194_v19, %v5194_v19 }
 0x259   : > { %7949 = vst [vmem:[#allocation159_spill] sm:$0xff] %v5689_v4  ;;  %v1742_v1 = vmul.f32 0.5, %v1741_v10  ;;  %v5734_v63 = vpop.eup %4112 }
 0x25b   : > { %v1743_v44 = vsub.f32 1.5, %v1742_v1  ;;  %v1764_v1 = vmul.f32 %v5734_v63, %v5703_v36 }
 0x25d   : > { %2216 = vmatmul.f32.gmra.mxu3 %v1714_v56  ;;  %v1184_v56 = vadd.f32 %v1152_v20, %v798_v23  ;;  %v1153_v20 = vmul.f32 %v5508_v29, %v5508_v29  ;;  %v1754_v23 = vmul.f32 0.5, %v1753_v61  ;;  %v1744_v24 = vmul.f32 %v5682_v38, %v1743_v44  ;;  %v5761_v44 = vpop.eup %4114 }
 0x25e   : > { %v1738_v29 = vsel %vm1736_vm13, %v1737_v27, %v1735_v25  ;;  %v1765_v40 = vmul.f32 %v5734_v63, %v1764_v1  ;;  %v1776_v25 = vmul.f32 %v5761_v44, %v5731_v14  ;;  %v1749_v1 = vand.u32 2147483648, %v5651_v16 }
 0x25f   : > { %v1570_v10 = vadd.f32 %v1538_v5, %v1184_v56  ;;  %v5738_v19 = vpop.f32.mrf.mxu2  ;;  %v1539_v5 = vmul.f32 %v5611_v39, %v5611_v39  ;;  %v1755_v61 = vsub.f32 1.5, %v1754_v23  ;;  %v1745_v38 = vmul.f32 %v1744_v24, %v5651_v16  ;;  %v5777_v24 = vpop.f32.mrf.mxu0 }
 0x260   : > { %v5717_v51 = vpop.f32.mrf.mxu3  ;;  %2151 = vmatmul.f32.gmra.mxu2 %v453_v26  ;;  %v5746_v26 = vpop.f32.mrf.mxu1  ;;  %7955 = vst [vmem:[#allocation165_spill] sm:$0xff] %v5777_v24 }
 0x261   : > { %7951 = vst [vmem:[#allocation161_spill] sm:$0xff] %v5717_v51  ;;  %v5754_v60 = vadd.f32 1e-08, %v1570_v10  ;;  %v1756_v41 = vmul.f32 %v5701_v18, %v1755_v61  ;;  %v800_v18 = vmul.f32 %v5218_v52, %v5218_v52  ;;  %v455_v61 = vld [vmem:[%s4761_s22 + $0xb0] sm:$0xff]  ;;  %v2986_v52 = vld [vmem:[#allocation10 + $0x68] sm:$0xff] }
 0x262   : > { %7953 = vst [vmem:[#allocation163_spill] sm:$0xff] %v5746_v26  ;;  %3153 = vmatpush.msra.mxu1 %v2986_v52  ;;  %v1541_v52 = vmul.f32 %v5678_v31, %v5678_v31  ;;  %v457_v31 = vld [vmem:[%s4761_s22 + $0xc0] sm:$0xff] }
 0x263   : > { %4116 = vrsqrt.f32 %v5754_v60  ;;  %vm1794_vm6 = vcmp.eq.f32.partialorder %v5754_v60, inf  ;;  %vm1796_vm7 = vcmp.eq.f32.partialorder %v5754_v60, 0.0 }
 0x265   : > { %2219 = vmatmul.f32.gmra.mxu3 %v1726_v53  ;;  %v799_v53 = vmul.f32 %v5206_v35, %v5206_v35 }
 0x267   : > { %v1185_v56 = vadd.f32 %v1153_v20, %v799_v53  ;;  %v5764_v10 = vpop.f32.mrf.mxu2  ;;  %v1154_v20 = vmul.f32 %v5531_v58, %v5531_v58  ;;  %v1766_v53 = vmul.f32 0.5, %v1765_v40 }
 0x268   : > { %v5740_v17 = vpop.f32.mrf.mxu3  ;;  %2154 = vmatmul.f32.gmra.mxu2 %v454_v43 }
 0x269   : > { %7952 = vst [vmem:[#allocation162_spill] sm:$0xff] %v5740_v17  ;;  %v1571_v37 = vadd.f32 %v1539_v5, %v1185_v56  ;;  %v5782_v56 = vpop.f32.mrf.mxu1  ;;  %v1757_v5 = vmul.f32 %v1756_v41, %v5671_v62  ;;  %v1186_v43 = vadd.f32 %v1154_v20, %v800_v18  ;;  %v5789_v58 = vpop.eup %4116  ;;  %v1767_v39 = vsub.f32 1.5, %v1766_v53  ;;  %v2985_v20 = vld [vmem:[#allocation10 + $0x60] sm:$0xff] }
 0x26a   : > { %7956 = vst [vmem:[#allocation166_spill] sm:$0xff] %v5782_v56  ;;  %v1155_v18 = vmul.f32 %v5556_v7, %v5556_v7  ;;  %v1788_v53 = vmul.f32 %v5789_v58, %v5754_v60  ;;  %3040 = vmatpush.msra.mxu0 %v2985_v20  ;;  %v5809_v7 = vpop.f32.mrf.mxu0  ;;  %v811_v20 = vmul.f32 %v5163_v50, %v5163_v50 }
 0x26b   : > { %v5780_v27 = vadd.f32 1e-08, %v1571_v37  ;;  %v1777_v37 = vmul.f32 %v5761_v44, %v1776_v25  ;;  %v1759_v24 = vsel %vm1758_vm0, %v5671_v62, %v1757_v5  ;;  %v1761_v25 = vand.u32 2147483648, %v5671_v62 }
 0x26c   : > { %v1768_v5 = vmul.f32 %v5734_v63, %v1767_v39  ;;  %v1789_v35 = vmul.f32 %v5789_v58, %v1788_v53 }
 0x26d   : > { %2222 = vmatmul.f32.gmra.mxu3 %v1738_v29  ;;  %v1747_v29 = vsel %vm1746_vm14, %v5651_v16, %v1745_v38  ;;  %v1540_v38 = vmul.f32 %v5647_v22, %v5647_v22  ;;  %v2987_v16 = vld [vmem:[#allocation10 + $0x70] sm:$0xff]  ;;  %4118 = vrsqrt.f32 %v5780_v27  ;;  %vm1806_vm8 = vcmp.eq.f32.partialorder %v5780_v27, inf }
 0x26e   : > { %v1750_v40 = vsel %vm1748_vm15, %v1749_v1, %v1747_v29  ;;  %3266 = vmatpush.msra.mxu2 %v2987_v16  ;;  %v1769_v62 = vmul.f32 %v1768_v5, %v5703_v36  ;;  %vm1808_vm9 = vcmp.eq.f32.partialorder %v5780_v27, 0.0 }
 0x26f   : > { %v5794_v41 = vpop.f32.mrf.mxu2  ;;  %v1572_v29 = vadd.f32 %v1540_v38, %v1186_v43  ;;  %v1762_v43 = vsel %vm1760_vm1, %v1761_v25, %v1759_v24  ;;  %v456_v38 = vld [vmem:[%s4761_s22 + $0xb8] sm:$0xff] }
 0x270   : > { %v5769_v23 = vpop.f32.mrf.mxu3  ;;  %2157 = vmatmul.f32.gmra.mxu2 %v455_v61  ;;  %v1778_v61 = vmul.f32 0.5, %v1777_v37  ;;  %v779_v37 = vmul.f32 %v5163_v50, %v5048_v59 }
 0x271   : > { %7954 = vst [vmem:[#allocation164_spill] sm:$0xff] %v5769_v23  ;;  %v5811_v16 = vadd.f32 1e-08, %v1572_v29  ;;  %v5818_v63 = vpop.f32.mrf.mxu1  ;;  %v802_v29 = vmul.f32 %v5240_v48, %v5240_v48 }
 0x272   : > { %7958 = vst [vmem:[#allocation168_spill] sm:$0xff] %v5818_v63  ;;  %v1779_v24 = vsub.f32 1.5, %v1778_v61  ;;  %v1790_v61 = vmul.f32 0.5, %v1789_v35 }
 0x273   : > { %v5816_v39 = vpop.eup %4118  ;;  %4120 = vrsqrt.f32 %v5811_v16  ;;  %vm1818_vm10 = vcmp.eq.f32.partialorder %v5811_v16, inf  ;;  %vm1820_vm11 = vcmp.eq.f32.partialorder %v5811_v16, 0.0 }
 0x274   : > { %v1780_v59 = vmul.f32 %v5761_v44, %v1779_v24  ;;  %v5853_v24 = vpop.f32.mrf.mxu0 }
 0x275   : > { %2225 = vmatmul.f32.gmra.mxu3 %v1750_v40  ;;  %v801_v40 = vmul.f32 %v5228_v3, %v5228_v3 }
 0x276   : > { %v1781_v44 = vmul.f32 %v1780_v59, %v5731_v14  ;;  %v2984_v59 = vld [vmem:[#allocation10 + $0x58] sm:$0xff] }
 0x277   : > { %v1187_v22 = vadd.f32 %v1155_v18, %v801_v40  ;;  %v1156_v18 = vmul.f32 %v5582_v32, %v5582_v32  ;;  %v5830_v53 = vpop.f32.mrf.mxu2  ;;  %v1800_v40 = vmul.f32 %v5816_v39, %v5780_v27  ;;  %v1773_v32 = vand.u32 2147483648, %v5703_v36  ;;  %3267 = vmatpush.msra.mxu2 %v2984_v59 }
 0x278   : > { %v5799_v1 = vpop.f32.mrf.mxu3  ;;  %2160 = vmatmul.f32.gmra.mxu2 %v456_v38  ;;  %v1771_v38 = vsel %vm1770_vm2, %v5703_v36, %v1769_v62 }
 0x279   : > { %7957 = vst [vmem:[#allocation167_spill] sm:$0xff] %v5799_v1  ;;  %v1573_v25 = vadd.f32 %v1541_v52, %v1187_v22  ;;  %v1188_v48 = vadd.f32 %v1156_v18, %v802_v29  ;;  %v1542_v22 = vmul.f32 %v5711_v0, %v5711_v0  ;;  %v1801_v62 = vmul.f32 %v5816_v39, %v1800_v40  ;;  %v5851_v36 = vpop.eup %4120  ;;  %v5863_v18 = vpop.f32.mrf.mxu1  ;;  %v2982_v40 = vld [vmem:[#allocation10 + $0x48] sm:$0xff] }
 0x27a   : > { %v803_v29 = vmul.f32 %v5252_v49, %v5252_v49  ;;  %7960 = vst [vmem:[#allocation170_spill] sm:$0xff] %v5863_v18  ;;  %3041 = vmatpush.msra.mxu0 %v2982_v40 }
 0x27b   : > { %v5847_v3 = vadd.f32 1e-08, %v1573_v25  ;;  %v2983_v25 = vld [vmem:[#allocation10 + $0x50] sm:$0xff] }
 0x27c   : > { %3154 = vmatpush.msra.mxu1 %v2983_v25  ;;  %v458_v25 = vld [vmem:[%s4761_s22 + $0xc8] sm:$0xff] }
 0x27d   : > { %2228 = vmatmul.f32.gmra.mxu3 %v1762_v43  ;;  %4122 = vrsqrt.f32 %v5847_v3  ;;  %vm1830_vm12 = vcmp.eq.f32.partialorder %v5847_v3, inf  ;;  %vm1832_vm13 = vcmp.eq.f32.partialorder %v5847_v3, 0.0 }
 0x280   : > { %v1053_v5 = vpop.f32.mrf.mxu3  ;;  %2163 = vmatmul.f32.gmra.mxu2 %v457_v31  ;;  %v1574_v31 = vadd.f32 %v1542_v22, %v1188_v48  ;;  %v1783_v22 = vsel %vm1782_vm4, %v5731_v14, %v1781_v44 }
 0x281   : > { %v1101_v50 = vmul.f32 %v1053_v5, %v5255_v45  ;;  %v1165_v43 = vmul.f32 %v1053_v5, %v1053_v5  ;;  %v1774_v5 = vsel %vm1772_vm3, %v1773_v32, %v1771_v38  ;;  %v1791_v45 = vsub.f32 1.5, %v1790_v61  ;;  %v5865_v61 = vpop.f32.mrf.mxu2 }
 0x282   : > { %v812_v32 = vmul.f32 %v5175_v55, %v5175_v55  ;;  %v1802_v38 = vmul.f32 0.5, %v1801_v62 }
 0x283   : > { %v5842_v35 = vadd.f32 %v1101_v50, %v779_v37  ;;  %v5844_v52 = vadd.f32 %v1165_v43, %v811_v20  ;;  %v1157_v37 = vmul.f32 %v5607_v12, %v5607_v12  ;;  %v780_v20 = vmul.f32 %v5175_v55, %v5063_v2 }
 0x284   : > { %v1792_v43 = vmul.f32 %v5789_v58, %v1791_v45  ;;  %v1785_v45 = vand.u32 2147483648, %v5731_v14  ;;  %v5877_v58 = vadd.f32 1e-08, %v1574_v31  ;;  %v813_v31 = vmul.f32 %v5187_v8, %v5187_v8 }
 0x285   : > { %7959 = vst [vmem:[#allocation169_spill] sm:$0xff] %v5842_v35  ;;  %2231 = vmatmul.f32.gmra.mxu3 %v1774_v5  ;;  %v1812_v5 = vmul.f32 %v5851_v36, %v5811_v16  ;;  %v1189_v2 = vadd.f32 %v1157_v37, %v803_v29  ;;  %v1543_v35 = vmul.f32 %v5746_v26, %v5746_v26  ;;  %v5887_v29 = vpop.eup %4122 }
 0x286   : > { %v1786_v44 = vsel %vm1784_vm5, %v1785_v45, %v1783_v22  ;;  %4124 = vrsqrt.f32 %v5877_v58  ;;  %vm1842_vm14 = vcmp.eq.f32.partialorder %v5877_v58, inf  ;;  %vm1844_vm15 = vcmp.eq.f32.partialorder %v5877_v58, 0.0 }
 0x287   : > { %v1813_v37 = vmul.f32 %v5851_v36, %v1812_v5  ;;  %v1575_v40 = vadd.f32 %v1543_v35, %v1189_v2 }
 0x288   : > { %v1056_v50 = vpop.f32.mrf.mxu3  ;;  %2166 = vmatmul.f32.gmra.mxu2 %v458_v25 }
 0x289   : > { %v1102_v55 = vmul.f32 %v1056_v50, %v5269_v33  ;;  %v1166_v48 = vmul.f32 %v1056_v50, %v1056_v50  ;;  %v1793_v50 = vmul.f32 %v1792_v43, %v5754_v60  ;;  %v1803_v33 = vsub.f32 1.5, %v1802_v38  ;;  %v5894_v14 = vpop.f32.mrf.mxu2  ;;  %v5901_v38 = vpop.f32.mrf.mxu0 }
 0x28a   : > { %v804_v43 = vmul.f32 %v5264_v6, %v5264_v6  ;;  %7962 = vst [vmem:[#allocation172_spill] sm:$0xff] %v5901_v38  ;;  %v1814_v45 = vmul.f32 0.5, %v1813_v37  ;;  %v5910_v25 = vadd.f32 1e-08, %v1575_v40  ;;  %v8062_v38 = vld [vmem:[#allocation107_spill] sm:$0xff] }
 0x28b   : > { %v5879_v62 = vadd.f32 %v1102_v55, %v780_v20  ;;  %v5881_v59 = vadd.f32 %v1166_v48, %v812_v32  ;;  %v781_v20 = vmul.f32 %v5187_v8, %v5078_v9  ;;  %v1158_v32 = vmul.f32 %v5636_v34, %v5636_v34  ;;  %v5905_v48 = vpop.f32.mrf.mxu1  ;;  %v463_v34 = vld [vmem:[%s4761_s22 + $0xf0] sm:$0xff] }
 0x28c   : > { %v1795_v35 = vsel %vm1794_vm6, %v5754_v60, %v1793_v50  ;;  %v1804_v55 = vmul.f32 %v5816_v39, %v1803_v33  ;;  %7963 = vst [vmem:[#allocation173_spill] sm:$0xff] %v5905_v48  ;;  %v1824_v8 = vmul.f32 %v5887_v29, %v5847_v3  ;;  %v1544_v50 = vmul.f32 %v5782_v56, %v5782_v56  ;;  %v462_v56 = vld [vmem:[%s4761_s22 + $0xe8] sm:$0xff] }
 0x28d   : > { %7961 = vst [vmem:[#allocation171_spill] sm:$0xff] %v5879_v62  ;;  %2234 = vmatmul.f32.gmra.mxu3 %v1786_v44  ;;  %v1797_v44 = vand.u32 2147483648, %v5754_v60  ;;  %v1190_v9 = vadd.f32 %v1158_v32, %v804_v43  ;;  %v5922_v62 = vpop.eup %4124  ;;  %v1815_v40 = vsub.f32 1.5, %v1814_v45  ;;  %v782_v60 = vmul.f32 %v5197_v21, %v5093_v15  ;;  %v2980_v43 = vld [vmem:[#allocation10 + $0x38] sm:$0xff] }
 0x28e   : > { %v1805_v37 = vmul.f32 %v1804_v55, %v5780_v27  ;;  %v1825_v6 = vmul.f32 %v5887_v29, %v1824_v8  ;;  %4126 = vrsqrt.f32 %v5910_v25  ;;  %v2979_v55 = vld [vmem:[#allocation10 + $0x30] sm:$0xff]  ;;  %3155 = vmatpush.msra.mxu1 %v2980_v43  ;;  %v1545_v15 = vmul.f32 %v5818_v63, %v5818_v63 }
 0x28f   : > { %v1576_v32 = vadd.f32 %v1544_v50, %v1190_v9  ;;  %v1836_v9 = vmul.f32 %v5922_v62, %v5877_v58  ;;  %3042 = vmatpush.msra.mxu0 %v2979_v55  ;;  %vm1854_vm0 = vcmp.eq.f32.partialorder %v5910_v25, inf  ;;  %vm1856_vm1 = vcmp.eq.f32.partialorder %v5910_v25, 0.0 }
 0x290   : > { %v1059_v2 = vpop.f32.mrf.mxu3  ;;  %v1807_v45 = vsel %vm1806_vm8, %v5780_v27, %v1805_v37  ;;  %v1826_v50 = vmul.f32 0.5, %v1825_v6  ;;  %v1809_v37 = vand.u32 2147483648, %v5780_v27  ;;  %v460_v6 = vld [vmem:[%s4761_s22 + $0xd8] sm:$0xff] }
 0x291   : > { %v1103_v22 = vmul.f32 %v1059_v2, %v5283_v54  ;;  %v1167_v5 = vmul.f32 %v1059_v2, %v1059_v2  ;;  %v459_v54 = vld [vmem:[%s4761_s22 + $0xd0] sm:$0xff]  ;;  %v1798_v2 = vsel %vm1796_vm7, %v1797_v44, %v1795_v35  ;;  %v5933_v35 = vpop.f32.mrf.mxu2  ;;  %v1816_v44 = vmul.f32 %v5851_v36, %v1815_v40 }
 0x292   : > { %2169 = vmatmul.f32.gmra.mxu2 %v459_v54  ;;  %v2981_v54 = vld [vmem:[#allocation10 + $0x40] sm:$0xff]  ;;  %v1810_v40 = vsel %vm1808_vm9, %v1809_v37, %v1807_v45  ;;  %v1837_v55 = vmul.f32 %v5922_v62, %v1836_v9  ;;  %v1827_v27 = vsub.f32 1.5, %v1826_v50  ;;  %v1160_v9 = vmul.f32 %v5689_v4, %v5689_v4 }
 0x293   : > { %v5916_v33 = vadd.f32 %v1103_v22, %v781_v20  ;;  %v5918_v39 = vadd.f32 %v1167_v5, %v813_v31  ;;  %v814_v20 = vmul.f32 %v5197_v21, %v5197_v21  ;;  %v1159_v31 = vmul.f32 %v5661_v11, %v5661_v11  ;;  %3268 = vmatpush.msra.mxu2 %v2981_v54  ;;  %v5950_v43 = vpop.f32.mrf.mxu1 }
 0x294   : > { %v805_v22 = vmul.f32 %v5279_v57, %v5279_v57  ;;  %v5948_v54 = vadd.f32 1e-08, %v1576_v32  ;;  %7966 = vst [vmem:[#allocation176_spill] sm:$0xff] %v5950_v43  ;;  %v5957_v36 = vpop.eup %4126  ;;  %v1817_v63 = vmul.f32 %v1816_v44, %v5811_v16  ;;  %v7968_v32 = vld [vmem:[#allocation39_spill] sm:$0xff]  ;;  %v7969_v57 = vld [vmem:[#allocation56_spill] sm:$0xff]  ;;  %v7970_v44 = vld [vmem:[#allocation82_spill] sm:$0xff]  ;;  %v1828_v37 = vmul.f32 %v5887_v29, %v1827_v27 }
 0x295   : > { %7964 = vst [vmem:[#allocation174_spill] sm:$0xff] %v5916_v33  ;;  %2237 = vmatmul.f32.gmra.mxu3 %v1798_v2  ;;  %v5942_v2 = vpop.f32.mrf.mxu0  ;;  %v815_v45 = vmul.f32 %v7969_v57, %v7969_v57  ;;  %v1546_v29 = vmul.f32 %v5863_v18, %v5863_v18 }
 0x296   : > { %7965 = vst [vmem:[#allocation175_spill] sm:$0xff] %v5942_v2  ;;  %v1191_v33 = vadd.f32 %v1159_v31, %v805_v22  ;;  %v783_v31 = vmul.f32 %v7969_v57, %v7968_v32  ;;  %4128 = vrsqrt.f32 %v5948_v54  ;;  %v1819_v50 = vsel %vm1818_vm10, %v5811_v16, %v1817_v63 }
 0x297   : > { %v1821_v57 = vand.u32 2147483648, %v5811_v16  ;;  %vm1866_vm2 = vcmp.eq.f32.partialorder %v5948_v54, inf  ;;  %vm1868_vm3 = vcmp.eq.f32.partialorder %v5948_v54, 0.0 }
 0x298   : > { %v1062_v5 = vpop.f32.mrf.mxu3  ;;  %v1577_v22 = vadd.f32 %v1545_v15, %v1191_v33 }
 0x299   : > { %v1104_v21 = vmul.f32 %v1062_v5, %v5297_v28  ;;  %v1168_v8 = vmul.f32 %v1062_v5, %v1062_v5  ;;  %v1822_v27 = vsel %vm1820_vm11, %v1821_v57, %v1819_v50 }
 0x29a   : > { %2172 = vmatmul.f32.gmra.mxu2 %v460_v6  ;;  %v7971_v6 = vld [vmem:[#allocation78_spill] sm:$0xff]  ;;  %v5980_v32 = vadd.f32 1e-08, %v1577_v22  ;;  %v1161_v22 = vmul.f32 %v5717_v51, %v5717_v51 }
 0x29b   : > { %v5952_v28 = vadd.f32 %v1104_v21, %v782_v60  ;;  %v5954_v5 = vadd.f32 %v1168_v8, %v814_v20  ;;  %v1848_v60 = vmul.f32 %v5957_v36, %v5910_v25  ;;  %v5965_v20 = vpop.f32.mrf.mxu2  ;;  %v1838_v8 = vmul.f32 0.5, %v1837_v55  ;;  %v5994_v16 = vpop.f32.mrf.mxu1 }
 0x29c   : > { %v5992_v11 = vpop.eup %4128  ;;  %7974 = vst [vmem:[#allocation179_spill] sm:$0xff] %v5994_v16  ;;  %4130 = vrsqrt.f32 %v5980_v32  ;;  %vm1878_vm4 = vcmp.eq.f32.partialorder %v5980_v32, inf  ;;  %vm1880_vm5 = vcmp.eq.f32.partialorder %v5980_v32, 0.0 }
 0x29d   : > { %7967 = vst [vmem:[#allocation177_spill] sm:$0xff] %v5952_v28  ;;  %2240 = vmatmul.f32.gmra.mxu3 %v1810_v40  ;;  %v806_v40 = vmul.f32 %v7971_v6, %v7971_v6  ;;  %v1849_v55 = vmul.f32 %v5957_v36, %v1848_v60  ;;  %v1839_v6 = vsub.f32 1.5, %v1838_v8  ;;  %v7975_v60 = vld [vmem:[#allocation42_spill] sm:$0xff] }
 0x29f   : > { %v1192_v63 = vadd.f32 %v1160_v9, %v806_v40  ;;  %v7977_v9 = vld [vmem:[#allocation83_spill] sm:$0xff]  ;;  %v1850_v40 = vmul.f32 0.5, %v1849_v55 }
 0x2a0   : > { %v1065_v21 = vpop.f32.mrf.mxu3 }
 0x2a1   : > { %v1105_v15 = vmul.f32 %v1065_v21, %v7970_v44  ;;  %v1169_v33 = vmul.f32 %v1065_v21, %v1065_v21  ;;  %v461_v21 = vld [vmem:[%s4761_s22 + $0xe0] sm:$0xff]  ;;  %v5988_v44 = vpop.f32.mrf.mxu0  ;;  %v1578_v8 = vadd.f32 %v1546_v29, %v1192_v63  ;;  %v1547_v63 = vmul.f32 %v5905_v48, %v5905_v48 }
 0x2a2   : > { %7973 = vst [vmem:[#allocation178_spill] sm:$0xff] %v5988_v44  ;;  %2175 = vmatmul.f32.gmra.mxu2 %v461_v21  ;;  %v1860_v21 = vmul.f32 %v5992_v11, %v5948_v54  ;;  %v1833_v29 = vand.u32 2147483648, %v5847_v3  ;;  %v8048_v44 = vld [vmem:[#allocation76_spill] sm:$0xff] }
 0x2a3   : > { %v5982_v28 = vadd.f32 %v1105_v15, %v783_v31  ;;  %v5984_v4 = vadd.f32 %v1169_v33, %v815_v45  ;;  %v1829_v31 = vmul.f32 %v1828_v37, %v5847_v3  ;;  %v7976_v45 = vld [vmem:[#allocation59_spill] sm:$0xff]  ;;  %v807_v33 = vmul.f32 %v7977_v9, %v7977_v9  ;;  %v6003_v50 = vpop.f32.mrf.mxu2 }
 0x2a4   : > { %v784_v15 = vmul.f32 %v7976_v45, %v7975_v60  ;;  %v1840_v37 = vmul.f32 %v5922_v62, %v1839_v6  ;;  %v7978_v60 = vld [vmem:[#allocation85_spill] sm:$0xff]  ;;  %v1851_v6 = vsub.f32 1.5, %v1850_v40 }
 0x2a5   : > { %7972 = vst [vmem:[#allocation56_spill] sm:$0xff] %v5982_v28  ;;  %2243 = vmatmul.f32.gmra.mxu3 %v1822_v27  ;;  %v816_v27 = vmul.f32 %v7976_v45, %v7976_v45  ;;  %v1831_v9 = vsel %vm1830_vm12, %v5847_v3, %v1829_v31  ;;  %v1193_v51 = vadd.f32 %v1161_v22, %v807_v33  ;;  %v6023_v45 = vadd.f32 1e-08, %v1578_v8  ;;  %v6027_v22 = vpop.eup %4130  ;;  %v7981_v33 = vld [vmem:[#allocation62_spill] sm:$0xff]  ;;  %v7983_v8 = vld [vmem:[#allocation87_spill] sm:$0xff] }
 0x2a6   : > { %v1861_v31 = vmul.f32 %v5992_v11, %v1860_v21  ;;  %v6039_v21 = vpop.f32.mrf.mxu1 }
 0x2a7   : > { %v1579_v40 = vadd.f32 %v1547_v63, %v1193_v51  ;;  %7984 = vst [vmem:[#allocation180_spill] sm:$0xff] %v6039_v21  ;;  %v1872_v51 = vmul.f32 %v6027_v22, %v5980_v32  ;;  %4132 = vrsqrt.f32 %v6023_v45  ;;  %vm1890_vm6 = vcmp.eq.f32.partialorder %v6023_v45, inf }
 0x2a8   : > { %v1068_v57 = vpop.f32.mrf.mxu3  ;;  %vm1892_vm7 = vcmp.eq.f32.partialorder %v6023_v45, 0.0 }
 0x2a9   : > { %v1106_v28 = vmul.f32 %v1068_v57, %v7978_v60  ;;  %v1170_v55 = vmul.f32 %v1068_v57, %v1068_v57  ;;  %v1834_v60 = vsel %vm1832_vm13, %v1833_v29, %v1831_v9  ;;  %v1841_v57 = vmul.f32 %v1840_v37, %v5877_v58  ;;  %v6033_v3 = vpop.f32.mrf.mxu0 }
 0x2aa   : > { %2178 = vmatmul.f32.gmra.mxu2 %v462_v56  ;;  %7982 = vst [vmem:[#allocation62_spill] sm:$0xff] %v6033_v3  ;;  %v817_v9 = vmul.f32 %v7981_v33, %v7981_v33  ;;  %v808_v37 = vmul.f32 %v7983_v8, %v7983_v8  ;;  %v1852_v56 = vmul.f32 %v5957_v36, %v1851_v6  ;;  %v6052_v36 = vadd.f32 1e-08, %v1579_v40 }
 0x2ab   : > { %v6017_v18 = vadd.f32 %v1106_v28, %v784_v15  ;;  %v6019_v62 = vadd.f32 %v1170_v55, %v816_v27  ;;  %v1162_v28 = vmul.f32 %v5740_v17, %v5740_v17  ;;  %v7980_v15 = vld [vmem:[#allocation44_spill] sm:$0xff]  ;;  %v6043_v55 = vpop.f32.mrf.mxu2  ;;  %v1843_v29 = vsel %vm1842_vm14, %v5877_v58, %v1841_v57 }
 0x2ac   : > { %v785_v27 = vmul.f32 %v7981_v33, %v7980_v15  ;;  %v1862_v15 = vmul.f32 0.5, %v1861_v31  ;;  %v1548_v33 = vmul.f32 %v5950_v43, %v5950_v43  ;;  %v1845_v6 = vand.u32 2147483648, %v5877_v58  ;;  %v7988_v58 = vld [vmem:[#allocation47_spill] sm:$0xff] }
 0x2ad   : > { %7979 = vst [vmem:[#allocation59_spill] sm:$0xff] %v6017_v18  ;;  %2246 = vmatmul.f32.gmra.mxu3 %v1834_v60  ;;  %v1194_v63 = vadd.f32 %v1162_v28, %v808_v37  ;;  %v7985_v18 = vld [vmem:[#allocation89_spill] sm:$0xff]  ;;  %v1853_v31 = vmul.f32 %v1852_v56, %v5910_v25  ;;  %v1163_v28 = vmul.f32 %v5769_v23, %v5769_v23  ;;  %4134 = vrsqrt.f32 %v6052_v36 }
 0x2ae   : > { %v1846_v37 = vsel %vm1844_vm15, %v1845_v6, %v1843_v29  ;;  %v1863_v43 = vsub.f32 1.5, %v1862_v15  ;;  %vm1902_vm8 = vcmp.eq.f32.partialorder %v6052_v36, inf  ;;  %vm1904_vm9 = vcmp.eq.f32.partialorder %v6052_v36, 0.0 }
 0x2af   : > { %v1580_v40 = vadd.f32 %v1548_v33, %v1194_v63  ;;  %v1855_v56 = vsel %vm1854_vm0, %v5910_v25, %v1853_v31  ;;  %v1549_v63 = vmul.f32 %v5994_v16, %v5994_v16 }
 0x2b0   : > { %v1071_v60 = vpop.f32.mrf.mxu3  ;;  %v1864_v6 = vmul.f32 %v5992_v11, %v1863_v43  ;;  %v6096_v11 = vld [vmem:[%s7602_s4] ss:$0 sm:$0xff] }
 0x2b1   : > { %v1107_v8 = vmul.f32 %v1071_v60, %v7985_v18  ;;  %v1171_v17 = vmul.f32 %v1071_v60, %v1071_v60  ;;  %v1873_v60 = vmul.f32 %v6027_v22, %v1872_v51  ;;  %v6065_v18 = vpop.eup %4132  ;;  %v6078_v29 = vpop.f32.mrf.mxu0 }
 0x2b2   : > { %2181 = vmatmul.f32.gmra.mxu2 %v463_v34  ;;  %v1884_v23 = vmul.f32 %v6065_v18, %v6023_v45  ;;  %v1865_v49 = vmul.f32 %v1864_v6, %v5948_v54  ;;  %v2978_v6 = vld [vmem:[#allocation10 + $0x28] sm:$0xff] }
 0x2b3   : > { %v6055_v48 = vadd.f32 %v1107_v8, %v785_v27  ;;  %v6057_v57 = vadd.f32 %v1171_v17, %v817_v9  ;;  %v7987_v27 = vld [vmem:[#allocation91_spill] sm:$0xff]  ;;  %v7989_v9 = vld [vmem:[#allocation65_spill] sm:$0xff]  ;;  %v6076_v34 = vpop.f32.mrf.mxu2  ;;  %3269 = vmatpush.msra.mxu2 %v2978_v6 }
 0x2b4   : > { %v809_v17 = vmul.f32 %v7987_v27, %v7987_v27  ;;  %v786_v8 = vmul.f32 %v7989_v9, %v7988_v58  ;;  %v818_v15 = vmul.f32 %v7989_v9, %v7989_v9  ;;  %7990 = vst [vmem:[#allocation65_spill] sm:$0xff] %v6078_v29  ;;  %v6085_v58 = vpop.f32.mrf.mxu1  ;;  %v7992_v9 = vld [vmem:[#allocation93_spill] sm:$0xff] }
 0x2b5   : > { %7986 = vst [vmem:[#allocation181_spill] sm:$0xff] %v6055_v48  ;;  %2249 = vmatmul.f32.gmra.mxu3 %v1846_v37  ;;  %v1874_v37 = vmul.f32 0.5, %v1873_v60  ;;  %v6083_v48 = vadd.f32 1e-08, %v1580_v40  ;;  %v464_v40 = vld [vmem:[%s4761_s22 + $0xf8] sm:$0xff]  ;;  %s3708_s22 = sshll.u32 %s3705_s12, 4  ;;  %s7543_s22 = int_to_ptr.hbm [resolvable:$true] %s3708_s22 }
 0x2b6   : > { %v1195_v51 = vadd.f32 %v1163_v28, %v809_v17  ;;  %7991 = vst [vmem:[#allocation182_spill] sm:$0xff] %v6085_v58  ;;  %v1164_v28 = vmul.f32 %v5799_v1, %v5799_v1  ;;  %v1857_v17 = vand.u32 2147483648, %v5910_v25  ;;  %v1550_v25 = vmul.f32 %v6039_v21, %v6039_v21  ;;  %v2974_v21 = vld [vmem:[#allocation10 + $0x8] sm:$0xff]  ;;  %s4452_s14 = sshra.s32 %s7543_s22, 4  ;;  %s4453_s14 = int_to_ptr.hbm [resolvable:$true] %s4452_s14 }
 0x2b7   : > { %v1875_v12 = vsub.f32 1.5, %v1874_v37  ;;  %4136 = vrsqrt.f32 %v6083_v48  ;;  %v2976_v37 = vld [vmem:[#allocation10 + $0x18] sm:$0xff]  ;;  %vm1914_vm10 = vcmp.eq.f32.partialorder %v6083_v48, inf  ;;  %vm1916_vm12 = vcmp.eq.f32.partialorder %v6083_v48, 0.0  ;;  %s4454_s17 = scalar_lea.hbm %s4453_s14, 256  ;;  %p4459_p2 = scmp.lt.s32.totalorder %s4453_s14, %s7605_s7 }
 0x2b8   : > { %v1074_v33 = vpop.f32.mrf.mxu3  ;;  %v1581_v1 = vadd.f32 %v1549_v63, %v1195_v51  ;;  %v1858_v26 = vsel %vm1856_vm1, %v1857_v17, %v1855_v56  ;;  %3043 = vmatpush.msra.mxu0 %v2976_v37  ;;  %p4455_p1 = scmp.ne.s32.totalorder %s4453_s14, %s4454_s17  ;;  %p4460_p10 = scmp.lt.s32.totalorder %s4458_s18, %s4454_s17 }
 0x2b9   : > { %v1108_v27 = vmul.f32 %v1074_v33, %v7992_v9  ;;  %v1172_v31 = vmul.f32 %v1074_v33, %v1074_v33  ;;  %v6104_v33 = vpop.eup %4134  ;;  %v7994_v9 = vld [vmem:[#allocation96_spill] sm:$0xff]  ;;  %v6126_v17 = vpop.f32.mrf.mxu0 }
 0x2ba   : > { %v810_v16 = vmul.f32 %v7994_v9, %v7994_v9  ;;  %2184 = vmatmul.f32.gmra.mxu2 %v464_v40  ;;  %v1896_v51 = vmul.f32 %v6104_v33, %v6052_v36  ;;  %7995 = vst [vmem:[#allocation184_spill] sm:$0xff] %v6126_v17  ;;  %v2973_v9 = vld [vmem:[#allocation10] sm:$0xff]  ;;  %p4456_p4 = pnand %p4455_p1, %p4697_p7  ;;  %p4461_p11 = por %p4460_p10, %p4459_p2 }
 0x2bb   : > { %v6098_v43 = vadd.f32 %v1108_v27, %v786_v8  ;;  %v6100_v60 = vadd.f32 %v1172_v31, %v818_v15  ;;  %v1885_v27 = vmul.f32 %v6065_v18, %v1884_v23  ;;  %v2093_v15 = vadd.f32 %v6096_v11, %v5632_v42  ;;  %v6117_v56 = vpop.f32.mrf.mxu2  ;;  %v2977_v23 = vld [vmem:[#allocation10 + $0x20] sm:$0xff]  ;;  %3044 = vmatpush.msra.mxu0 %v2973_v9 }
 0x2bc   : > { %v1196_v8 = vadd.f32 %v1164_v28, %v810_v16  ;;  %v1867_v31 = vsel %vm1866_vm2, %v5948_v54, %v1865_v49  ;;  %3156 = vmatpush.msra.mxu1 %v2977_v23  ;;  %v1876_v42 = vmul.f32 %v6027_v22, %v1875_v12  ;;  %v1897_v49 = vmul.f32 %v6104_v33, %v1896_v51  ;;  %p4457_p8 = pneg %p4456_p4 }
 0x2bd   : > { %7993 = vst [vmem:[#allocation183_spill] sm:$0xff] %v6098_v43  ;;  %2252 = vmatmul.f32.gmra.mxu3 %v1858_v26  ;;  %v6119_v26 = vadd.f32 1e-08, %v1581_v1  ;;  %v1886_v28 = vmul.f32 0.5, %v1885_v27  ;;  %v1869_v1 = vand.u32 2147483648, %v5948_v54  ;;  %v2975_v43 = vld [vmem:[#allocation10 + $0x10] sm:$0xff]  ;;  %v6129_v0 = vpop.eup %4136  ;;  %v2096_v54 = vadd.f32 %v6096_v11, %v5657_v30 }
 0x2be   : > { %v1582_v40 = vadd.f32 %v1550_v25, %v1196_v8  ;;  %3270 = vmatpush.msra.mxu2 %v2975_v43  ;;  %3157 = vmatpush.msra.mxu1 %v2974_v21  ;;  %v1877_v22 = vmul.f32 %v1876_v42, %v5980_v32  ;;  %v1908_v25 = vmul.f32 %v6129_v0, %v6083_v48  ;;  %v1898_v21 = vmul.f32 0.5, %v1897_v49  ;;  %p4462_p9 = pnand %p4461_p11, %p4457_p8 }
 0x2bf   : > { %v1870_v12 = vsel %vm1868_vm3, %v1869_v1, %v1867_v31  ;;  %4138 = vrsqrt.f32 %v6119_v26  ;;  %v1887_v27 = vsub.f32 1.5, %v1886_v28  ;;  %v1551_v9 = vmul.f32 %v6085_v58, %v6085_v58 }
 0x2c0   : > { %v2205_v63 = vpop.f32.mrf.mxu3  ;;  %v6138_v8 = vadd.f32 1e-08, %v1582_v40  ;;  %v1879_v23 = vsel %vm1878_vm4, %v5980_v32, %v1877_v22  ;;  %v1881_v42 = vand.u32 2147483648, %v5980_v32  ;;  %v1909_v30 = vmul.f32 %v6129_v0, %v1908_v25 }
 0x2c1   : > { %v6122_v16 = vadd.f32 %v2205_v63, %v2093_v15  ;;  %v6131_v15 = vpop.f32.mrf.mxu1  ;;  %v1888_v37 = vmul.f32 %v6065_v18, %v1887_v27  ;;  %v1899_v1 = vsub.f32 1.5, %v1898_v21  ;;  %v1583_v49 = vadd.f32 %v1551_v9, %v5844_v52 }
 0x2c2   : > { %7996 = vst [vmem:[#allocation185_spill] sm:$0xff] %v6131_v15  ;;  %v1882_v18 = vsel %vm1880_vm5, %v1881_v42, %v1879_v23  ;;  %v1910_v25 = vmul.f32 0.5, %v1909_v30  ;;  %v2102_v9 = vadd.f32 %v6096_v11, %v5715_v13  ;;  %v1552_v23 = vmul.f32 %v6131_v15, %v6131_v15 }
 0x2c3   : > { %v3902_v63 = vmul.f32 -1.442695, %v6122_v16  ;;  %v6144_v43 = vpop.f32.mrf.mxu2  ;;  %v1889_v27 = vmul.f32 %v1888_v37, %v6023_v45  ;;  %v1900_v52 = vmul.f32 %v6104_v33, %v1899_v1  ;;  %v6192_v13 = vadd.f32 %v6096_v11, %v5738_v19 }
 0x2c4   : > { %vm1926_vm0 = vcmp.eq.f32.partialorder %v6119_v26, inf  ;;  %vm1928_vm2 = vcmp.eq.f32.partialorder %v6119_v26, 0.0  ;;  %vm1938_vm4 = vcmp.eq.f32.partialorder %v6138_v8, inf }
 0x2c5   : > { %4140 = vpow2.f32 %v3902_v63  ;;  %2255 = vmatmul.f32.gmra.mxu3 %v1870_v12  ;;  %v6153_v31 = vpop.eup %4138  ;;  %v6160_v63 = vpop.f32.mrf.mxu0  ;;  %v1891_v30 = vsel %vm1890_vm6, %v6023_v45, %v1889_v27 }
 0x2c6   : > { %4142 = vrsqrt.f32 %v6138_v8  ;;  %7997 = vst [vmem:[#allocation186_spill] sm:$0xff] %v6160_v63  ;;  %v1920_v32 = vmul.f32 %v6153_v31, %v6119_v26 }
 0x2c8   : > { %v2208_v51 = vpop.f32.mrf.mxu3 }
 0x2c9   : > { %v6149_v6 = vadd.f32 %v2208_v51, %v2096_v54  ;;  %v6165_v22 = vpop.f32.mrf.mxu1  ;;  %v2099_v54 = vadd.f32 %v6096_v11, %v5685_v46  ;;  %v6178_v51 = vadd.f32 1e-08, %v1583_v49  ;;  %v1893_v46 = vand.u32 2147483648, %v6023_v45 }
 0x2ca   : > { %7998 = vst [vmem:[#allocation187_spill] sm:$0xff] %v6165_v22 }
 0x2cb   : > { %v4141_v28 = vpop.eup %4140  ;;  %v3903_v40 = vmul.f32 -1.442695, %v6149_v6  ;;  %v6188_v33 = vpop.f32.mrf.mxu2 }
 0x2cc   : > { %v6163_v12 = vadd.f32 1.0, %v4141_v28  ;;  %v6174_v21 = vpop.eup %4142  ;;  %v1911_v28 = vsub.f32 1.5, %v1910_v25  ;;  %v6207_v25 = vadd.f32 %v6096_v11, %v5764_v10  ;;  %v6219_v10 = vadd.f32 %v6096_v11, %v5794_v41 }
 0x2cd   : > { %4144 = vpow2.f32 %v3903_v40  ;;  %2258 = vmatmul.f32.gmra.mxu3 %v1882_v18  ;;  %v1921_v40 = vmul.f32 %v6153_v31, %v1920_v32  ;;  %v1901_v18 = vmul.f32 %v1900_v52, %v6052_v36  ;;  %v1932_v45 = vmul.f32 %v6174_v21, %v6138_v8  ;;  %v6211_v15 = vpop.f32.mrf.mxu0 }
 0x2ce   : > { %4146 = vrcp.f32 %v6163_v12  ;;  %v1905_v52 = vand.u32 2147483648, %v6052_v36  ;;  %7999 = vst [vmem:[#allocation188_spill] sm:$0xff] %v6211_v15  ;;  %vm2434_vm13 = vweird.f32 %v6163_v12 }
 0x2cf   : > { %4148 = vrsqrt.f32 %v6178_v51 }
 0x2d0   : > { %v2211_v37 = vpop.f32.mrf.mxu3 }
 0x2d1   : > { %v6183_v42 = vadd.f32 %v2211_v37, %v2099_v54  ;;  %v1584_v54 = vadd.f32 %v1552_v23, %v5881_v59  ;;  %v1894_v37 = vsel %vm1892_vm7, %v1893_v46, %v1891_v30  ;;  %v1912_v59 = vmul.f32 %v6129_v0, %v1911_v28  ;;  %v6221_v46 = vpop.f32.mrf.mxu1 }
 0x2d2   : > { %v1922_v30 = vmul.f32 0.5, %v1921_v40  ;;  %8000 = vst [vmem:[#allocation189_spill] sm:$0xff] %v6221_v46  ;;  %v1553_v0 = vmul.f32 %v6165_v22, %v6165_v22  ;;  %v2440_v28 = vand.u32 2147483648, %v6163_v12 }
 0x2d3   : > { %v4145_v1 = vpop.eup %4144  ;;  %v3904_v49 = vmul.f32 -1.442695, %v6183_v42  ;;  %v6227_v58 = vadd.f32 1e-08, %v1584_v54  ;;  %v1913_v22 = vmul.f32 %v1912_v59, %v6083_v48  ;;  %v6248_v17 = vpop.f32.mrf.mxu2 }
 0x2d4   : > { %v4147_v27 = vpop.eup %4146  ;;  %v6202_v19 = vadd.f32 1.0, %v4145_v1  ;;  %v1923_v41 = vsub.f32 1.5, %v1922_v30  ;;  %v1585_v3 = vadd.f32 %v1553_v0, %v5918_v39 }
 0x2d5   : > { %v2430_v32 = vmul.f32 %v4147_v27, %v6163_v12  ;;  %4150 = vpow2.f32 %v3904_v49  ;;  %2261 = vmatmul.f32.gmra.mxu3 %v1894_v37  ;;  %v1903_v49 = vsel %vm1902_vm8, %v6052_v36, %v1901_v18  ;;  %v1933_v37 = vmul.f32 %v6174_v21, %v1932_v45  ;;  %v6237_v18 = vpop.eup %4148 }
 0x2d6   : > { %4152 = vrcp.f32 %v6202_v19  ;;  %vm2435_vm11 = vweird.f32 %v4147_v27  ;;  %v6241_v45 = vadd.f32 %v6096_v11, %v5830_v53  ;;  %v1906_v54 = vsel %vm1904_vm9, %v1905_v52, %v1903_v49 }
 0x2d7   : > { %v2431_v1 = vsub.f32 1.0, %v2430_v32  ;;  %v2438_v32 = vand.u32 2147483647, %v6163_v12  ;;  %vm2436_vm14 = vmor %vm2434_vm13, %vm2435_vm11  ;;  %v2441_v53 = vor.u32 1.1754944e-38, %v2440_v28  ;;  %4154 = vrsqrt.f32 %v6227_v58 }
 0x2d8   : > { %v2214_v40 = vpop.f32.mrf.mxu3  ;;  %v1944_v39 = vmul.f32 %v6237_v18, %v6178_v51  ;;  %v6268_v0 = vadd.f32 1e-08, %v1585_v3  ;;  %v2455_v28 = vand.u32 2147483648, %v6202_v19  ;;  %v6282_v3 = vadd.f32 %v6096_v11, %v5865_v61 }
 0x2d9   : > { %v2432_v23 = vmul.f32 %v4147_v27, %v2431_v1  ;;  %v6234_v15 = vadd.f32 %v2214_v40, %v2102_v9  ;;  %v1934_v40 = vmul.f32 0.5, %v1933_v37  ;;  %vm2439_vm15 = vcmp.eq.f32.partialorder %v2438_v32, 8.507059e+37  ;;  %v6266_v37 = vpop.f32.mrf.mxu0 }
 0x2da   : > { %8001 = vst [vmem:[#allocation190_spill] sm:$0xff] %v6266_v37  ;;  %vm2449_vm3 = vweird.f32 %v6202_v19  ;;  %vm1940_vm8 = vcmp.eq.f32.partialorder %v6138_v8, 0.0 }
 0x2db   : > { %v4151_v1 = vpop.eup %4150  ;;  %v2433_v63 = vadd.f32 %v4147_v27, %v2432_v23  ;;  %v3905_v9 = vmul.f32 -1.442695, %v6234_v15  ;;  %v1924_v23 = vmul.f32 %v6153_v31, %v1923_v41  ;;  %v2453_v31 = vand.u32 2147483647, %v6202_v19 }
 0x2dc   : > { %v4153_v29 = vpop.eup %4152  ;;  %v6252_v36 = vadd.f32 1.0, %v4151_v1  ;;  %v1935_v32 = vsub.f32 1.5, %v1934_v40 }
 0x2dd   : > { %v2437_v52 = vsel %vm2436_vm14, %v4147_v27, %v2433_v63  ;;  %v2445_v59 = vmul.f32 %v4153_v29, %v6202_v19  ;;  %4156 = vpow2.f32 %v3905_v9  ;;  %2264 = vmatmul.f32.gmra.mxu3 %v1906_v54  ;;  %v1915_v63 = vsel %vm1914_vm10, %v6083_v48, %v1913_v22  ;;  %v6272_v54 = vpop.f32.mrf.mxu1  ;;  %v6278_v22 = vpop.eup %4154 }
 0x2de   : > { %v2442_v12 = vsel %vm2439_vm15, %v2441_v53, %v2437_v52  ;;  %4158 = vrcp.f32 %v6252_v36  ;;  %8002 = vst [vmem:[#allocation191_spill] sm:$0xff] %v6272_v54  ;;  %vm2450_vm1 = vweird.f32 %v4153_v29  ;;  %v8003_v53 = vand.u32 2147483648, %v6083_v48 }
 0x2df   : > { %v2909_v30 = vmul.f32 %v2442_v12, %v6122_v16  ;;  %v2446_v49 = vsub.f32 1.0, %v2445_v59  ;;  %v1925_v52 = vmul.f32 %v1924_v23, %v6119_v26  ;;  %v1945_v59 = vmul.f32 %v6237_v18, %v1944_v39  ;;  %vm2451_vm5 = vmor %vm2449_vm3, %vm2450_vm1 }
 0x2e0   : > { %v2217_v41 = vpop.f32.mrf.mxu3  ;;  %v1918_v40 = vsel %vm1916_vm12, %v8003_v53, %v1915_v63  ;;  %v2456_v48 = vor.u32 1.1754944e-38, %v2455_v28  ;;  %v1936_v39 = vmul.f32 %v6174_v21, %v1935_v32  ;;  %4160 = vrsqrt.f32 %v6268_v0 }
 0x2e1   : > { %v2941_v16 = vmul.f32 1.6666666, %v2909_v30  ;;  %v2447_v1 = vmul.f32 %v4153_v29, %v2446_v49  ;;  %v6275_v9 = vadd.f32 %v2217_v41, %v6192_v13  ;;  %v1554_v13 = vmul.f32 %v6221_v46, %v6221_v46  ;;  %v6301_v41 = vpop.f32.mrf.mxu2 }
 0x2e2   : > { %vm2454_vm6 = vcmp.eq.f32.partialorder %v2453_v31, 8.507059e+37  ;;  %v1946_v53 = vmul.f32 0.5, %v1945_v59  ;;  %v1956_v28 = vmul.f32 %v6278_v22, %v6227_v58  ;;  %v1555_v31 = vmul.f32 %v6272_v54, %v6272_v54 }
 0x2e3   : > { %v4157_v12 = vpop.eup %4156  ;;  %v2448_v30 = vadd.f32 %v4153_v29, %v2447_v1  ;;  %v3906_v49 = vmul.f32 -1.442695, %v6275_v9  ;;  %3045 = vmatmul.f32.vlgmr.msra.gmra.mxu0 %v2941_v16  ;;  %3158 = vmatmul.f32.vlgmr.msra.gmra.mxu1 %v2941_v16  ;;  %vm2464_vm9 = vweird.f32 %v6252_v36  ;;  %vm1950_vm12 = vcmp.eq.f32.partialorder %v6178_v51, inf }
 0x2e4   : > { %v4159_v61 = vpop.eup %4158  ;;  %v6296_v23 = vadd.f32 1.0, %v4157_v12  ;;  %3271 = vmatmul.f32.vlgmr.msra.gmra.mxu2 %v2941_v16  ;;  %v1586_v16 = vadd.f32 %v1554_v13, %v5954_v5  ;;  %v2470_v12 = vand.u32 2147483648, %v6252_v36  ;;  %vm1952_vm14 = vcmp.eq.f32.partialorder %v6178_v51, 0.0 }
 0x2e5   : > { %v2452_v63 = vsel %vm2451_vm5, %v4153_v29, %v2448_v30  ;;  %v2460_v19 = vmul.f32 %v4159_v61, %v6252_v36  ;;  %4162 = vpow2.f32 %v3906_v49  ;;  %2267 = vmatmul.f32.gmra.mxu3 %v1918_v40  ;;  %v1927_v29 = vsel %vm1926_vm0, %v6119_v26, %v1925_v52  ;;  %v6322_v52 = vpop.f32.mrf.mxu0 }
 0x2e6   : > { %v2457_v1 = vsel %vm2454_vm6, %v2456_v48, %v2452_v63  ;;  %4164 = vrcp.f32 %v6296_v23  ;;  %v2468_v40 = vand.u32 2147483647, %v6252_v36  ;;  %v1937_v30 = vmul.f32 %v1936_v39, %v6138_v8  ;;  %v6320_v13 = vpop.eup %4160  ;;  %8004 = vst [vmem:[#allocation192_spill] sm:$0xff] %v6322_v52  ;;  %v8047_v52 = vld [vmem:[#allocation101_spill] sm:$0xff] }
 0x2e7   : > { %v2910_v21 = vmul.f32 %v2457_v1, %v6149_v6  ;;  %v2461_v32 = vsub.f32 1.0, %v2460_v19  ;;  %vm2465_vm7 = vweird.f32 %v4159_v61  ;;  %v8005_v48 = vand.u32 2147483648, %v6119_v26 }
 0x2e8   : > { %v2220_v59 = vpop.f32.mrf.mxu3  ;;  %v1947_v19 = vsub.f32 1.5, %v1946_v53  ;;  %v1953_v39 = vand.u32 2147483648, %v6178_v51  ;;  %v1957_v1 = vmul.f32 %v6278_v22, %v1956_v28  ;;  %v1587_v26 = vadd.f32 %v1555_v31, %v5984_v4  ;;  %vm2466_vm10 = vmor %vm2464_vm9, %vm2465_vm7 }
 0x2e9   : > { %v2462_v49 = vmul.f32 %v4159_v61, %v2461_v32  ;;  %v6317_v5 = vadd.f32 %v2220_v59, %v6207_v25  ;;  %v2942_v6 = vmul.f32 1.6666666, %v2910_v21  ;;  %v1930_v63 = vsel %vm1928_vm2, %v8005_v48, %v1927_v29  ;;  %v6332_v21 = vpop.f32.mrf.mxu1 }
 0x2ea   : > { %v6330_v25 = vadd.f32 1e-08, %v1586_v16  ;;  %8006 = vst [vmem:[#allocation193_spill] sm:$0xff] %v6332_v21  ;;  %v2471_v53 = vor.u32 1.1754944e-38, %v2470_v12  ;;  %v1939_v28 = vsel %vm1938_vm4, %v6138_v8, %v1937_v30  ;;  %vm2469_vm11 = vcmp.eq.f32.partialorder %v2468_v40, 8.507059e+37 }
 0x2eb   : > { %v4163_v32 = vpop.eup %4162  ;;  %v2463_v59 = vadd.f32 %v4159_v61, %v2462_v49  ;;  %v3907_v27 = vmul.f32 -1.442695, %v6317_v5  ;;  %3048 = vmatmul.f32.gmra.mxu0 %v2942_v6  ;;  %3161 = vmatmul.f32.gmra.mxu1 %v2942_v6  ;;  %v1958_v4 = vmul.f32 0.5, %v1957_v1  ;;  %v1968_v31 = vmul.f32 %v6320_v13, %v6268_v0 }
 0x2ec   : > { %v4165_v54 = vpop.eup %4164  ;;  %v6338_v29 = vadd.f32 1.0, %v4163_v32  ;;  %3274 = vmatmul.f32.gmra.mxu2 %v2942_v6  ;;  %v1948_v30 = vmul.f32 %v6237_v18, %v1947_v19  ;;  %v1556_v40 = vmul.f32 %v6332_v21, %v6332_v21  ;;  %v2483_v48 = vand.u32 2147483647, %v6296_v23  ;;  %v8038_v21 = vld [vmem:[#allocation46_spill] sm:$0xff] }
 0x2ed   : > { %v2467_v16 = vsel %vm2466_vm10, %v4159_v61, %v2463_v59  ;;  %v2475_v36 = vmul.f32 %v4165_v54, %v6296_v23  ;;  %4166 = vpow2.f32 %v3907_v27  ;;  %2270 = vmatmul.f32.gmra.mxu3 %v1930_v63  ;;  %v6350_v61 = vpop.f32.mrf.mxu2  ;;  %v6353_v27 = vadd.f32 1e-08, %v1587_v26 }
 0x2ee   : > { %v2472_v49 = vsel %vm2469_vm11, %v2471_v53, %v2467_v16  ;;  %4168 = vrcp.f32 %v6338_v29  ;;  %v2485_v63 = vand.u32 2147483648, %v6296_v23  ;;  %vm2480_vm13 = vweird.f32 %v4165_v54 }
 0x2ef   : > { %v2911_v12 = vmul.f32 %v2472_v49, %v6183_v42  ;;  %v2476_v6 = vsub.f32 1.0, %v2475_v36  ;;  %4170 = vrsqrt.f32 %v6330_v25  ;;  %v6365_v19 = vadd.f32 %v6096_v11, %v5894_v14 }
 0x2f0   : > { %v2223_v1 = vpop.f32.mrf.mxu3  ;;  %v8007_v59 = vand.u32 2147483648, %v6138_v8  ;;  %v1959_v53 = vsub.f32 1.5, %v1958_v4  ;;  %v1969_v16 = vmul.f32 %v6320_v13, %v1968_v31  ;;  %vm2479_vm15 = vweird.f32 %v6296_v23 }
 0x2f1   : > { %v2477_v32 = vmul.f32 %v4165_v54, %v2476_v6  ;;  %v6360_v42 = vadd.f32 %v2223_v1, %v6219_v10  ;;  %v2943_v18 = vmul.f32 1.6666666, %v2911_v12  ;;  %v1949_v12 = vmul.f32 %v1948_v30, %v6178_v51  ;;  %v6375_v6 = vpop.f32.mrf.mxu0  ;;  %vm2481_vm0 = vmor %vm2479_vm15, %vm2480_vm13  ;;  %v6384_v4 = vpop.f32.mrf.mxu1 }
 0x2f2   : > { %v1942_v26 = vsel %vm1940_vm8, %v8007_v59, %v1939_v28  ;;  %8008 = vst [vmem:[#allocation194_spill] sm:$0xff] %v6375_v6  ;;  %v1588_v1 = vadd.f32 %v1556_v40, %v6019_v62  ;;  %v2486_v8 = vor.u32 1.1754944e-38, %v2485_v63  ;;  %4172 = vrsqrt.f32 %v6353_v27 }
 0x2f3   : > { %v4167_v36 = vpop.eup %4166  ;;  %v2478_v49 = vadd.f32 %v4165_v54, %v2477_v32  ;;  %v3908_v10 = vmul.f32 -1.442695, %v6360_v42  ;;  %3051 = vmatmul.f32.gmra.mxu0 %v2943_v18  ;;  %3164 = vmatmul.f32.gmra.mxu1 %v2943_v18  ;;  %8009 = vst [vmem:[#allocation195_spill] sm:$0xff] %v6384_v4  ;;  %vm2484_vm1 = vcmp.eq.f32.partialorder %v2483_v48, 8.507059e+37  ;;  %v1960_v62 = vmul.f32 %v6278_v22, %v1959_v53 }
 0x2f4   : > { %v4169_v14 = vpop.eup %4168  ;;  %v6379_v28 = vadd.f32 1.0, %v4167_v36  ;;  %3277 = vmatmul.f32.gmra.mxu2 %v2943_v18  ;;  %v1970_v40 = vmul.f32 0.5, %v1969_v16  ;;  %v1951_v59 = vsel %vm1950_vm12, %v6178_v51, %v1949_v12  ;;  %vm1962_vm2 = vcmp.eq.f32.partialorder %v6227_v58, inf }
 0x2f5   : > { %v6382_v23 = vpop.eup %4170  ;;  %v2482_v31 = vsel %vm2481_vm0, %v4165_v54, %v2478_v49  ;;  %v2490_v30 = vmul.f32 %v4169_v14, %v6338_v29  ;;  %4174 = vpow2.f32 %v3908_v10  ;;  %2273 = vmatmul.f32.gmra.mxu3 %v1942_v26  ;;  %v6394_v54 = vadd.f32 1e-08, %v1588_v1  ;;  %v6404_v49 = vpop.f32.mrf.mxu2 }
 0x2f6   : > { %v2487_v32 = vsel %vm2484_vm1, %v2486_v8, %v2482_v31  ;;  %4176 = vrcp.f32 %v6379_v28  ;;  %v2498_v48 = vand.u32 2147483647, %v6338_v29  ;;  %v2500_v26 = vand.u32 2147483648, %v6338_v29 }
 0x2f7   : > { %v2912_v63 = vmul.f32 %v2487_v32, %v6234_v15  ;;  %v2491_v18 = vsub.f32 1.0, %v2490_v30  ;;  %v1980_v22 = vmul.f32 %v6382_v23, %v6330_v25  ;;  %vm2495_vm3 = vweird.f32 %v4169_v14 }
 0x2f8   : > { %v2226_v36 = vpop.f32.mrf.mxu3  ;;  %vm1964_vm4 = vcmp.eq.f32.partialorder %v6227_v58, 0.0  ;;  %v6406_v10 = vpop.eup %4172  ;;  %v1954_v12 = vsel %vm1952_vm14, %v1953_v39, %v1951_v59  ;;  %v1961_v1 = vmul.f32 %v1960_v62, %v6227_v58  ;;  %v1965_v8 = vand.u32 2147483648, %v6227_v58 }
 0x2f9   : > { %v2492_v53 = vmul.f32 %v4169_v14, %v2491_v18  ;;  %v6401_v15 = vadd.f32 %v2226_v36, %v6241_v45  ;;  %v2944_v16 = vmul.f32 1.6666666, %v2912_v63  ;;  %v1971_v31 = vsub.f32 1.5, %v1970_v40 }
 0x2fa   : > { %v1557_v45 = vmul.f32 %v6384_v4, %v6384_v4  ;;  %vm2494_vm5 = vweird.f32 %v6338_v29  ;;  %v2501_v51 = vor.u32 1.1754944e-38, %v2500_v26  ;;  %v1981_v62 = vmul.f32 %v6382_v23, %v1980_v22  ;;  %v6424_v29 = vpop.f32.mrf.mxu0  ;;  %v8037_v4 = vld [vmem:[#allocation50_spill] sm:$0xff] }
 0x2fb   : > { %v4175_v30 = vpop.eup %4174  ;;  %v2493_v32 = vadd.f32 %v4169_v14, %v2492_v53  ;;  %v3909_v63 = vmul.f32 -1.442695, %v6401_v15  ;;  %3054 = vmatmul.f32.gmra.mxu0 %v2944_v16  ;;  %3167 = vmatmul.f32.gmra.mxu1 %v2944_v16  ;;  %vm2496_vm6 = vmor %vm2494_vm5, %vm2495_vm3  ;;  %4178 = vrsqrt.f32 %v6394_v54  ;;  %vm2499_vm7 = vcmp.eq.f32.partialorder %v2498_v48, 8.507059e+37  ;;  %8010 = vst [vmem:[#allocation196_spill] sm:$0xff] %v6424_v29 }
 0x2fc   : > { %v4177_v18 = vpop.eup %4176  ;;  %v6419_v39 = vadd.f32 1.0, %v4175_v30  ;;  %3280 = vmatmul.f32.gmra.mxu2 %v2944_v16  ;;  %v6428_v36 = vadd.f32 %v6096_v11, %v5933_v35  ;;  %v1992_v22 = vmul.f32 %v6406_v10, %v6353_v27  ;;  %v1589_v53 = vadd.f32 %v1557_v45, %v6057_v57 }
 0x2fd   : > { %v2497_v40 = vsel %vm2496_vm6, %v4169_v14, %v2493_v32  ;;  %v2505_v59 = vmul.f32 %v4177_v18, %v6379_v28  ;;  %4180 = vpow2.f32 %v3909_v63  ;;  %2276 = vmatmul.f32.gmra.mxu3 %v1954_v12  ;;  %v6434_v14 = vpop.f32.mrf.mxu1  ;;  %v1963_v12 = vsel %vm1962_vm2, %v6227_v58, %v1961_v1 }
 0x2fe   : > { %v2502_v26 = vsel %vm2499_vm7, %v2501_v51, %v2497_v40  ;;  %4182 = vrcp.f32 %v6419_v39  ;;  %8011 = vst [vmem:[#allocation197_spill] sm:$0xff] %v6434_v14  ;;  %v2513_v35 = vand.u32 2147483647, %v6379_v28  ;;  %v2515_v30 = vand.u32 2147483648, %v6379_v28 }
 0x2ff   : > { %v2913_v48 = vmul.f32 %v2502_v26, %v6275_v9  ;;  %v2506_v16 = vsub.f32 1.0, %v2505_v59  ;;  %v1972_v63 = vmul.f32 %v6320_v13, %v1971_v31  ;;  %v1982_v51 = vmul.f32 0.5, %v1981_v62 }
 0x300   : > { %v2229_v32 = vpop.f32.mrf.mxu3  ;;  %vm2510_vm8 = vweird.f32 %v4177_v18  ;;  %v1558_v59 = vmul.f32 %v6434_v14, %v6434_v14  ;;  %v1966_v1 = vsel %vm1964_vm4, %v1965_v8, %v1963_v12  ;;  %vm1974_vm9 = vcmp.eq.f32.partialorder %v6268_v0, inf }
 0x301   : > { %v2507_v40 = vmul.f32 %v4177_v18, %v2506_v16  ;;  %v6444_v57 = vadd.f32 %v2229_v32, %v6282_v3  ;;  %v2945_v45 = vmul.f32 1.6666666, %v2913_v48  ;;  %v6446_v9 = vpop.eup %4178  ;;  %v1993_v26 = vmul.f32 %v6406_v10, %v1992_v22  ;;  %v6459_v48 = vpop.f32.mrf.mxu2 }
 0x302   : > { %v6454_v31 = vadd.f32 1e-08, %v1589_v53  ;;  %vm2509_vm10 = vweird.f32 %v6379_v28  ;;  %vm1976_vm11 = vcmp.eq.f32.partialorder %v6268_v0, 0.0  ;;  %v2516_v8 = vor.u32 1.1754944e-38, %v2515_v30 }
 0x303   : > { %v4181_v13 = vpop.eup %4180  ;;  %v2508_v62 = vadd.f32 %v4177_v18, %v2507_v40  ;;  %v3910_v3 = vmul.f32 -1.442695, %v6444_v57  ;;  %3057 = vmatmul.f32.gmra.mxu0 %v2945_v45  ;;  %3170 = vmatmul.f32.gmra.mxu1 %v2945_v45  ;;  %vm2511_vm12 = vmor %vm2509_vm10, %vm2510_vm8  ;;  %v1973_v22 = vmul.f32 %v1972_v63, %v6268_v0  ;;  %v1983_v53 = vsub.f32 1.5, %v1982_v51 }
 0x304   : > { %v4183_v58 = vpop.eup %4182  ;;  %v6462_v16 = vadd.f32 1.0, %v4181_v13  ;;  %3283 = vmatmul.f32.gmra.mxu2 %v2945_v45  ;;  %vm2514_vm13 = vcmp.eq.f32.partialorder %v2513_v35, 8.507059e+37  ;;  %v1994_v40 = vmul.f32 0.5, %v1993_v26  ;;  %v2004_v14 = vmul.f32 %v6446_v9, %v6394_v54 }
 0x305   : > { %v2512_v12 = vsel %vm2511_vm12, %v4177_v18, %v2508_v62  ;;  %v2520_v28 = vmul.f32 %v4183_v58, %v6419_v39  ;;  %4184 = vpow2.f32 %v3910_v3  ;;  %2279 = vmatmul.f32.gmra.mxu3 %v1966_v1  ;;  %v1590_v30 = vadd.f32 %v1558_v59, %v6100_v60  ;;  %v6472_v18 = vpop.f32.mrf.mxu0 }
 0x306   : > { %v2517_v32 = vsel %vm2514_vm13, %v2516_v8, %v2512_v12  ;;  %4186 = vrcp.f32 %v6462_v16  ;;  %8012 = vst [vmem:[#allocation198_spill] sm:$0xff] %v6472_v18  ;;  %v2528_v35 = vand.u32 2147483647, %v6419_v39  ;;  %v2530_v63 = vand.u32 2147483648, %v6419_v39  ;;  %v8045_v18 = vld [vmem:[#allocation100_spill] sm:$0xff] }
 0x307   : > { %v2914_v45 = vmul.f32 %v2517_v32, %v6317_v5  ;;  %v2521_v13 = vsub.f32 1.0, %v2520_v28  ;;  %4188 = vrsqrt.f32 %v6454_v31  ;;  %v1975_v1 = vsel %vm1974_vm9, %v6268_v0, %v1973_v22 }
 0x308   : > { %v2232_v51 = vpop.f32.mrf.mxu3  ;;  %v1984_v26 = vmul.f32 %v6382_v23, %v1983_v53  ;;  %vm2525_vm14 = vweird.f32 %v4183_v58  ;;  %v6485_v59 = vadd.f32 %v6096_v11, %v5965_v20  ;;  %v1977_v3 = vand.u32 2147483648, %v6268_v0 }
 0x309   : > { %v2522_v62 = vmul.f32 %v4183_v58, %v2521_v13  ;;  %v6481_v60 = vadd.f32 %v2232_v51, %v6365_v19  ;;  %v2946_v5 = vmul.f32 1.6666666, %v2914_v45  ;;  %v1995_v8 = vsub.f32 1.5, %v1994_v40  ;;  %v6502_v13 = vpop.f32.mrf.mxu2 }
 0x30a   : > { %v2005_v12 = vmul.f32 %v6446_v9, %v2004_v14  ;;  %v6489_v32 = vadd.f32 1e-08, %v1590_v30  ;;  %vm2524_vm15 = vweird.f32 %v6419_v39  ;;  %v2531_v20 = vor.u32 1.1754944e-38, %v2530_v63 }
 0x30b   : > { %v4185_v28 = vpop.eup %4184  ;;  %v2523_v22 = vadd.f32 %v4183_v58, %v2522_v62  ;;  %v3911_v23 = vmul.f32 -1.442695, %v6481_v60  ;;  %3060 = vmatmul.f32.gmra.mxu0 %v2946_v5  ;;  %3173 = vmatmul.f32.gmra.mxu1 %v2946_v5  ;;  %vm2526_vm0 = vmor %vm2524_vm15, %vm2525_vm14  ;;  %v1978_v14 = vsel %vm1976_vm11, %v1977_v3, %v1975_v1  ;;  %v1985_v40 = vmul.f32 %v1984_v26, %v6330_v25 }
 0x30c   : > { %v4187_v19 = vpop.eup %4186  ;;  %v6494_v53 = vadd.f32 1.0, %v4185_v28  ;;  %3286 = vmatmul.f32.gmra.mxu2 %v2946_v5  ;;  %vm2529_vm1 = vcmp.eq.f32.partialorder %v2528_v35, 8.507059e+37  ;;  %vm1986_vm2 = vcmp.eq.f32.partialorder %v6330_v25, inf  ;;  %v1996_v0 = vmul.f32 %v6406_v10, %v1995_v8 }
 0x30d   : > { %v6499_v30 = vpop.eup %4188  ;;  %v2527_v45 = vsel %vm2526_vm0, %v4183_v58, %v2523_v22  ;;  %v2535_v39 = vmul.f32 %v4187_v19, %v6462_v16  ;;  %4190 = vpow2.f32 %v3911_v23  ;;  %2282 = vmatmul.f32.gmra.mxu3 %v1978_v14  ;;  %v2006_v26 = vmul.f32 0.5, %v2005_v12  ;;  %v6517_v8 = vpop.f32.mrf.mxu0 }
 0x30e   : > { %v2532_v51 = vsel %vm2529_vm1, %v2531_v20, %v2527_v45  ;;  %4192 = vrcp.f32 %v6494_v53  ;;  %v2543_v58 = vand.u32 2147483647, %v6462_v16  ;;  %v2545_v35 = vand.u32 2147483648, %v6462_v16  ;;  %8013 = vst [vmem:[#allocation199_spill] sm:$0xff] %v6517_v8  ;;  %v8044_v8 = vld [vmem:[#allocation74_spill] sm:$0xff] }
 0x30f   : > { %v2915_v63 = vmul.f32 %v2532_v51, %v6360_v42  ;;  %v2536_v1 = vsub.f32 1.0, %v2535_v39  ;;  %4194 = vrsqrt.f32 %v6489_v32  ;;  %v1987_v5 = vsel %vm1986_vm2, %v6330_v25, %v1985_v40 }
 0x310   : > { %v2235_v62 = vpop.f32.mrf.mxu3  ;;  %v2016_v3 = vmul.f32 %v6499_v30, %v6454_v31  ;;  %vm2540_vm3 = vweird.f32 %v4187_v19  ;;  %vm1988_vm4 = vcmp.eq.f32.partialorder %v6330_v25, 0.0  ;;  %v1989_v12 = vand.u32 2147483648, %v6330_v25 }
 0x311   : > { %v2537_v28 = vmul.f32 %v4187_v19, %v2536_v1  ;;  %v6515_v10 = vadd.f32 %v2235_v62, %v6428_v36  ;;  %v2947_v42 = vmul.f32 1.6666666, %v2915_v63  ;;  %v1997_v22 = vmul.f32 %v1996_v0, %v6353_v27 }
 0x312   : > { %vm1998_vm5 = vcmp.eq.f32.partialorder %v6353_v27, inf  ;;  %vm2539_vm6 = vweird.f32 %v6462_v16  ;;  %v2007_v36 = vsub.f32 1.5, %v2006_v26  ;;  %v2546_v45 = vor.u32 1.1754944e-38, %v2545_v35 }
 0x313   : > { %v4191_v23 = vpop.eup %4190  ;;  %v2538_v20 = vadd.f32 %v4187_v19, %v2537_v28  ;;  %v3912_v14 = vmul.f32 -1.442695, %v6515_v10  ;;  %3063 = vmatmul.f32.gmra.mxu0 %v2947_v42  ;;  %3176 = vmatmul.f32.gmra.mxu1 %v2947_v42  ;;  %vm2541_vm7 = vmor %vm2539_vm6, %vm2540_vm3  ;;  %v1990_v51 = vsel %vm1988_vm4, %v1989_v12, %v1987_v5  ;;  %v2017_v0 = vmul.f32 %v6499_v30, %v2016_v3 }
 0x314   : > { %v4193_v40 = vpop.eup %4192  ;;  %v6526_v39 = vadd.f32 1.0, %v4191_v23  ;;  %3289 = vmatmul.f32.gmra.mxu2 %v2947_v42  ;;  %vm2544_vm8 = vcmp.eq.f32.partialorder %v2543_v58, 8.507059e+37  ;;  %vm2000_vm9 = vcmp.eq.f32.partialorder %v6353_v27, 0.0  ;;  %v2001_v35 = vand.u32 2147483648, %v6353_v27  ;;  %v6542_v58 = vpop.f32.mrf.mxu2 }
 0x315   : > { %v6531_v63 = vpop.eup %4194  ;;  %v2542_v16 = vsel %vm2541_vm7, %v4187_v19, %v2538_v20  ;;  %v2550_v1 = vmul.f32 %v4193_v40, %v6494_v53  ;;  %4196 = vpow2.f32 %v3912_v14  ;;  %2285 = vmatmul.f32.gmra.mxu3 %v1990_v51  ;;  %v1999_v5 = vsel %vm1998_vm5, %v6353_v27, %v1997_v22 }
 0x316   : > { %v2547_v26 = vsel %vm2544_vm8, %v2546_v45, %v2542_v16  ;;  %4198 = vrcp.f32 %v6526_v39  ;;  %v2008_v19 = vmul.f32 %v6446_v9, %v2007_v36  ;;  %v2558_v3 = vand.u32 2147483647, %v6494_v53  ;;  %v6556_v16 = vpop.f32.mrf.mxu0 }
 0x317   : > { %v2916_v25 = vmul.f32 %v2547_v26, %v6401_v15  ;;  %v2551_v62 = vsub.f32 1.0, %v2550_v1  ;;  %v2560_v28 = vand.u32 2147483648, %v6494_v53  ;;  %v2018_v12 = vmul.f32 0.5, %v2017_v0  ;;  %8014 = vst [vmem:[#allocation200_spill] sm:$0xff] %v6556_v16  ;;  %v8043_v16 = vld [vmem:[#allocation49_spill] sm:$0xff] }
 0x318   : > { %v2238_v42 = vpop.f32.mrf.mxu3  ;;  %v2028_v23 = vmul.f32 %v6531_v63, %v6489_v32  ;;  %vm2555_vm10 = vweird.f32 %v4193_v40  ;;  %v2002_v9 = vsel %vm2000_vm9, %v2001_v35, %v1999_v5  ;;  %vm2554_vm11 = vweird.f32 %v6494_v53 }
 0x319   : > { %v2552_v20 = vmul.f32 %v4193_v40, %v2551_v62  ;;  %v6549_v15 = vadd.f32 %v2238_v42, %v6485_v59  ;;  %v2948_v14 = vmul.f32 1.6666666, %v2916_v25  ;;  %v2009_v51 = vmul.f32 %v2008_v19, %v6394_v54  ;;  %vm2556_vm12 = vmor %vm2554_vm11, %vm2555_vm10 }
 0x31a   : > { %v2561_v59 = vor.u32 1.1754944e-38, %v2560_v28  ;;  %v2019_v27 = vsub.f32 1.5, %v2018_v12  ;;  %v2029_v26 = vmul.f32 %v6531_v63, %v2028_v23  ;;  %vm2559_vm13 = vcmp.eq.f32.partialorder %v2558_v3, 8.507059e+37 }
 0x31b   : > { %v4197_v22 = vpop.eup %4196  ;;  %v2553_v36 = vadd.f32 %v4193_v40, %v2552_v20  ;;  %v3913_v45 = vmul.f32 -1.442695, %v6549_v15  ;;  %3066 = vmatmul.f32.gmra.mxu0 %v2948_v14  ;;  %3179 = vmatmul.f32.gmra.mxu1 %v2948_v14  ;;  %v2129_v25 = vadd.f32 %v6096_v11, %v6003_v50  ;;  %vm2010_vm14 = vcmp.eq.f32.partialorder %v6394_v54, inf }
 0x31c   : > { %v4199_v0 = vpop.eup %4198  ;;  %v6558_v1 = vadd.f32 1.0, %v4197_v22  ;;  %3292 = vmatmul.f32.gmra.mxu2 %v2948_v14  ;;  %v2011_v28 = vsel %vm2010_vm14, %v6394_v54, %v2009_v51  ;;  %v2573_v3 = vand.u32 2147483647, %v6526_v39  ;;  %v2575_v42 = vand.u32 2147483648, %v6526_v39 }
 0x31d   : > { %v2557_v35 = vsel %vm2556_vm12, %v4193_v40, %v2553_v36  ;;  %v2565_v53 = vmul.f32 %v4199_v0, %v6526_v39  ;;  %4200 = vpow2.f32 %v3913_v45  ;;  %2288 = vmatmul.f32.gmra.mxu3 %v2002_v9  ;;  %v2013_v40 = vand.u32 2147483648, %v6394_v54  ;;  %v6574_v9 = vpop.f32.mrf.mxu2 }
 0x31e   : > { %v2562_v62 = vsel %vm2559_vm13, %v2561_v59, %v2557_v35  ;;  %4202 = vrcp.f32 %v6558_v1  ;;  %v2020_v23 = vmul.f32 %v6499_v30, %v2019_v27  ;;  %v2030_v50 = vmul.f32 0.5, %v2029_v26 }
 0x31f   : > { %v2917_v5 = vmul.f32 %v2562_v62, %v6444_v57  ;;  %v2566_v19 = vsub.f32 1.0, %v2565_v53  ;;  %vm2570_vm15 = vweird.f32 %v4199_v0  ;;  %vm2012_vm0 = vcmp.eq.f32.partialorder %v6394_v54, 0.0 }
 0x320   : > { %v2241_v12 = vpop.f32.mrf.mxu3  ;;  %vm2569_vm1 = vweird.f32 %v6526_v39  ;;  %v2014_v45 = vsel %vm2012_vm0, %v2013_v40, %v2011_v28  ;;  %v2576_v51 = vor.u32 1.1754944e-38, %v2575_v42  ;;  %v2021_v27 = vmul.f32 %v2020_v23, %v6454_v31  ;;  %v6583_v39 = vpop.f32.mrf.mxu0 }
 0x321   : > { %v2949_v11 = vmul.f32 1.6666666, %v2917_v5  ;;  %v2567_v20 = vmul.f32 %v4199_v0, %v2566_v19  ;;  %v6572_v14 = vadd.f32 %v2241_v12, %v2129_v25  ;;  %vm2571_vm2 = vmor %vm2569_vm1, %vm2570_vm15  ;;  %v2031_v26 = vsub.f32 1.5, %v2030_v50  ;;  %8015 = vst [vmem:[#allocation201_spill] sm:$0xff] %v6583_v39  ;;  %v6589_v25 = vld [vmem:[%s7602_s4] ss:$0 sm:$0xff] }
 0x322   : > { %vm2574_vm3 = vcmp.eq.f32.partialorder %v2573_v3, 8.507059e+37  ;;  %v2132_v62 = vadd.f32 %v6589_v25, %v6043_v55  ;;  %vm2022_vm4 = vcmp.eq.f32.partialorder %v6454_v31, inf  ;;  %v2588_v19 = vand.u32 2147483647, %v6558_v1  ;;  %v8042_v39 = vld [vmem:[#allocation54_spill] sm:$0xff] }
 0x323   : > { %v4201_v57 = vpop.eup %4200  ;;  %v2568_v22 = vadd.f32 %v4199_v0, %v2567_v20  ;;  %v3914_v36 = vmul.f32 -1.442695, %v6572_v14  ;;  %3069 = vmatmul.f32.gmra.mxu0 %v2949_v11  ;;  %3182 = vmatmul.f32.gmra.mxu1 %v2949_v11  ;;  %v2590_v28 = vand.u32 2147483648, %v6558_v1  ;;  %v2023_v3 = vsel %vm2022_vm4, %v6454_v31, %v2021_v27 }
 0x324   : > { %v4203_v30 = vpop.eup %4202  ;;  %v6579_v59 = vadd.f32 1.0, %v4201_v57  ;;  %3295 = vmatmul.f32.gmra.mxu2 %v2949_v11  ;;  %v2032_v42 = vmul.f32 %v6531_v63, %v2031_v26  ;;  %v2025_v55 = vand.u32 2147483648, %v6454_v31  ;;  %vm2584_vm6 = vweird.f32 %v6558_v1 }
 0x325   : > { %v2572_v35 = vsel %vm2571_vm2, %v4199_v0, %v2568_v22  ;;  %v2580_v54 = vmul.f32 %v4203_v30, %v6558_v1  ;;  %4204 = vpow2.f32 %v3914_v36  ;;  %2291 = vmatmul.f32.gmra.mxu3 %v2014_v45  ;;  %vm2585_vm5 = vweird.f32 %v4203_v30  ;;  %v6605_v57 = vpop.f32.mrf.mxu2 }
 0x326   : > { %v2577_v53 = vsel %vm2574_vm3, %v2576_v51, %v2572_v35  ;;  %4206 = vrcp.f32 %v6579_v59  ;;  %vm2024_vm7 = vcmp.eq.f32.partialorder %v6454_v31, 0.0  ;;  %8016 = vst [vmem:[#allocation202_spill] sm:$0xff] %v6605_v57  ;;  %vm2586_vm8 = vmor %vm2584_vm6, %vm2585_vm5  ;;  %v2591_v22 = vor.u32 1.1754944e-38, %v2590_v28 }
 0x327   : > { %v2918_v0 = vmul.f32 %v2577_v53, %v6481_v60  ;;  %v2581_v5 = vsub.f32 1.0, %v2580_v54  ;;  %v2026_v45 = vsel %vm2024_vm7, %v2025_v55, %v2023_v3  ;;  %v2033_v51 = vmul.f32 %v2032_v42, %v6489_v32 }
 0x328   : > { %v2244_v40 = vpop.f32.mrf.mxu3  ;;  %vm2589_vm9 = vcmp.eq.f32.partialorder %v2588_v19, 8.507059e+37  ;;  %v2135_v31 = vadd.f32 %v6589_v25, %v6076_v34  ;;  %vm2034_vm10 = vcmp.eq.f32.partialorder %v6489_v32, inf  ;;  %v6616_v53 = vpop.f32.mrf.mxu0  ;;  %v2037_v34 = vand.u32 2147483648, %v6489_v32 }
 0x329   : > { %v2950_v12 = vmul.f32 1.6666666, %v2918_v0  ;;  %v2582_v23 = vmul.f32 %v4203_v30, %v2581_v5  ;;  %v6599_v50 = vadd.f32 %v2244_v40, %v2132_v62  ;;  %8017 = vst [vmem:[#allocation203_spill] sm:$0xff] %v6616_v53  ;;  %v2605_v62 = vand.u32 2147483648, %v6579_v59 }
 0x32a   : > { %v2035_v5 = vsel %vm2034_vm10, %v6489_v32, %v2033_v51  ;;  %vm2599_vm12 = vweird.f32 %v6579_v59  ;;  %vm2036_vm13 = vcmp.eq.f32.partialorder %v6489_v32, 0.0  ;;  %v2138_v32 = vadd.f32 %v6589_v25, %v6117_v56 }
 0x32b   : > { %v4205_v60 = vpop.eup %4204  ;;  %v2583_v11 = vadd.f32 %v4203_v30, %v2582_v23  ;;  %v3915_v20 = vmul.f32 -1.442695, %v6599_v50  ;;  %3072 = vmatmul.f32.gmra.mxu0 %v2950_v12  ;;  %3185 = vmatmul.f32.gmra.mxu1 %v2950_v12  ;;  %v2606_v23 = vor.u32 1.1754944e-38, %v2605_v62 }
 0x32c   : > { %v4207_v63 = vpop.eup %4206  ;;  %v6607_v36 = vadd.f32 1.0, %v4205_v60  ;;  %3298 = vmatmul.f32.gmra.mxu2 %v2950_v12  ;;  %v2038_v60 = vsel %vm2036_vm13, %v2037_v34, %v2035_v5 }
 0x32d   : > { %v2587_v27 = vsel %vm2586_vm8, %v4203_v30, %v2583_v11  ;;  %v2595_v1 = vmul.f32 %v4207_v63, %v6579_v59  ;;  %4208 = vpow2.f32 %v3915_v20  ;;  %2294 = vmatmul.f32.gmra.mxu3 %v2026_v45  ;;  %v2603_v30 = vand.u32 2147483647, %v6579_v59  ;;  %v6630_v59 = vpop.f32.mrf.mxu2 }
 0x32e   : > { %v2592_v26 = vsel %vm2589_vm9, %v2591_v22, %v2587_v27  ;;  %4210 = vrcp.f32 %v6607_v36  ;;  %vm2600_vm11 = vweird.f32 %v4207_v63  ;;  %8018 = vst [vmem:[#allocation204_spill] sm:$0xff] %v6630_v59  ;;  %v2618_v27 = vand.u32 2147483647, %v6607_v36 }
 0x32f   : > { %v2919_v35 = vmul.f32 %v2592_v26, %v6515_v10  ;;  %v2596_v54 = vsub.f32 1.0, %v2595_v1  ;;  %vm2601_vm14 = vmor %vm2599_vm12, %vm2600_vm11  ;;  %vm2604_vm15 = vcmp.eq.f32.partialorder %v2603_v30, 8.507059e+37  ;;  %vm2614_vm1 = vweird.f32 %v6607_v36 }
 0x330   : > { %v2247_v0 = vpop.f32.mrf.mxu3  ;;  %vm2619_vm3 = vcmp.eq.f32.partialorder %v2618_v27, 8.507059e+37 }
 0x331   : > { %v2951_v19 = vmul.f32 1.6666666, %v2919_v35  ;;  %v2597_v28 = vmul.f32 %v4207_v63, %v2596_v54  ;;  %v6621_v40 = vadd.f32 %v2247_v0, %v2135_v31  ;;  %v6640_v54 = vpop.f32.mrf.mxu0 }
 0x332   : > { %8019 = vst [vmem:[#allocation205_spill] sm:$0xff] %v6640_v54  ;;  %v8039_v54 = vld [vmem:[#allocation52_spill] sm:$0xff] }
 0x333   : > { %v4209_v10 = vpop.eup %4208  ;;  %v2598_v3 = vadd.f32 %v4207_v63, %v2597_v28  ;;  %v3916_v42 = vmul.f32 -1.442695, %v6621_v40  ;;  %3075 = vmatmul.f32.gmra.mxu0 %v2951_v19  ;;  %3188 = vmatmul.f32.gmra.mxu1 %v2951_v19 }
 0x334   : > { %v4211_v12 = vpop.eup %4210  ;;  %v6627_v55 = vadd.f32 1.0, %v4209_v10  ;;  %3301 = vmatmul.f32.gmra.mxu2 %v2951_v19 }
 0x335   : > { %v2602_v11 = vsel %vm2601_vm14, %v4207_v63, %v2598_v3  ;;  %v2610_v20 = vmul.f32 %v4211_v12, %v6607_v36  ;;  %4212 = vpow2.f32 %v3916_v42  ;;  %2297 = vmatmul.f32.gmra.mxu3 %v2038_v60  ;;  %v2620_v63 = vand.u32 2147483648, %v6607_v36  ;;  %v6651_v42 = vpop.f32.mrf.mxu2 }
 0x336   : > { %v2607_v22 = vsel %vm2604_vm15, %v2606_v23, %v2602_v11  ;;  %4214 = vrcp.f32 %v6627_v55  ;;  %vm2615_vm0 = vweird.f32 %v4211_v12  ;;  %v2141_v36 = vadd.f32 %v6589_v25, %v6144_v43  ;;  %8020 = vst [vmem:[#allocation206_spill] sm:$0xff] %v6651_v42 }
 0x337   : > { %v2920_v45 = vmul.f32 %v2607_v22, %v6549_v15  ;;  %v2611_v51 = vsub.f32 1.0, %v2610_v20  ;;  %vm2616_vm2 = vmor %vm2614_vm1, %vm2615_vm0  ;;  %v2621_v0 = vor.u32 1.1754944e-38, %v2620_v63  ;;  %v2633_v23 = vand.u32 2147483647, %v6627_v55 }
 0x338   : > { %v2250_v1 = vpop.f32.mrf.mxu3  ;;  %v2635_v60 = vand.u32 2147483648, %v6627_v55  ;;  %vm2629_vm5 = vweird.f32 %v6627_v55 }
 0x339   : > { %v2952_v26 = vmul.f32 1.6666666, %v2920_v45  ;;  %v2612_v31 = vmul.f32 %v4211_v12, %v2611_v51  ;;  %v6638_v35 = vadd.f32 %v2250_v1, %v2138_v32  ;;  %v6659_v51 = vpop.f32.mrf.mxu0  ;;  %vm2634_vm7 = vcmp.eq.f32.partialorder %v2633_v23, 8.507059e+37  ;;  %v8028_v23 = vld [vmem:[#allocation38_spill] sm:$0xff] }
 0x33a   : > { %8021 = vst [vmem:[#allocation207_spill] sm:$0xff] %v6659_v51  ;;  %v2636_v27 = vor.u32 1.1754944e-38, %v2635_v60  ;;  %v8029_v60 = vld [vmem:[#allocation35_spill] sm:$0xff]  ;;  %v6698_v51 = vmul.f32 %v8038_v21, %v8037_v4  ;;  %v6710_v21 = vmul.f32 %v8043_v16, %v8042_v39 }
 0x33b   : > { %v4213_v30 = vpop.eup %4212  ;;  %v2613_v62 = vadd.f32 %v4211_v12, %v2612_v31  ;;  %v3917_v56 = vmul.f32 -1.442695, %v6638_v35  ;;  %3078 = vmatmul.f32.gmra.mxu0 %v2952_v26  ;;  %3191 = vmatmul.f32.gmra.mxu1 %v2952_v26  ;;  %v8022_v31 = vld [vmem:[#allocation28_spill] sm:$0xff]  ;;  %v8049_v16 = vld [vmem:[#allocation103_spill] sm:$0xff] }
 0x33c   : > { %v4215_v15 = vpop.eup %4214  ;;  %v6644_v5 = vadd.f32 1.0, %v4213_v30  ;;  %3304 = vmatmul.f32.gmra.mxu2 %v2952_v26  ;;  %v8023_v30 = vld [vmem:[#allocation26_spill] sm:$0xff]  ;;  %v1079_v39 = vmul.f32 %v8049_v16, %v8048_v44 }
 0x33d   : > { %v2617_v19 = vsel %vm2616_vm2, %v4211_v12, %v2613_v62  ;;  %v2625_v28 = vmul.f32 %v4215_v15, %v6627_v55  ;;  %4216 = vpow2.f32 %v3917_v56  ;;  %vm2630_vm4 = vweird.f32 %v4215_v15  ;;  %v8024_v62 = vld [vmem:[#allocation31_spill] sm:$0xff]  ;;  %v8025_v56 = vld [vmem:[#allocation29_spill] sm:$0xff] }
 0x33e   : > { %v2622_v34 = vsel %vm2619_vm3, %v2621_v0, %v2617_v19  ;;  %4218 = vrcp.f32 %v6644_v5  ;;  %vm2631_vm6 = vmor %vm2629_vm5, %vm2630_vm4  ;;  %v755_v55 = vmul.f32 %v8023_v30, %v8022_v31  ;;  %v756_v0 = vmul.f32 %v8025_v56, %v8024_v62  ;;  %v8034_v56 = vld [vmem:[#allocation40_spill] sm:$0xff] }
 0x33f   : > { %v2921_v10 = vmul.f32 %v2622_v34, %v6572_v14  ;;  %v2626_v3 = vsub.f32 1.0, %v2625_v28  ;;  %v8026_v28 = vld [vmem:[#allocation34_spill] sm:$0xff]  ;;  %v8027_v34 = vld [vmem:[#allocation32_spill] sm:$0xff]  ;;  %vm2644_vm9 = vweird.f32 %v6644_v5 }
 0x340   : > { %v2253_v12 = vpop.f32.mrf.mxu3 }
 0x341   : > { %v2953_v11 = vmul.f32 1.6666666, %v2921_v10  ;;  %v2627_v20 = vmul.f32 %v4215_v15, %v2626_v3  ;;  %v6655_v22 = vadd.f32 %v2253_v12, %v2141_v36  ;;  %v757_v36 = vmul.f32 %v8027_v34, %v8026_v28  ;;  %v8035_v34 = vld [vmem:[#allocation48_spill] sm:$0xff] }
 0x342   : > { %v2144_v10 = vadd.f32 %v6589_v25, %v6188_v33  ;;  %v6676_v12 = vmul.f32 %v8029_v60, %v8028_v23  ;;  %v8036_v60 = vld [vmem:[#allocation43_spill] sm:$0xff] }
 0x343   : > { %v4217_v32 = vpop.eup %4216  ;;  %v2628_v45 = vadd.f32 %v4215_v15, %v2627_v20  ;;  %v3918_v43 = vmul.f32 -1.442695, %v6655_v22  ;;  %3081 = vmatmul.f32.gmra.mxu0 %v2953_v11  ;;  %3194 = vmatmul.f32.gmra.mxu1 %v2953_v11  ;;  %v8031_v20 = vld [vmem:[#allocation37_spill] sm:$0xff] }
 0x344   : > { %v4219_v14 = vpop.eup %4218  ;;  %v6661_v63 = vadd.f32 1.0, %v4217_v32  ;;  %3307 = vmatmul.f32.gmra.mxu2 %v2953_v11  ;;  %v8030_v11 = vld [vmem:[#allocation41_spill] sm:$0xff] }
 0x345   : > { %v2632_v1 = vsel %vm2631_vm6, %v4215_v15, %v2628_v45  ;;  %v2640_v26 = vmul.f32 %v4219_v14, %v6644_v5  ;;  %4220 = vpow2.f32 %v3918_v43  ;;  %v6680_v32 = vmul.f32 %v8031_v20, %v8030_v11 }
 0x346   : > { %v2637_v19 = vsel %vm2634_vm7, %v2636_v27, %v2632_v1  ;;  %4222 = vrcp.f32 %v6661_v63  ;;  %v2648_v45 = vand.u32 2147483647, %v6644_v5  ;;  %v2650_v43 = vand.u32 2147483648, %v6644_v5 }
 0x347   : > { %v2922_v15 = vmul.f32 %v2637_v19, %v6599_v50  ;;  %v2641_v3 = vsub.f32 1.0, %v2640_v26  ;;  %vm2645_vm8 = vweird.f32 %v4219_v14  ;;  %v6686_v50 = vpop.f32.mrf.mxu2  ;;  %v8033_v26 = vld [vmem:[#allocation45_spill] sm:$0xff]  ;;  %v6694_v20 = vmul.f32 %v8036_v60, %v8035_v34  ;;  %v8061_v34 = vld [vmem:[#allocation80_spill] sm:$0xff] }
 0x348   : > { %v2256_v27 = vpop.f32.mrf.mxu3  ;;  %8032 = vst [vmem:[#allocation28_spill] sm:$0xff] %v6686_v50  ;;  %v6690_v19 = vmul.f32 %v8034_v56, %v8033_v26  ;;  %vm2646_vm10 = vmor %vm2644_vm9, %vm2645_vm8  ;;  %v2651_v29 = vor.u32 1.1754944e-38, %v2650_v43  ;;  %vm2649_vm11 = vcmp.eq.f32.partialorder %v2648_v45, 8.507059e+37  ;;  %v2665_v16 = vand.u32 2147483648, %v6661_v63 }
 0x349   : > { %v2954_v1 = vmul.f32 1.6666666, %v2922_v15  ;;  %v2642_v30 = vmul.f32 %v4219_v14, %v2641_v3  ;;  %v6684_v33 = vadd.f32 %v2256_v27, %v2144_v10  ;;  %v6702_v15 = vmul.f32 %v5160_v47, %v8039_v54  ;;  %v8040_v3 = vld [vmem:[#allocation70_spill] sm:$0xff]  ;;  %v8041_v27 = vld [vmem:[#allocation97_spill] sm:$0xff]  ;;  %v6722_v54 = vpop.f32.mrf.mxu0 }
 0x34a   : > { %v1077_v46 = vmul.f32 %v8041_v27, %v8040_v3  ;;  %v1078_v47 = vmul.f32 %v8045_v18, %v8044_v8  ;;  %v8046_v27 = vld [vmem:[#allocation117_spill] sm:$0xff]  ;;  %8050 = vst [vmem:[#allocation26_spill] sm:$0xff] %v6722_v54  ;;  %vm2659_vm13 = vweird.f32 %v6661_v63 }
 0x34b   : > { %v4221_v10 = vpop.eup %4220  ;;  %v2643_v53 = vadd.f32 %v4219_v14, %v2642_v30  ;;  %v3919_v56 = vmul.f32 -1.442695, %v6684_v33  ;;  %3084 = vmatmul.f32.gmra.mxu0 %v2954_v1  ;;  %3197 = vmatmul.f32.gmra.mxu1 %v2954_v1  ;;  %v1463_v37 = vmul.f32 %v8047_v52, %v8046_v27  ;;  %v2663_v52 = vand.u32 2147483647, %v6661_v63 }
 0x34c   : > { %v4223_v60 = vpop.eup %4222  ;;  %v6715_v6 = vadd.f32 1.0, %v4221_v10  ;;  %3310 = vmatmul.f32.gmra.mxu2 %v2954_v1  ;;  %v1109_v43 = vadd.f32 %v1077_v46, %v755_v55  ;;  %v2147_v1 = vadd.f32 %v6589_v25, %v6248_v17  ;;  %v1110_v45 = vadd.f32 %v1078_v47, %v756_v0  ;;  %v8051_v10 = vld [vmem:[#allocation122_spill] sm:$0xff]  ;;  %v8053_v46 = vld [vmem:[#allocation57_spill] sm:$0xff]  ;;  %v8054_v55 = vld [vmem:[#allocation51_spill] sm:$0xff] }
 0x34d   : > { %v2647_v30 = vsel %vm2646_vm10, %v4219_v14, %v2643_v53  ;;  %v2655_v5 = vmul.f32 %v4223_v60, %v6661_v63  ;;  %4224 = vpow2.f32 %v3919_v56  ;;  %v8052_v56 = vld [vmem:[#allocation105_spill] sm:$0xff]  ;;  %vm2660_vm12 = vweird.f32 %v4223_v60 }
 0x34e   : > { %v2652_v18 = vsel %vm2649_vm11, %v2651_v29, %v2647_v30  ;;  %4226 = vrcp.f32 %v6715_v6  ;;  %v1464_v50 = vmul.f32 %v8052_v56, %v8051_v10  ;;  %v6736_v17 = vmul.f32 %v8054_v55, %v8053_v46  ;;  %v8060_v56 = vld [vmem:[#allocation109_spill] sm:$0xff]  ;;  %vm2661_vm14 = vmor %vm2659_vm13, %vm2660_vm12  ;;  %v8065_v46 = vld [vmem:[#allocation114_spill] sm:$0xff] }
 0x34f   : > { %v2923_v53 = vmul.f32 %v2652_v18, %v6621_v40  ;;  %v2656_v14 = vsub.f32 1.0, %v2655_v5  ;;  %v8056_v40 = vld [vmem:[#allocation61_spill] sm:$0xff]  ;;  %v1111_v47 = vadd.f32 %v1079_v39, %v757_v36  ;;  %v8059_v18 = vld [vmem:[#allocation126_spill] sm:$0xff]  ;;  %v2666_v39 = vor.u32 1.1754944e-38, %v2665_v16 }
 0x350   : > { %v2259_v4 = vpop.f32.mrf.mxu3  ;;  %8055 = vst [vmem:[#allocation31_spill] sm:$0xff] %v6736_v17  ;;  %v8057_v5 = vld [vmem:[#allocation53_spill] sm:$0xff]  ;;  %v1465_v42 = vmul.f32 %v8060_v56, %v8059_v18  ;;  %vm2664_vm15 = vcmp.eq.f32.partialorder %v2663_v52, 8.507059e+37  ;;  %v8069_v52 = vld [vmem:[#allocation84_spill] sm:$0xff]  ;;  %vm2674_vm1 = vweird.f32 %v6715_v6 }
 0x351   : > { %v2955_v54 = vmul.f32 1.6666666, %v2923_v53  ;;  %v2657_v29 = vmul.f32 %v4223_v60, %v2656_v14  ;;  %v6732_v30 = vadd.f32 %v2259_v4, %v2147_v1  ;;  %v6740_v0 = vmul.f32 %v8057_v5, %v8056_v40  ;;  %v6748_v1 = vpop.f32.mrf.mxu2 }
 0x352   : > { %v1080_v53 = vmul.f32 %v8062_v38, %v8061_v34  ;;  %8063 = vst [vmem:[#allocation34_spill] sm:$0xff] %v6748_v1  ;;  %v1495_v5 = vadd.f32 %v1463_v37, %v1109_v43  ;;  %v1496_v40 = vadd.f32 %v1464_v50, %v1110_v45  ;;  %v1497_v63 = vadd.f32 %v1465_v42, %v1111_v47  ;;  %v8067_v43 = vld [vmem:[#allocation55_spill] sm:$0xff]  ;;  %v6767_v47 = vpop.f32.mrf.mxu0 }
 0x353   : > { %8058 = vst [vmem:[#allocation29_spill] sm:$0xff] %v6740_v0  ;;  %v4225_v2 = vpop.eup %4224  ;;  %v2658_v14 = vadd.f32 %v4223_v60, %v2657_v29  ;;  %v3920_v4 = vmul.f32 -1.442695, %v6732_v30  ;;  %3087 = vmatmul.f32.gmra.mxu0 %v2955_v54  ;;  %3200 = vmatmul.f32.gmra.mxu1 %v2955_v54  ;;  %v8064_v29 = vld [vmem:[#allocation130_spill] sm:$0xff]  ;;  %v2150_v50 = vadd.f32 %v6589_v25, %v6301_v41  ;;  %v8070_v42 = vld [vmem:[#allocation111_spill] sm:$0xff] }
 0x354   : > { %v4227_v55 = vpop.eup %4226  ;;  %v6751_v36 = vadd.f32 1.0, %v4225_v2  ;;  %3313 = vmatmul.f32.gmra.mxu2 %v2955_v54  ;;  %v1466_v0 = vmul.f32 %v8065_v46, %v8064_v29  ;;  %v1112_v37 = vadd.f32 %v1080_v53, %v6676_v12  ;;  %v1081_v16 = vmul.f32 %v8070_v42, %v8069_v52  ;;  %8071 = vst [vmem:[#allocation38_spill] sm:$0xff] %v6767_v47 }
 0x355   : > { %v2662_v56 = vsel %vm2661_vm14, %v4223_v60, %v2658_v14  ;;  %v2670_v38 = vmul.f32 %v4227_v55, %v6715_v6  ;;  %4228 = vpow2.f32 %v3920_v4  ;;  %v8066_v60 = vld [vmem:[#allocation64_spill] sm:$0xff]  ;;  %v2678_v46 = vand.u32 2147483647, %v6715_v6 }
 0x356   : > { %v2667_v17 = vsel %vm2664_vm15, %v2666_v39, %v2662_v56  ;;  %4230 = vrcp.f32 %v6751_v36  ;;  %v6763_v45 = vmul.f32 %v8067_v43, %v8066_v60  ;;  %v2680_v14 = vand.u32 2147483648, %v6715_v6 }
 0x357   : > { %v2924_v2 = vmul.f32 %v2667_v17, %v6638_v35  ;;  %v2671_v54 = vsub.f32 1.0, %v2670_v38  ;;  %vm2675_vm0 = vweird.f32 %v4227_v55  ;;  %v8072_v35 = vld [vmem:[#allocation68_spill] sm:$0xff]  ;;  %v8073_v17 = vld [vmem:[#allocation58_spill] sm:$0xff]  ;;  %v1591_v56 = vmul.f32 0.088388346, %v1495_v5 }
 0x358   : > { %8068 = vst [vmem:[#allocation32_spill] sm:$0xff] %v6763_v45  ;;  %v2262_v12 = vpop.f32.mrf.mxu3  ;;  %v6775_v39 = vmul.f32 %v8073_v17, %v8072_v35  ;;  %v6777_v38 = vmul.f32 0.088388346, %v1496_v40  ;;  %v6779_v43 = vmul.f32 0.088388346, %v1497_v63  ;;  %v1498_v47 = vadd.f32 %v1466_v0, %v1112_v37  ;;  %v8075_v40 = vld [vmem:[#allocation135_spill] sm:$0xff]  ;;  %vm2676_vm2 = vmor %vm2674_vm1, %vm2675_vm0 }
 0x359   : > { %v2956_v53 = vmul.f32 1.6666666, %v2924_v2  ;;  %v2672_v4 = vmul.f32 %v4227_v55, %v2671_v54  ;;  %v6771_v41 = vadd.f32 %v2262_v12, %v2150_v50  ;;  %v3021_v50 = vld [vmem:[%s7604_s6] sm:$0x7]  ;;  %v1113_v5 = vadd.f32 %v1081_v16, %v6680_v32  ;;  %v8076_v12 = vld [vmem:[#allocation119_spill] sm:$0xff]  ;;  %v6793_v17 = vpop.f32.mrf.mxu2  ;;  %v8078_v35 = vld [vmem:[#allocation88_spill] sm:$0xff] }
 0x35a   : > { %8074 = vst [vmem:[#allocation35_spill] sm:$0xff] %v6775_v39  ;;  %v1467_v63 = vmul.f32 %v8076_v12, %v8075_v40  ;;  %v2681_v0 = vor.u32 1.1754944e-38, %v2680_v14  ;;  %vm2679_vm3 = vcmp.eq.f32.partialorder %v2678_v46, 8.507059e+37  ;;  %v8079_v39 = vld [vmem:[#allocation115_spill] sm:$0xff]  ;;  %v6798_v16 = vperm.slane %v3021_v50, 1 }
 0x35b   : > { %v4229_v42 = vpop.eup %4228  ;;  %v2673_v60 = vadd.f32 %v4227_v55, %v2672_v4  ;;  %v3921_v2 = vmul.f32 -1.442695, %v6771_v41  ;;  %3090 = vmatmul.f32.gmra.mxu0 %v2956_v53  ;;  %3203 = vmatmul.f32.gmra.mxu1 %v2956_v53  ;;  %8077 = vst [vmem:[#allocation41_spill] sm:$0xff] %v6793_v17  ;;  %v1082_v45 = vmul.f32 %v8079_v39, %v8078_v35  ;;  %v6809_v12 = vperm.slane %v3021_v50, 0 }
 0x35c   : > { %v4231_v54 = vpop.eup %4230  ;;  %v6790_v37 = vadd.f32 1.0, %v4229_v42  ;;  %3316 = vmatmul.f32.gmra.mxu2 %v2956_v53  ;;  %v2153_v14 = vadd.f32 %v6589_v25, %v6350_v61  ;;  %v6805_v46 = vadd.f32 %v1467_v63, %v1113_v5  ;;  %v2693_v42 = vand.u32 2147483647, %v6751_v36  ;;  %v8082_v63 = vld [vmem:[#allocation92_spill] sm:$0xff] }
 0x35d   : > { %v2677_v6 = vsel %vm2676_vm2, %v4227_v55, %v2673_v60  ;;  %v2685_v4 = vmul.f32 %v4231_v54, %v6751_v36  ;;  %4232 = vpow2.f32 %v3921_v2  ;;  %v6803_v60 = vmul.f32 0.088388346, %v1498_v47  ;;  %v8080_v47 = vld [vmem:[#allocation140_spill] sm:$0xff] }
 0x35e   : > { %v2682_v32 = vsel %vm2679_vm3, %v2681_v0, %v2677_v6  ;;  %4234 = vrcp.f32 %v6790_v37  ;;  %v2695_v2 = vand.u32 2147483648, %v6751_v36  ;;  %vm2690_vm4 = vweird.f32 %v4231_v54 }
 0x35f   : > { %v2925_v53 = vmul.f32 %v2682_v32, %v6655_v22  ;;  %v2686_v55 = vsub.f32 1.0, %v2685_v4  ;;  %v1114_v22 = vadd.f32 %v1082_v45, %v6690_v19  ;;  %v8081_v4 = vld [vmem:[#allocation123_spill] sm:$0xff]  ;;  %v8083_v32 = vld [vmem:[#allocation118_spill] sm:$0xff]  ;;  %vm2689_vm5 = vweird.f32 %v6751_v36 }
 0x360   : > { %v2265_v39 = vpop.f32.mrf.mxu3  ;;  %v3046_v0 = vpop.f32.mrf.mxu0  ;;  %v1468_v5 = vmul.f32 %v8081_v4, %v8080_v47  ;;  %v1083_v59 = vmul.f32 %v8083_v32, %v8082_v63  ;;  %vm2691_vm6 = vmor %vm2689_vm5, %vm2690_vm4  ;;  %vm2694_vm7 = vcmp.eq.f32.partialorder %v2693_v42, 8.507059e+37  ;;  %v2696_v19 = vor.u32 1.1754944e-38, %v2695_v2  ;;  %v8084_v32 = vld [vmem:[#allocation144_spill] sm:$0xff] }
 0x361   : > { %v2957_v6 = vmul.f32 1.6666666, %v2925_v53  ;;  %v2687_v17 = vmul.f32 %v4231_v54, %v2686_v55  ;;  %v6811_v1 = vadd.f32 %v2265_v39, %v2153_v14  ;;  %v3159_v61 = vpop.f32.mrf.mxu1  ;;  %v6821_v14 = vperm.slane %v3021_v50, 2  ;;  %v8085_v50 = vld [vmem:[#allocation127_spill] sm:$0xff] }
 0x362   : > { %v3160_v35 = vadd.f32 %v3159_v61, %v6798_v16  ;;  %v3047_v36 = vadd.f32 %v3046_v0, %v6809_v12  ;;  %v6828_v4 = vadd.f32 %v1468_v5, %v1114_v22  ;;  %v1469_v63 = vmul.f32 %v8085_v50, %v8084_v32 }
 0x363   : > { %v4233_v26 = vpop.eup %4232  ;;  %v2688_v57 = vadd.f32 %v4231_v54, %v2687_v17  ;;  %v3922_v53 = vmul.f32 -1.442695, %v6811_v1  ;;  %3093 = vmatmul.f32.gmra.mxu0 %v2957_v6  ;;  %3206 = vmatmul.f32.gmra.mxu1 %v2957_v6  ;;  %v1115_v42 = vadd.f32 %v1083_v59, %v6694_v20  ;;  %v2708_v2 = vand.u32 2147483647, %v6790_v37 }
 0x364   : > { %v4235_v55 = vpop.eup %4234  ;;  %v6824_v45 = vadd.f32 1.0, %v4233_v26  ;;  %v3368_v39 = vmul.f32 %v3160_v35, %v1591_v56  ;;  %3319 = vmatmul.f32.gmra.mxu2 %v2957_v6  ;;  %v2710_v0 = vand.u32 2147483648, %v6790_v37  ;;  %vm2704_vm9 = vweird.f32 %v6790_v37 }
 0x365   : > { %v2692_v61 = vsel %vm2691_vm6, %v4231_v54, %v2688_v57  ;;  %v2700_v17 = vmul.f32 %v4235_v55, %v6790_v37  ;;  %4236 = vpow2.f32 %v3922_v53  ;;  %v2156_v54 = vadd.f32 %v6589_v25, %v6404_v49 }
 0x366   : > { %v2697_v47 = vsel %vm2694_vm7, %v2696_v19, %v2692_v61  ;;  %4238 = vrcp.f32 %v6824_v45  ;;  %v3400_v56 = vadd.f32 %v3368_v39, %v3047_v36  ;;  %vm2705_vm8 = vweird.f32 %v4235_v55 }
 0x367   : > { %v2926_v26 = vmul.f32 %v2697_v47, %v6684_v33  ;;  %v2701_v35 = vsub.f32 1.0, %v2700_v17  ;;  %v3272_v57 = vpop.f32.mrf.mxu2  ;;  %vm2706_vm10 = vmor %vm2704_vm9, %vm2705_vm8  ;;  %v2711_v50 = vor.u32 1.1754944e-38, %v2710_v0  ;;  %vm2709_vm11 = vcmp.eq.f32.partialorder %v2708_v2, 8.507059e+37 }
 0x368   : > { %v3273_v6 = vadd.f32 %v3272_v57, %v6821_v14  ;;  %v2268_v22 = vpop.f32.mrf.mxu3  ;;  %v3049_v5 = vpop.f32.mrf.mxu0  ;;  %v3432_v59 = vmul.f32 0.70710677, %v3400_v56  ;;  %v8087_v56 = vld [vmem:[#allocation121_spill] sm:$0xff]  ;;  %vm2719_vm13 = vweird.f32 %v6824_v45 }
 0x369   : > { %v2958_v53 = vmul.f32 1.6666666, %v2926_v26  ;;  %v2702_v19 = vmul.f32 %v4235_v55, %v2701_v35  ;;  %v3162_v33 = vpop.f32.mrf.mxu1  ;;  %v6843_v39 = vadd.f32 %v2268_v22, %v2156_v54  ;;  %v3050_v0 = vadd.f32 %v3049_v5, %v6809_v12 }
 0x36a   : > { %v3496_v20 = vmul.f32 %v3273_v6, %v8022_v31  ;;  %v3560_v47 = vmul.f32 %v3273_v6, %v8040_v3  ;;  %v3624_v49 = vmul.f32 %v3273_v6, %v8046_v27  ;;  %3464 = vst [vmem:[%s6848_s20] sm:$0xff] %v3432_v59  ;;  %v3163_v36 = vadd.f32 %v3162_v33, %v6798_v16 }
 0x36b   : > { %v4237_v61 = vpop.eup %4236  ;;  %v2703_v17 = vadd.f32 %v4235_v55, %v2702_v19  ;;  %3096 = vmatmul.f32.gmra.mxu0 %v2958_v53  ;;  %3209 = vmatmul.f32.gmra.mxu1 %v2958_v53  ;;  %v6853_v31 = vmul.f32 0.088388346, %v6805_v46  ;;  %v1501_v27 = vadd.f32 %v1469_v63, %v1115_v42  ;;  %v3923_v37 = vmul.f32 -1.442695, %v6843_v39  ;;  %v8086_v42 = vld [vmem:[#allocation95_spill] sm:$0xff] }
 0x36c   : > { %v4239_v3 = vpop.eup %4238  ;;  %v6856_v26 = vadd.f32 1.0, %v4237_v61  ;;  %3528 = vst [vmem:[%s6860_s24] sm:$0xff] %v3496_v20  ;;  %3322 = vmatmul.f32.gmra.mxu2 %v2958_v53  ;;  %v3369_v63 = vmul.f32 %v3163_v36, %v6777_v38  ;;  %v1084_v57 = vmul.f32 %v8087_v56, %v8086_v42  ;;  %v2159_v6 = vadd.f32 %v6589_v25, %v6459_v48  ;;  %v8089_v56 = vld [vmem:[#allocation132_spill] sm:$0xff] }
 0x36d   : > { %v2707_v35 = vsel %vm2706_vm10, %v4235_v55, %v2703_v17  ;;  %v2715_v46 = vmul.f32 %v4239_v3, %v6824_v45  ;;  %3592 = vst [vmem:[%s6860_s24 + $0x8] sm:$0xff] %v3560_v47  ;;  %v2723_v53 = vand.u32 2147483647, %v6824_v45  ;;  %v2725_v38 = vand.u32 2147483648, %v6824_v45 }
 0x36e   : > { %v2712_v54 = vsel %vm2709_vm11, %v2711_v50, %v2707_v35  ;;  %4240 = vrcp.f32 %v6856_v26  ;;  %3656 = vst [vmem:[%s6860_s24 + $0x10] sm:$0xff] %v3624_v49  ;;  %v3401_v19 = vadd.f32 %v3369_v63, %v3050_v0  ;;  %vm2720_vm12 = vweird.f32 %v4239_v3  ;;  %v8088_v63 = vld [vmem:[#allocation148_spill] sm:$0xff] }
 0x36f   : > { %v2927_v55 = vmul.f32 %v2712_v54, %v6732_v30  ;;  %v2716_v2 = vsub.f32 1.0, %v2715_v46  ;;  %4242 = vpow2.f32 %v3923_v37  ;;  %v3275_v22 = vpop.f32.mrf.mxu2  ;;  %v1470_v45 = vmul.f32 %v8089_v56, %v8088_v63  ;;  %vm2721_vm14 = vmor %vm2719_vm13, %vm2720_vm12 }
 0x370   : > { %v3276_v59 = vadd.f32 %v3275_v22, %v6821_v14  ;;  %v2271_v33 = vpop.f32.mrf.mxu3  ;;  %v3052_v20 = vpop.f32.mrf.mxu0  ;;  %v3433_v30 = vmul.f32 0.70710677, %v3401_v19  ;;  %vm2724_vm15 = vcmp.eq.f32.partialorder %v2723_v53, 8.507059e+37  ;;  %vm2734_vm1 = vweird.f32 %v6856_v26 }
 0x371   : > { %v2959_v47 = vmul.f32 1.6666666, %v2927_v55  ;;  %v2717_v49 = vmul.f32 %v4239_v3, %v2716_v2  ;;  %v6878_v5 = vadd.f32 %v2271_v33, %v2159_v6  ;;  %v3165_v48 = vpop.f32.mrf.mxu1  ;;  %v2740_v2 = vand.u32 2147483648, %v6856_v26 }
 0x372   : > { %v3497_v61 = vmul.f32 %v3276_v59, %v8024_v62  ;;  %v3561_v17 = vmul.f32 %v3276_v59, %v8044_v8  ;;  %v3625_v50 = vmul.f32 %v3276_v59, %v8051_v10  ;;  %v3166_v35 = vadd.f32 %v3165_v48, %v6798_v16  ;;  %3465 = vst [vmem:[%s6848_s20 + $0x8] sm:$0xff] %v3433_v30  ;;  %v8091_v30 = vld [vmem:[#allocation125_spill] sm:$0xff] }
 0x373   : > { %v2718_v36 = vadd.f32 %v4239_v3, %v2717_v49  ;;  %v3924_v37 = vmul.f32 -1.442695, %v6878_v5  ;;  %3099 = vmatmul.f32.gmra.mxu0 %v2959_v47  ;;  %3212 = vmatmul.f32.gmra.mxu1 %v2959_v47  ;;  %v2726_v62 = vor.u32 1.1754944e-38, %v2725_v38  ;;  %v6893_v8 = vmul.f32 0.088388346, %v6828_v4 }
 0x374   : > { %v6886_v46 = vpop.eup %4240  ;;  %3325 = vmatmul.f32.gmra.mxu2 %v2959_v47  ;;  %v6895_v10 = vmul.f32 0.088388346, %v1501_v27  ;;  %3529 = vst [vmem:[%s6860_s24 + $0x18] sm:$0xff] %v3497_v61  ;;  %v3370_v4 = vmul.f32 %v3166_v35, %v6779_v43  ;;  %v1116_v38 = vadd.f32 %v1084_v57, %v6698_v51  ;;  %v2162_v59 = vadd.f32 %v6589_v25, %v6502_v13 }
 0x375   : > { %v4243_v54 = vpop.eup %4242  ;;  %v2722_v0 = vsel %vm2721_vm14, %v4239_v3, %v2718_v36  ;;  %v2730_v6 = vmul.f32 %v6886_v46, %v6856_v26  ;;  %4244 = vpow2.f32 %v3924_v37  ;;  %3593 = vst [vmem:[%s6860_s24 + $0x20] sm:$0xff] %v3561_v17  ;;  %v3053_v3 = vadd.f32 %v3052_v20, %v6809_v12  ;;  %v8090_v20 = vld [vmem:[#allocation98_spill] sm:$0xff] }
 0x376   : > { %v2727_v55 = vsel %vm2724_vm15, %v2726_v62, %v2722_v0  ;;  %v6901_v22 = vadd.f32 1.0, %v4243_v54  ;;  %3657 = vst [vmem:[%s6860_s24 + $0x28] sm:$0xff] %v3625_v50  ;;  %vm2735_vm0 = vweird.f32 %v6886_v46  ;;  %v2738_v33 = vand.u32 2147483647, %v6856_v26 }
 0x377   : > { %v2928_v27 = vmul.f32 %v2727_v55, %v6771_v41  ;;  %v2731_v19 = vsub.f32 1.0, %v2730_v6  ;;  %v3278_v53 = vpop.f32.mrf.mxu2  ;;  %v3402_v41 = vadd.f32 %v3370_v4, %v3053_v3  ;;  %v1085_v61 = vmul.f32 %v8091_v30, %v8090_v20  ;;  %vm2736_vm2 = vmor %vm2734_vm1, %vm2735_vm0 }
 0x378   : > { %4246 = vrcp.f32 %v6901_v22  ;;  %v2274_v47 = vpop.f32.mrf.mxu3  ;;  %v3055_v43 = vpop.f32.mrf.mxu0  ;;  %v3279_v57 = vadd.f32 %v3278_v53, %v6821_v14  ;;  %v2741_v13 = vor.u32 1.1754944e-38, %v2740_v2  ;;  %v6931_v6 = vadd.f32 %v1470_v45, %v1116_v38 }
 0x379   : > { %v2960_v49 = vmul.f32 1.6666666, %v2928_v27  ;;  %v2732_v51 = vmul.f32 %v6886_v46, %v2731_v19  ;;  %v3168_v48 = vpop.f32.mrf.mxu1  ;;  %v6919_v17 = vadd.f32 %v2274_v47, %v2162_v59  ;;  %v3434_v37 = vmul.f32 0.70710677, %v3402_v41  ;;  %v8095_v19 = vld [vmem:[#allocation129_spill] sm:$0xff] }
 0x37a   : > { %v3498_v35 = vmul.f32 %v3279_v57, %v8026_v28  ;;  %v3562_v56 = vmul.f32 %v3279_v57, %v8048_v44  ;;  %v3626_v26 = vmul.f32 %v3279_v57, %v8059_v18  ;;  %v3169_v0 = vadd.f32 %v3168_v48, %v6798_v16  ;;  %v8092_v28 = vld [vmem:[#allocation165_spill] sm:$0xff]  ;;  %v8094_v18 = vld [vmem:[#allocation102_spill] sm:$0xff] }
 0x37b   : > { %v4245_v36 = vpop.eup %4244  ;;  %v2733_v50 = vadd.f32 %v6886_v46, %v2732_v51  ;;  %3102 = vmatmul.f32.gmra.mxu0 %v2960_v49  ;;  %3215 = vmatmul.f32.gmra.mxu1 %v2960_v49  ;;  %v3925_v54 = vmul.f32 -1.442695, %v6919_v17  ;;  %v8093_v44 = vld [vmem:[#allocation137_spill] sm:$0xff]  ;;  %vm2739_vm3 = vcmp.eq.f32.partialorder %v2738_v33, 8.507059e+37  ;;  %3466 = vst [vmem:[%s6848_s20 + $0x10] sm:$0xff] %v3434_v37  ;;  %v1117_v27 = vadd.f32 %v1085_v61, %v6702_v15 }
 0x37c   : > { %v6926_v62 = vadd.f32 1.0, %v4245_v36  ;;  %3328 = vmatmul.f32.gmra.mxu2 %v2960_v49  ;;  %v1471_v55 = vmul.f32 %v8093_v44, %v8092_v28  ;;  %v1086_v3 = vmul.f32 %v8095_v19, %v8094_v18  ;;  %3530 = vst [vmem:[%s6860_s24 + $0x30] sm:$0xff] %v3498_v35  ;;  %v2165_v45 = vadd.f32 %v6589_v25, %v6542_v58 }
 0x37d   : > { %v2737_v2 = vsel %vm2736_vm2, %v6886_v46, %v2733_v50  ;;  %v2753_v46 = vand.u32 2147483647, %v6901_v22  ;;  %3594 = vst [vmem:[%s6860_s24 + $0x38] sm:$0xff] %v3562_v56  ;;  %v3056_v15 = vadd.f32 %v3055_v43, %v6809_v12  ;;  %v3371_v47 = vmul.f32 %v3169_v0, %v6803_v60 }
 0x37e   : > { %v4247_v4 = vpop.eup %4246  ;;  %v2742_v53 = vsel %vm2739_vm3, %v2741_v13, %v2737_v2  ;;  %4248 = vrcp.f32 %v6926_v62  ;;  %3658 = vst [vmem:[%s6860_s24 + $0x40] sm:$0xff] %v3626_v26  ;;  %v1118_v56 = vadd.f32 %v1086_v3, %v6710_v21  ;;  %v8096_v26 = vld [vmem:[#allocation141_spill] sm:$0xff]  ;;  %vm2749_vm5 = vweird.f32 %v6901_v22 }
 0x37f   : > { %v2929_v38 = vmul.f32 %v2742_v53, %v6811_v1  ;;  %v2745_v59 = vmul.f32 %v4247_v4, %v6901_v22  ;;  %v3281_v33 = vpop.f32.mrf.mxu2  ;;  %4250 = vpow2.f32 %v3925_v54  ;;  %v2755_v1 = vand.u32 2147483648, %v6901_v22 }
 0x380   : > { %v3282_v49 = vadd.f32 %v3281_v33, %v6821_v14  ;;  %v2277_v51 = vpop.f32.mrf.mxu3  ;;  %v3058_v41 = vpop.f32.mrf.mxu0  ;;  %vm2750_vm4 = vweird.f32 %v4247_v4  ;;  %v3403_v61 = vadd.f32 %v3371_v47, %v3056_v15  ;;  %v1472_v54 = vmul.f32 %v8096_v26, %v5809_v7 }
 0x381   : > { %v2961_v57 = vmul.f32 1.6666666, %v2929_v38  ;;  %v2746_v58 = vsub.f32 1.0, %v2745_v59  ;;  %v6953_v48 = vadd.f32 %v2277_v51, %v2165_v45  ;;  %v3171_v30 = vpop.f32.mrf.mxu1  ;;  %vm2751_vm6 = vmor %vm2749_vm5, %vm2750_vm4  ;;  %vm2754_vm7 = vcmp.eq.f32.partialorder %v2753_v46, 8.507059e+37 }
 0x382   : > { %v3499_v13 = vmul.f32 %v3282_v49, %v8028_v23  ;;  %v3563_v43 = vmul.f32 %v3282_v49, %v8061_v34  ;;  %v3627_v60 = vmul.f32 %v3282_v49, %v8064_v29  ;;  %v3172_v37 = vadd.f32 %v3171_v30, %v6798_v16 }
 0x383   : > { %v2747_v36 = vmul.f32 %v4247_v4, %v2746_v58  ;;  %v3926_v50 = vmul.f32 -1.442695, %v6953_v48  ;;  %3105 = vmatmul.f32.gmra.mxu0 %v2961_v57  ;;  %3218 = vmatmul.f32.gmra.mxu1 %v2961_v57  ;;  %v3435_v23 = vmul.f32 0.70710677, %v3403_v61  ;;  %v6964_v34 = vadd.f32 %v1471_v55, %v1117_v27  ;;  %v8097_v61 = vld [vmem:[#allocation145_spill] sm:$0xff] }
 0x384   : > { %v4249_v35 = vpop.eup %4248  ;;  %3531 = vst [vmem:[%s6860_s24 + $0x48] sm:$0xff] %v3499_v13  ;;  %3331 = vmatmul.f32.gmra.mxu2 %v2961_v57  ;;  %v2756_v21 = vor.u32 1.1754944e-38, %v2755_v1  ;;  %v3059_v2 = vadd.f32 %v3058_v41, %v6809_v12  ;;  %v3372_v19 = vmul.f32 %v3172_v37, %v6853_v31  ;;  %v2768_v3 = vand.u32 2147483647, %v6926_v62 }
 0x385   : > { %v2748_v0 = vadd.f32 %v4247_v4, %v2747_v36  ;;  %v2760_v29 = vmul.f32 %v4249_v35, %v6926_v62  ;;  %3595 = vst [vmem:[%s6860_s24 + $0x50] sm:$0xff] %v3563_v43  ;;  %4252 = vpow2.f32 %v3926_v50  ;;  %v4251_v44 = vpop.eup %4250  ;;  %v2770_v38 = vand.u32 2147483648, %v6926_v62  ;;  %v8098_v43 = vld [vmem:[#allocation106_spill] sm:$0xff]  ;;  %v8099_v36 = vld [vmem:[#allocation133_spill] sm:$0xff] }
 0x386   : > { %3467 = vst [vmem:[%s6848_s20 + $0x18] sm:$0xff] %v3435_v23  ;;  %v6974_v53 = vadd.f32 1.0, %v4251_v44  ;;  %v3404_v59 = vadd.f32 %v3372_v19, %v3059_v2  ;;  %vm2765_vm8 = vweird.f32 %v4249_v35  ;;  %vm2764_vm9 = vweird.f32 %v6926_v62  ;;  %v8100_v44 = vld [vmem:[#allocation110_spill] sm:$0xff] }
 0x387   : > { %v2752_v55 = vsel %vm2751_vm6, %v4247_v4, %v2748_v0  ;;  %v2761_v27 = vsub.f32 1.0, %v2760_v29  ;;  %3659 = vst [vmem:[%s6860_s24 + $0x58] sm:$0xff] %v3627_v60  ;;  %v3284_v22 = vpop.f32.mrf.mxu2  ;;  %v2168_v4 = vadd.f32 %v6589_v25, %v6574_v9  ;;  %v6989_v13 = vmul.f32 %v8097_v61, %v5853_v24  ;;  %vm2766_vm10 = vmor %vm2764_vm9, %vm2765_vm8 }
 0x388   : > { %v2757_v45 = vsel %vm2754_vm7, %v2756_v21, %v2752_v55  ;;  %v3285_v46 = vadd.f32 %v3284_v22, %v6821_v14  ;;  %v2280_v33 = vpop.f32.mrf.mxu3  ;;  %v3061_v15 = vpop.f32.mrf.mxu0  ;;  %4254 = vrcp.f32 %v6974_v53  ;;  %v3436_v51 = vmul.f32 0.70710677, %v3404_v59  ;;  %v8101_v21 = vld [vmem:[#allocation136_spill] sm:$0xff] }
 0x389   : > { %v2930_v47 = vmul.f32 %v2757_v45, %v6843_v39  ;;  %v2762_v49 = vmul.f32 %v4249_v35, %v2761_v27  ;;  %v3174_v31 = vpop.f32.mrf.mxu1  ;;  %v2771_v9 = vor.u32 1.1754944e-38, %v2770_v38  ;;  %v6994_v62 = vadd.f32 %v2280_v33, %v2168_v4  ;;  %v8103_v33 = vld [vmem:[#allocation45_spill] sm:$0xff]  ;;  %v8105_v4 = vld [vmem:[#allocation140_spill] sm:$0xff] }
 0x38a   : > { %v3500_v41 = vmul.f32 %v3285_v46, %v8030_v11  ;;  %v3564_v39 = vmul.f32 %v3285_v46, %v8069_v52  ;;  %v3628_v30 = vmul.f32 %v3285_v46, %v8075_v40  ;;  %3468 = vst [vmem:[%s6848_s20 + $0x20] sm:$0xff] %v3436_v51  ;;  %vm2769_vm11 = vcmp.eq.f32.partialorder %v2768_v3, 8.507059e+37 }
 0x38b   : > { %v4253_v57 = vpop.eup %4252  ;;  %v2962_v58 = vmul.f32 1.6666666, %v2930_v47  ;;  %v2763_v1 = vadd.f32 %v4249_v35, %v2762_v49  ;;  %v3175_v52 = vadd.f32 %v3174_v31, %v6798_v16  ;;  %v6999_v40 = vmul.f32 0.088388346, %v6931_v6  ;;  %v8104_v47 = vld [vmem:[#allocation88_spill] sm:$0xff] }
 0x38c   : > { %v6991_v25 = vadd.f32 1.0, %v4253_v57  ;;  %3532 = vst [vmem:[%s6860_s24 + $0x60] sm:$0xff] %v3500_v41  ;;  %v7003_v60 = vmul.f32 %v8099_v36, %v8098_v43  ;;  %v7007_v37 = vadd.f32 %v1472_v54, %v1118_v56  ;;  %v3927_v23 = vmul.f32 -1.442695, %v6994_v62  ;;  %v7021_v56 = vld [vmem:[%s7602_s4] ss:$0 sm:$0xff] }
 0x38d   : > { %v2767_v11 = vsel %vm2766_vm10, %v4249_v35, %v2763_v1  ;;  %3108 = vmatmul.f32.gmra.mxu0 %v2962_v58  ;;  %3221 = vmatmul.f32.gmra.mxu1 %v2962_v58  ;;  %3596 = vst [vmem:[%s6860_s24 + $0x68] sm:$0xff] %v3564_v39  ;;  %v3062_v6 = vadd.f32 %v3061_v15, %v6809_v12  ;;  %v8102_v54 = vld [vmem:[#allocation202_spill] sm:$0xff]  ;;  %v2783_v22 = vand.u32 2147483647, %v6974_v53  ;;  %v2785_v46 = vand.u32 2147483648, %v6974_v53  ;;  %v8106_v1 = vld [vmem:[#allocation204_spill] sm:$0xff] }
 0x38e   : > { %v2772_v50 = vsel %vm2769_vm11, %v2771_v9, %v2767_v11  ;;  %4256 = vrcp.f32 %v6991_v25  ;;  %3334 = vmatmul.f32.gmra.mxu2 %v2962_v58  ;;  %v4255_v35 = vpop.eup %4254  ;;  %3660 = vst [vmem:[%s6860_s24 + $0x70] sm:$0xff] %v3628_v30  ;;  %v3373_v0 = vmul.f32 %v3175_v52, %v6893_v8  ;;  %v7016_v2 = vmul.f32 %v8101_v21, %v8100_v44 }
 0x38f   : > { %v2931_v26 = vmul.f32 %v2772_v50, %v6878_v5  ;;  %v3287_v29 = vpop.f32.mrf.mxu2  ;;  %v2171_v5 = vadd.f32 %v7021_v56, %v8102_v54  ;;  %v2775_v19 = vmul.f32 %v4255_v35, %v6974_v53  ;;  %4258 = vpow2.f32 %v3927_v23 }
 0x390   : > { %v3288_v55 = vadd.f32 %v3287_v29, %v6821_v14  ;;  %v2283_v27 = vpop.f32.mrf.mxu3  ;;  %v3064_v3 = vpop.f32.mrf.mxu0  ;;  %v3405_v45 = vadd.f32 %v3373_v0, %v3062_v6  ;;  %v2174_v39 = vadd.f32 %v7021_v56, %v8106_v1  ;;  %vm2780_vm12 = vweird.f32 %v4255_v35 }
 0x391   : > { %v2963_v8 = vmul.f32 1.6666666, %v2931_v26  ;;  %v3177_v38 = vpop.f32.mrf.mxu1  ;;  %v2776_v59 = vsub.f32 1.0, %v2775_v19  ;;  %v7032_v41 = vadd.f32 %v2283_v27, %v2171_v5  ;;  %v3065_v61 = vadd.f32 %v3064_v3, %v6809_v12 }
 0x392   : > { %v3501_v15 = vmul.f32 %v3288_v55, %v8103_v33  ;;  %v3565_v49 = vmul.f32 %v3288_v55, %v8104_v47  ;;  %v3437_v31 = vmul.f32 0.70710677, %v3405_v45  ;;  %v3629_v51 = vmul.f32 %v3288_v55, %v8105_v4  ;;  %v8113_v4 = vld [vmem:[#allocation92_spill] sm:$0xff] }
 0x393   : > { %v3178_v57 = vadd.f32 %v3177_v38, %v6798_v16  ;;  %v2777_v30 = vmul.f32 %v4255_v35, %v2776_v59  ;;  %vm2779_vm13 = vweird.f32 %v6974_v53  ;;  %v3928_v11 = vmul.f32 -1.442695, %v7032_v41  ;;  %v8109_v38 = vld [vmem:[#allocation31_spill] sm:$0xff] }
 0x394   : > { %v4257_v58 = vpop.eup %4256  ;;  %3533 = vst [vmem:[%s6860_s24 + $0x78] sm:$0xff] %v3501_v15  ;;  %vm7044_vm14 = vcmp.eq.f32.partialorder %v2783_v22, 8.507059e+37  ;;  %v2786_v26 = vor.u32 1.1754944e-38, %v2785_v46  ;;  %v2798_v23 = vand.u32 2147483647, %v6991_v25  ;;  %vm2781_vm15 = vmor %vm2779_vm13, %vm2780_vm12  ;;  %v2800_v0 = vand.u32 2147483648, %v6991_v25 }
 0x395   : > { %v2790_v9 = vmul.f32 %v4257_v58, %v6991_v25  ;;  %3469 = vst [vmem:[%s6848_s20 + $0x28] sm:$0xff] %v3437_v31  ;;  %v3374_v52 = vmul.f32 %v3178_v57, %v6895_v10  ;;  %3111 = vmatmul.f32.gmra.mxu0 %v2963_v8  ;;  %3224 = vmatmul.f32.gmra.mxu1 %v2963_v8  ;;  %v4259_v53 = vpop.eup %4258  ;;  %4260 = vpow2.f32 %v3928_v11  ;;  %vm2795_vm0 = vweird.f32 %v4257_v58  ;;  %v8111_v46 = vld [vmem:[#allocation149_spill] sm:$0xff] }
 0x396   : > { %v2778_v36 = vadd.f32 %v4255_v35, %v2777_v30  ;;  %3597 = vst [vmem:[%s6860_s24 + $0x80] sm:$0xff] %v3565_v49  ;;  %3337 = vmatmul.f32.gmra.mxu2 %v2963_v8  ;;  %v7053_v54 = vadd.f32 1.0, %v4259_v53  ;;  %v1119_v59 = vadd.f32 %v7003_v60, %v8109_v38  ;;  %vm2794_vm1 = vweird.f32 %v6991_v25  ;;  %v8112_v49 = vld [vmem:[#allocation48_spill] sm:$0xff]  ;;  %v8114_v30 = vld [vmem:[#allocation29_spill] sm:$0xff]  ;;  %v8115_v53 = vld [vmem:[#allocation175_spill] sm:$0xff] }
 0x397   : > { %v2791_v6 = vsub.f32 1.0, %v2790_v9  ;;  %3661 = vst [vmem:[%s6860_s24 + $0x88] sm:$0xff] %v3629_v51  ;;  %v3406_v10 = vadd.f32 %v3374_v52, %v3065_v61  ;;  %v3290_v29 = vpop.f32.mrf.mxu2  ;;  %vm2796_vm2 = vmor %vm2794_vm1, %vm2795_vm0  ;;  %v2801_v60 = vor.u32 1.1754944e-38, %v2800_v0  ;;  %v1120_v61 = vadd.f32 %v7016_v2, %v8114_v30  ;;  %v8121_v30 = vld [vmem:[#allocation28_spill] sm:$0xff] }
 0x398   : > { %v2782_v21 = vsel %vm2781_vm15, %v4255_v35, %v2778_v36  ;;  %v3291_v5 = vadd.f32 %v3290_v29, %v6821_v14  ;;  %v2286_v19 = vpop.f32.mrf.mxu3  ;;  %v3067_v55 = vpop.f32.mrf.mxu0  ;;  %v8110_v35 = vld [vmem:[#allocation172_spill] sm:$0xff]  ;;  %4262 = vrcp.f32 %v7053_v54  ;;  %vm2799_vm3 = vcmp.eq.f32.partialorder %v2798_v23, 8.507059e+37 }
 0x399   : > { %v2787_v27 = vsel %vm7044_vm14, %v2786_v26, %v2782_v21  ;;  %v2792_v3 = vmul.f32 %v4257_v58, %v2791_v6  ;;  %v3438_v8 = vmul.f32 0.70710677, %v3406_v10  ;;  %v7058_v22 = vadd.f32 %v2286_v19, %v2174_v39  ;;  %v3180_v45 = vpop.f32.mrf.mxu1  ;;  %v8116_v6 = vld [vmem:[#allocation154_spill] sm:$0xff] }
 0x39a   : > { %v1474_v33 = vmul.f32 %v8111_v46, %v8110_v35  ;;  %v2932_v15 = vmul.f32 %v2787_v27, %v6919_v17  ;;  %v3502_v31 = vmul.f32 %v3291_v5, %v8112_v49  ;;  %v3566_v51 = vmul.f32 %v3291_v5, %v8113_v4  ;;  %v8117_v10 = vld [vmem:[#allocation206_spill] sm:$0xff] }
 0x39b   : > { %v2793_v47 = vadd.f32 %v4257_v58, %v2792_v3  ;;  %3470 = vst [vmem:[%s6848_s20 + $0x30] sm:$0xff] %v3438_v8  ;;  %v3630_v1 = vmul.f32 %v3291_v5, %v8084_v32  ;;  %v3929_v17 = vmul.f32 -1.442695, %v7058_v22  ;;  %v4261_v39 = vpop.eup %4260  ;;  %v3181_v9 = vadd.f32 %v3180_v45, %v6798_v16  ;;  %v8119_v5 = vld [vmem:[#allocation139_spill] sm:$0xff] }
 0x39c   : > { %v2964_v57 = vmul.f32 1.6666666, %v2932_v15  ;;  %3534 = vst [vmem:[%s6860_s24 + $0x90] sm:$0xff] %v3502_v31  ;;  %v7077_v52 = vadd.f32 1.0, %v4261_v39  ;;  %v1599_v32 = vmul.f32 0.088388346, %v6964_v34  ;;  %v3068_v50 = vadd.f32 %v3067_v55, %v6809_v12 }
 0x39d   : > { %v2797_v25 = vsel %vm2796_vm2, %v4257_v58, %v2793_v47  ;;  %3598 = vst [vmem:[%s6860_s24 + $0x98] sm:$0xff] %v3566_v51  ;;  %4264 = vpow2.f32 %v3929_v17  ;;  %v3375_v2 = vmul.f32 %v3181_v9, %v6999_v40  ;;  %v7086_v26 = vmul.f32 0.088388346, %v7007_v37  ;;  %v8118_v40 = vld [vmem:[#allocation113_spill] sm:$0xff]  ;;  %v8120_v31 = vld [vmem:[#allocation50_spill] sm:$0xff] }
 0x39e   : > { %v2802_v11 = vsel %vm2799_vm3, %v2801_v60, %v2797_v25  ;;  %3114 = vmatmul.f32.gmra.mxu0 %v2964_v57  ;;  %3227 = vmatmul.f32.gmra.mxu1 %v2964_v57  ;;  %3662 = vst [vmem:[%s6860_s24 + $0xa0] sm:$0xff] %v3630_v1  ;;  %v4263_v23 = vpop.eup %4262  ;;  %v7090_v0 = vmul.f32 %v8116_v6, %v8115_v53  ;;  %4266 = vrcp.f32 %v7077_v52  ;;  %v2813_v45 = vand.u32 2147483647, %v7053_v54 }
 0x39f   : > { %v2933_v36 = vmul.f32 %v2802_v11, %v6953_v48  ;;  %3340 = vmatmul.f32.gmra.mxu2 %v2964_v57  ;;  %v3293_v58 = vpop.f32.mrf.mxu2  ;;  %v2177_v34 = vadd.f32 %v7021_v56, %v8117_v10  ;;  %v1505_v21 = vadd.f32 %v6989_v13, %v1119_v59  ;;  %v7098_v19 = vmul.f32 %v8119_v5, %v8118_v40 }
 0x3a0   : > { %v2289_v48 = vpop.f32.mrf.mxu3  ;;  %v3070_v29 = vpop.f32.mrf.mxu0  ;;  %v2805_v37 = vmul.f32 %v4263_v23, %v7053_v54  ;;  %v3407_v55 = vadd.f32 %v3375_v2, %v3068_v50  ;;  %v7101_v3 = vadd.f32 %v1474_v33, %v1120_v61  ;;  %v3294_v38 = vadd.f32 %v3293_v58, %v6821_v14 }
 0x3a1   : > { %v3183_v27 = vpop.f32.mrf.mxu1  ;;  %v2965_v8 = vmul.f32 1.6666666, %v2933_v36  ;;  %v7105_v46 = vadd.f32 %v2289_v48, %v2177_v34  ;;  %v2815_v13 = vand.u32 2147483648, %v7053_v54  ;;  %vm2810_vm4 = vweird.f32 %v4263_v23 }
 0x3a2   : > { %v2806_v15 = vsub.f32 1.0, %v2805_v37  ;;  %v3439_v59 = vmul.f32 0.70710677, %v3407_v55  ;;  %v3184_v47 = vadd.f32 %v3183_v27, %v6798_v16  ;;  %v3503_v4 = vmul.f32 %v3294_v38, %v8120_v31  ;;  %v8122_v27 = vld [vmem:[#allocation52_spill] sm:$0xff] }
 0x3a3   : > { %v4265_v49 = vpop.eup %4264  ;;  %v3567_v33 = vmul.f32 %v3294_v38, %v8086_v42  ;;  %v3631_v51 = vmul.f32 %v3294_v38, %v8088_v63  ;;  %v3930_v57 = vmul.f32 -1.442695, %v7105_v46  ;;  %v2180_v61 = vadd.f32 %v7021_v56, %v8121_v30 }
 0x3a4   : > { %v2807_v60 = vmul.f32 %v4263_v23, %v2806_v15  ;;  %v7113_v1 = vadd.f32 1.0, %v4265_v49  ;;  %3471 = vst [vmem:[%s6848_s20 + $0x38] sm:$0xff] %v3439_v59  ;;  %v3376_v17 = vmul.f32 %v3184_v47, %v1599_v32  ;;  %v7116_v39 = vpop.eup %4266  ;;  %v3071_v42 = vadd.f32 %v3070_v29, %v6809_v12 }
 0x3a5   : > { %3535 = vst [vmem:[%s6860_s24 + $0xa8] sm:$0xff] %v3503_v4  ;;  %4268 = vpow2.f32 %v3930_v57  ;;  %v7122_v63 = vmul.f32 0.088388346, %v1505_v21  ;;  %vm2809_vm5 = vweird.f32 %v7053_v54  ;;  %v2820_v9 = vmul.f32 %v7116_v39, %v7077_v52 }
 0x3a6   : > { %3117 = vmatmul.f32.gmra.mxu0 %v2965_v8  ;;  %3230 = vmatmul.f32.gmra.mxu1 %v2965_v8  ;;  %v2808_v25 = vadd.f32 %v4263_v23, %v2807_v60  ;;  %4270 = vrcp.f32 %v7113_v1  ;;  %3599 = vst [vmem:[%s6860_s24 + $0xb0] sm:$0xff] %v3567_v33  ;;  %vm2811_vm6 = vmor %vm2809_vm5, %vm2810_vm4  ;;  %vm2814_vm7 = vcmp.eq.f32.partialorder %v2813_v45, 8.507059e+37  ;;  %v2816_v32 = vor.u32 1.1754944e-38, %v2815_v13  ;;  %v8125_v33 = vld [vmem:[#allocation34_spill] sm:$0xff] }
 0x3a7   : > { %3343 = vmatmul.f32.gmra.mxu2 %v2965_v8  ;;  %v3296_v11 = vpop.f32.mrf.mxu2  ;;  %v2830_v36 = vand.u32 2147483648, %v7077_v52  ;;  %3663 = vst [vmem:[%s6860_s24 + $0xb8] sm:$0xff] %v3631_v51  ;;  %v3408_v50 = vadd.f32 %v3376_v17, %v3071_v42  ;;  %v2821_v6 = vsub.f32 1.0, %v2820_v9  ;;  %vm2825_vm8 = vweird.f32 %v7116_v39  ;;  %v8126_v17 = vld [vmem:[#allocation32_spill] sm:$0xff] }
 0x3a8   : > { %v2292_v2 = vpop.f32.mrf.mxu3  ;;  %v3073_v58 = vpop.f32.mrf.mxu0  ;;  %v2812_v54 = vsel %vm2811_vm6, %v4263_v23, %v2808_v25  ;;  %v3297_v10 = vadd.f32 %v3296_v11, %v6821_v14  ;;  %v2828_v21 = vand.u32 2147483647, %v7077_v52  ;;  %vm2824_vm9 = vweird.f32 %v7077_v52 }
 0x3a9   : > { %v7133_v34 = vadd.f32 %v2292_v2, %v2180_v61  ;;  %v3186_v48 = vpop.f32.mrf.mxu1  ;;  %v2817_v29 = vsel %vm2814_vm7, %v2816_v32, %v2812_v54  ;;  %v3440_v5 = vmul.f32 0.70710677, %v3408_v50  ;;  %v2822_v55 = vmul.f32 %v7116_v39, %v2821_v6  ;;  %vm7152_vm10 = vmor %vm2824_vm9, %vm2825_vm8  ;;  %v8127_v6 = vld [vmem:[#allocation54_spill] sm:$0xff] }
 0x3aa   : > { %v2934_v37 = vmul.f32 %v2817_v29, %v6994_v62  ;;  %v3504_v8 = vmul.f32 %v3297_v10, %v8122_v27  ;;  %v3568_v23 = vmul.f32 %v3297_v10, %v8090_v20  ;;  %v3632_v38 = vmul.f32 %v3297_v10, %v8092_v28  ;;  %v8128_v27 = vld [vmem:[#allocation116_spill] sm:$0xff] }
 0x3ab   : > { %v4269_v45 = vpop.eup %4268  ;;  %3472 = vst [vmem:[%s6848_s20 + $0x40] sm:$0xff] %v3440_v5  ;;  %v3931_v15 = vmul.f32 -1.442695, %v7133_v34  ;;  %v3187_v13 = vadd.f32 %v3186_v48, %v6798_v16  ;;  %v2823_v47 = vadd.f32 %v7116_v39, %v2822_v55  ;;  %v2831_v49 = vor.u32 1.1754944e-38, %v2830_v36 }
 0x3ac   : > { %v4271_v59 = vpop.eup %4270  ;;  %v2966_v62 = vmul.f32 1.6666666, %v2934_v37  ;;  %v7147_v31 = vadd.f32 1.0, %v4269_v45  ;;  %3536 = vst [vmem:[%s6860_s24 + $0xc0] sm:$0xff] %v3504_v8  ;;  %v3074_v52 = vadd.f32 %v3073_v58, %v6809_v12  ;;  %v2183_v51 = vadd.f32 %v7021_v56, %v8125_v33  ;;  %v8129_v8 = vld [vmem:[#allocation143_spill] sm:$0xff] }
 0x3ad   : > { %v2835_v28 = vmul.f32 %v4271_v59, %v7113_v1  ;;  %3600 = vst [vmem:[%s6860_s24 + $0xc8] sm:$0xff] %v3568_v23  ;;  %4272 = vpow2.f32 %v3931_v15  ;;  %v3377_v4 = vmul.f32 %v3187_v13, %v7086_v26  ;;  %v2827_v57 = vsel %vm7152_vm10, %v7116_v39, %v2823_v47  ;;  %v8130_v15 = vld [vmem:[#allocation41_spill] sm:$0xff] }
 0x3ae   : > { %vm2829_vm11 = vcmp.eq.f32.partialorder %v2828_v21, 8.507059e+37  ;;  %4274 = vrcp.f32 %v7147_v31  ;;  %3664 = vst [vmem:[%s6860_s24 + $0xd0] sm:$0xff] %v3632_v38  ;;  %3120 = vmatmul.f32.gmra.mxu0 %v2966_v62  ;;  %3233 = vmatmul.f32.gmra.mxu1 %v2966_v62  ;;  %v1121_v30 = vadd.f32 %v7098_v19, %v8126_v17  ;;  %v2845_v39 = vand.u32 2147483648, %v7113_v1 }
 0x3af   : > { %v3299_v60 = vpop.f32.mrf.mxu2  ;;  %v2832_v61 = vsel %vm2829_vm11, %v2831_v49, %v2827_v57  ;;  %v2836_v42 = vsub.f32 1.0, %v2835_v28  ;;  %v3409_v26 = vadd.f32 %v3377_v4, %v3074_v52  ;;  %3346 = vmatmul.f32.gmra.mxu2 %v2966_v62  ;;  %vm2840_vm12 = vweird.f32 %v4271_v59 }
 0x3b0   : > { %v2295_v25 = vpop.f32.mrf.mxu3  ;;  %v3076_v9 = vpop.f32.mrf.mxu0  ;;  %v2935_v11 = vmul.f32 %v2832_v61, %v7032_v41  ;;  %v3300_v32 = vadd.f32 %v3299_v60, %v6821_v14  ;;  %v2843_v19 = vand.u32 2147483647, %v7113_v1  ;;  %vm2839_vm13 = vweird.f32 %v7113_v1 }
 0x3b1   : > { %v7172_v36 = vadd.f32 %v2295_v25, %v2183_v51  ;;  %v3189_v50 = vpop.f32.mrf.mxu1  ;;  %v2837_v2 = vmul.f32 %v4271_v59, %v2836_v42  ;;  %v3441_v58 = vmul.f32 0.70710677, %v3409_v26  ;;  %v7184_v23 = vmul.f32 %v8129_v8, %v8128_v27  ;;  %vm2841_vm14 = vmor %vm2839_vm13, %vm2840_vm12 }
 0x3b2   : > { %v2967_v54 = vmul.f32 1.6666666, %v2935_v11  ;;  %v3505_v10 = vmul.f32 %v3300_v32, %v8127_v6  ;;  %v3569_v48 = vmul.f32 %v3300_v32, %v8094_v18  ;;  %v3633_v41 = vmul.f32 %v3300_v32, %v5809_v7 }
 0x3b3   : > { %v4273_v29 = vpop.eup %4272  ;;  %v2838_v21 = vadd.f32 %v4271_v59, %v2837_v2  ;;  %3473 = vst [vmem:[%s6848_s20 + $0x48] sm:$0xff] %v3441_v58  ;;  %v3932_v5 = vmul.f32 -1.442695, %v7172_v36  ;;  %v3190_v37 = vadd.f32 %v3189_v50, %v6798_v16  ;;  %v2846_v18 = vor.u32 1.1754944e-38, %v2845_v39 }
 0x3b4   : > { %v4275_v55 = vpop.eup %4274  ;;  %v7187_v7 = vadd.f32 1.0, %v4273_v29  ;;  %3537 = vst [vmem:[%s6860_s24 + $0xd8] sm:$0xff] %v3505_v10  ;;  %v7191_v45 = vadd.f32 %v7090_v0, %v1121_v30  ;;  %vm2844_vm15 = vcmp.eq.f32.partialorder %v2843_v19, 8.507059e+37  ;;  %v2186_v13 = vadd.f32 %v7021_v56, %v8130_v15 }
 0x3b5   : > { %v2842_v1 = vsel %vm2841_vm14, %v4271_v59, %v2838_v21  ;;  %v2850_v38 = vmul.f32 %v4275_v55, %v7147_v31  ;;  %3601 = vst [vmem:[%s6860_s24 + $0xe0] sm:$0xff] %v3569_v48  ;;  %4276 = vpow2.f32 %v3932_v5  ;;  %v1602_v49 = vmul.f32 0.088388346, %v7101_v3 }
 0x3b6   : > { %v2847_v62 = vsel %vm2844_vm15, %v2846_v18, %v2842_v1  ;;  %4278 = vrcp.f32 %v7187_v7  ;;  %3665 = vst [vmem:[%s6860_s24 + $0xe8] sm:$0xff] %v3633_v41  ;;  %3123 = vmatmul.f32.gmra.mxu0 %v2967_v54  ;;  %3236 = vmatmul.f32.gmra.mxu1 %v2967_v54  ;;  %v3077_v20 = vadd.f32 %v3076_v9, %v6809_v12  ;;  %v2858_v56 = vand.u32 2147483647, %v7147_v31  ;;  %v8134_v41 = vld [vmem:[#allocation35_spill] sm:$0xff] }
 0x3b7   : > { %v3302_v47 = vpop.f32.mrf.mxu2  ;;  %v2936_v0 = vmul.f32 %v2847_v62, %v7058_v22  ;;  %v2851_v59 = vsub.f32 1.0, %v2850_v38  ;;  %v3378_v28 = vmul.f32 %v3190_v37, %v7122_v63  ;;  %3349 = vmatmul.f32.gmra.mxu2 %v2967_v54  ;;  %v2860_v33 = vand.u32 2147483648, %v7147_v31  ;;  %v8131_v63 = vld [vmem:[#allocation57_spill] sm:$0xff]  ;;  %v8133_v54 = vld [vmem:[#allocation156_spill] sm:$0xff] }
 0x3b8   : > { %v2298_v52 = vpop.f32.mrf.mxu3  ;;  %v3079_v4 = vpop.f32.mrf.mxu0  ;;  %v3303_v51 = vadd.f32 %v3302_v47, %v6821_v14  ;;  %vm2854_vm0 = vweird.f32 %v7147_v31  ;;  %vm2855_vm1 = vweird.f32 %v4275_v55  ;;  %vm2859_vm3 = vcmp.eq.f32.partialorder %v2858_v56, 8.507059e+37  ;;  %v8135_v47 = vld [vmem:[#allocation61_spill] sm:$0xff]  ;;  %v8136_v56 = vld [vmem:[#allocation120_spill] sm:$0xff] }
 0x3b9   : > { %v7206_v57 = vadd.f32 %v2298_v52, %v2186_v13  ;;  %v3192_v60 = vpop.f32.mrf.mxu1  ;;  %v2852_v3 = vmul.f32 %v4275_v55, %v2851_v59  ;;  %v3410_v22 = vadd.f32 %v3378_v28, %v3077_v20  ;;  %v2968_v17 = vmul.f32 1.6666666, %v2936_v0  ;;  %vm2856_vm2 = vmor %vm2854_vm0, %vm2855_vm1 }
 0x3ba   : > { %v3506_v30 = vmul.f32 %v3303_v51, %v8131_v63  ;;  %v3570_v61 = vmul.f32 %v3303_v51, %v8098_v43  ;;  %v3634_v11 = vmul.f32 %v3303_v51, %v5853_v24  ;;  %v3193_v39 = vadd.f32 %v3192_v60, %v6798_v16  ;;  %v8132_v24 = vld [vmem:[#allocation178_spill] sm:$0xff] }
 0x3bb   : > { %v3933_v42 = vmul.f32 -1.442695, %v7206_v57  ;;  %v4277_v26 = vpop.eup %4276  ;;  %v2853_v25 = vadd.f32 %v4275_v55, %v2852_v3  ;;  %v3442_v9 = vmul.f32 0.70710677, %v3410_v22  ;;  %v2861_v32 = vor.u32 1.1754944e-38, %v2860_v33  ;;  %v8137_v33 = vld [vmem:[#allocation147_spill] sm:$0xff] }
 0x3bc   : > { %v4279_v31 = vpop.eup %4278  ;;  %v7214_v50 = vadd.f32 1.0, %v4277_v26  ;;  %3538 = vst [vmem:[%s6860_s24 + $0xf0] sm:$0xff] %v3506_v30  ;;  %v3080_v19 = vadd.f32 %v3079_v4, %v6809_v12  ;;  %v3379_v58 = vmul.f32 %v3193_v39, %v1602_v49  ;;  %v1476_v6 = vmul.f32 %v8133_v54, %v8132_v24  ;;  %v8138_v22 = vld [vmem:[#allocation72_spill] sm:$0xff]  ;;  %v8140_v30 = vld [vmem:[#allocation62_spill] sm:$0xff] }
 0x3bd   : > { %4280 = vpow2.f32 %v3933_v42  ;;  %v2857_v43 = vsel %vm2856_vm2, %v4275_v55, %v2853_v25  ;;  %v2865_v2 = vmul.f32 %v4279_v31, %v7187_v7  ;;  %3474 = vst [vmem:[%s6848_s20 + $0x50] sm:$0xff] %v3442_v9  ;;  %v1122_v29 = vadd.f32 %v7184_v23, %v8134_v41 }
 0x3be   : > { %v2862_v10 = vsel %vm2859_vm3, %v2861_v32, %v2857_v43  ;;  %4282 = vrcp.f32 %v7214_v50  ;;  %3602 = vst [vmem:[%s6860_s24 + $0xf8] sm:$0xff] %v3570_v61  ;;  %3126 = vmatmul.f32.gmra.mxu0 %v2968_v17  ;;  %3239 = vmatmul.f32.gmra.mxu1 %v2968_v17  ;;  %v3411_v37 = vadd.f32 %v3379_v58, %v3080_v19  ;;  %v2873_v8 = vand.u32 2147483647, %v7187_v7  ;;  %v8141_v61 = vld [vmem:[#allocation158_spill] sm:$0xff] }
 0x3bf   : > { %v3305_v48 = vpop.f32.mrf.mxu2  ;;  %v2937_v21 = vmul.f32 %v2862_v10, %v7105_v46  ;;  %v2866_v5 = vsub.f32 1.0, %v2865_v2  ;;  %3666 = vst [vmem:[%s6860_s24 + $0x100] sm:$0xff] %v3634_v11  ;;  %3352 = vmatmul.f32.gmra.mxu2 %v2968_v17  ;;  %v2875_v18 = vand.u32 2147483648, %v7187_v7  ;;  %v1603_v38 = vmul.f32 0.088388346, %v7191_v45  ;;  %v8139_v17 = vld [vmem:[#allocation60_spill] sm:$0xff] }
 0x3c0   : > { %v3082_v55 = vpop.f32.mrf.mxu0  ;;  %v3306_v1 = vadd.f32 %v3305_v48, %v6821_v14  ;;  %vm2870_vm4 = vweird.f32 %v4279_v31  ;;  %v3443_v23 = vmul.f32 0.70710677, %v3411_v37  ;;  %vm2869_vm5 = vweird.f32 %v7187_v7  ;;  %v8142_v48 = vld [vmem:[#allocation64_spill] sm:$0xff] }
 0x3c1   : > { %v3195_v15 = vpop.f32.mrf.mxu1  ;;  %v2969_v13 = vmul.f32 1.6666666, %v2937_v21  ;;  %v2867_v62 = vmul.f32 %v4279_v31, %v2866_v5  ;;  %v1508_v52 = vadd.f32 %v1476_v6, %v1122_v29  ;;  %v1091_v51 = vmul.f32 %v8137_v33, %v8136_v56  ;;  %vm2871_vm6 = vmor %vm2869_vm5, %vm2870_vm4 }
 0x3c2   : > { %v3507_v49 = vmul.f32 %v3306_v1, %v8135_v47  ;;  %v3571_v0 = vmul.f32 %v3306_v1, %v8100_v44  ;;  %v3635_v59 = vmul.f32 %v3306_v1, %v8110_v35  ;;  %v3196_v20 = vadd.f32 %v3195_v15, %v6798_v16  ;;  %3475 = vst [vmem:[%s6848_s20 + $0x58] sm:$0xff] %v3443_v23  ;;  %v8145_v1 = vld [vmem:[#allocation124_spill] sm:$0xff] }
 0x3c3   : > { %v4281_v46 = vpop.eup %4280  ;;  %v2868_v28 = vadd.f32 %v4279_v31, %v2867_v62  ;;  %vm2874_vm7 = vcmp.eq.f32.partialorder %v2873_v8, 8.507059e+37  ;;  %v2876_v44 = vor.u32 1.1754944e-38, %v2875_v18  ;;  %v3083_v7 = vadd.f32 %v3082_v55, %v6809_v12  ;;  %v8143_v55 = vld [vmem:[#allocation77_spill] sm:$0xff]  ;;  %v8144_v8 = vld [vmem:[#allocation63_spill] sm:$0xff]  ;;  %v8148_v47 = vld [vmem:[#allocation160_spill] sm:$0xff] }
 0x3c4   : > { %v7237_v45 = vadd.f32 1.0, %v4281_v46  ;;  %v4283_v4 = vpop.eup %4282  ;;  %3539 = vst [vmem:[%s6860_s24 + $0x108] sm:$0xff] %v3507_v49  ;;  %v3380_v35 = vmul.f32 %v3196_v20, %v1603_v38  ;;  %v769_v63 = vmul.f32 %v8139_v17, %v8138_v22  ;;  %v1477_v42 = vmul.f32 %v8141_v61, %v8140_v30  ;;  %v8146_v38 = vld [vmem:[#allocation151_spill] sm:$0xff]  ;;  %v8147_v46 = vld [vmem:[#allocation65_spill] sm:$0xff] }
 0x3c5   : > { %v2872_v60 = vsel %vm2871_vm6, %v4279_v31, %v2868_v28  ;;  %v2880_v3 = vmul.f32 %v4283_v4, %v7214_v50  ;;  %3603 = vst [vmem:[%s6860_s24 + $0x110] sm:$0xff] %v3571_v0  ;;  %v2888_v2 = vand.u32 2147483647, %v7214_v50  ;;  %v2890_v19 = vand.u32 2147483648, %v7214_v50 }
 0x3c6   : > { %4284 = vrcp.f32 %v7237_v45  ;;  %v2877_v26 = vsel %vm2874_vm7, %v2876_v44, %v2872_v60  ;;  %3667 = vst [vmem:[%s6860_s24 + $0x118] sm:$0xff] %v3635_v59  ;;  %3129 = vmatmul.f32.gmra.mxu0 %v2969_v13  ;;  %3242 = vmatmul.f32.gmra.mxu1 %v2969_v13  ;;  %v3412_v39 = vadd.f32 %v3380_v35, %v3083_v7  ;;  %v1604_v58 = vmul.f32 0.088388346, %v1508_v52 }
 0x3c7   : > { %v3308_v25 = vpop.f32.mrf.mxu2  ;;  %v2938_v9 = vmul.f32 %v2877_v26, %v7133_v34  ;;  %v2881_v11 = vsub.f32 1.0, %v2880_v3  ;;  %3355 = vmatmul.f32.gmra.mxu2 %v2969_v13  ;;  %v1123_v43 = vadd.f32 %v1091_v51, %v769_v63  ;;  %vm2885_vm8 = vweird.f32 %v4283_v4  ;;  %v8149_v63 = vld [vmem:[#allocation68_spill] sm:$0xff] }
 0x3c8   : > { %v3309_v31 = vadd.f32 %v3308_v25, %v6821_v14  ;;  %v3085_v32 = vpop.f32.mrf.mxu0  ;;  %v3444_v10 = vmul.f32 0.70710677, %v3412_v39  ;;  %v770_v18 = vmul.f32 %v8144_v8, %v8143_v55  ;;  %v1092_v15 = vmul.f32 %v8146_v38, %v8145_v1  ;;  %v8150_v39 = vld [vmem:[#allocation128_spill] sm:$0xff] }
 0x3c9   : > { %v3198_v54 = vpop.f32.mrf.mxu1  ;;  %v2882_v6 = vmul.f32 %v4283_v4, %v2881_v11  ;;  %v2970_v41 = vmul.f32 1.6666666, %v2938_v9  ;;  %vm2884_vm9 = vweird.f32 %v7214_v50  ;;  %v2891_v62 = vor.u32 1.1754944e-38, %v2890_v19 }
 0x3ca   : > { %v3508_v34 = vmul.f32 %v3309_v31, %v8142_v48  ;;  %v3572_v29 = vmul.f32 %v3309_v31, %v8118_v40  ;;  %v3636_v21 = vmul.f32 %v3309_v31, %v8115_v53  ;;  %v3199_v5 = vadd.f32 %v3198_v54, %v6798_v16  ;;  %3476 = vst [vmem:[%s6848_s20 + $0x60] sm:$0xff] %v3444_v10  ;;  %vm2886_vm10 = vmor %vm2884_vm9, %vm2885_vm8  ;;  %v8151_v31 = vld [vmem:[#allocation153_spill] sm:$0xff] }
 0x3cb   : > { %v2883_v13 = vadd.f32 %v4283_v4, %v2882_v6  ;;  %v3086_v53 = vadd.f32 %v3085_v32, %v6809_v12  ;;  %v1478_v49 = vmul.f32 %v8148_v47, %v8147_v46  ;;  %vm2889_vm11 = vcmp.eq.f32.partialorder %v2888_v2, 8.507059e+37  ;;  %v8152_v54 = vld [vmem:[#allocation81_spill] sm:$0xff] }
 0x3cc   : > { %v4285_v37 = vpop.eup %4284  ;;  %3540 = vst [vmem:[%s6860_s24 + $0x120] sm:$0xff] %v3508_v34  ;;  %v3381_v23 = vmul.f32 %v3199_v5, %v1604_v58  ;;  %v1509_v59 = vadd.f32 %v1477_v42, %v1123_v43  ;;  %v1124_v33 = vadd.f32 %v1092_v15, %v770_v18  ;;  %v2905_v44 = vand.u32 2147483648, %v7237_v45  ;;  %v8154_v5 = vld [vmem:[#allocation184_spill] sm:$0xff] }
 0x3cd   : > { %v2895_v40 = vmul.f32 %v4285_v37, %v7237_v45  ;;  %v2887_v0 = vsel %vm2886_vm10, %v4283_v4, %v2883_v13  ;;  %3604 = vst [vmem:[%s6860_s24 + $0x128] sm:$0xff] %v3572_v29  ;;  %vm2900_vm12 = vweird.f32 %v4285_v37  ;;  %v2903_v3 = vand.u32 2147483647, %v7237_v45 }
 0x3ce   : > { %v2892_v20 = vsel %vm2889_vm11, %v2891_v62, %v2887_v0  ;;  %3668 = vst [vmem:[%s6860_s24 + $0x130] sm:$0xff] %v3636_v21  ;;  %v3413_v50 = vadd.f32 %v3381_v23, %v3086_v53  ;;  %3132 = vmatmul.f32.gmra.mxu0 %v2970_v41  ;;  %3245 = vmatmul.f32.gmra.mxu1 %v2970_v41  ;;  %v1605_v26 = vmul.f32 0.088388346, %v1509_v59  ;;  %vm2899_vm13 = vweird.f32 %v7237_v45  ;;  %v8153_v45 = vld [vmem:[#allocation66_spill] sm:$0xff]  ;;  %v8157_v0 = vld [vmem:[#allocation155_spill] sm:$0xff] }
 0x3cf   : > { %v2896_v28 = vsub.f32 1.0, %v2895_v40  ;;  %v3311_v52 = vpop.f32.mrf.mxu2  ;;  %v2939_v51 = vmul.f32 %v2892_v20, %v7172_v36  ;;  %3358 = vmatmul.f32.gmra.mxu2 %v2970_v41  ;;  %v1093_v32 = vmul.f32 %v8151_v31, %v8150_v39  ;;  %vm2901_vm14 = vmor %vm2899_vm13, %vm2900_vm12  ;;  %v2906_v43 = vor.u32 1.1754944e-38, %v2905_v44 }
 0x3d0   : > { %v3312_v35 = vadd.f32 %v3311_v52, %v6821_v14  ;;  %v3088_v4 = vpop.f32.mrf.mxu0  ;;  %v3445_v7 = vmul.f32 0.70710677, %v3413_v50  ;;  %v1510_v2 = vadd.f32 %v1478_v49, %v1124_v33  ;;  %vm2904_vm15 = vcmp.eq.f32.partialorder %v2903_v3, 8.507059e+37  ;;  %v8156_v49 = vld [vmem:[#allocation131_spill] sm:$0xff] }
 0x3d1   : > { %v2897_v60 = vmul.f32 %v4285_v37, %v2896_v28  ;;  %v3201_v17 = vpop.f32.mrf.mxu1  ;;  %v2971_v25 = vmul.f32 1.6666666, %v2939_v51  ;;  %v771_v6 = vmul.f32 %v8153_v45, %v8152_v54  ;;  %v1094_v59 = vmul.f32 %v8157_v0, %v8156_v49  ;;  %v8158_v28 = vld [vmem:[#allocation86_spill] sm:$0xff]  ;;  %v8167_v45 = vld [vmem:[#allocation168_spill] sm:$0xff] }
 0x3d2   : > { %v3509_v61 = vmul.f32 %v3312_v35, %v8149_v63  ;;  %v3573_v42 = vmul.f32 %v3312_v35, %v8128_v27  ;;  %v3637_v36 = vmul.f32 %v3312_v35, %v8132_v24  ;;  %3477 = vst [vmem:[%s6848_s20 + $0x68] sm:$0xff] %v3445_v7  ;;  %v3202_v11 = vadd.f32 %v3201_v17, %v6798_v16  ;;  %v8160_v35 = vld [vmem:[#allocation186_spill] sm:$0xff] }
 0x3d3   : > { %v2898_v9 = vadd.f32 %v4285_v37, %v2897_v60  ;;  %v3089_v27 = vadd.f32 %v3088_v4, %v6809_v12  ;;  %v1125_v21 = vadd.f32 %v1093_v32, %v771_v6  ;;  %v1606_v38 = vmul.f32 0.088388346, %v1510_v2  ;;  %v8161_v4 = vld [vmem:[#allocation166_spill] sm:$0xff] }
 0x3d4   : > { %3541 = vst [vmem:[%s6860_s24 + $0x138] sm:$0xff] %v3509_v61  ;;  %v3382_v24 = vmul.f32 %v3202_v11, %v1605_v26  ;;  %v1480_v60 = vmul.f32 %v8161_v4, %v8160_v35  ;;  %v8172_v0 = vld [vmem:[#allocation190_spill] sm:$0xff] }
 0x3d5   : > { %v2902_v19 = vsel %vm2901_vm14, %v4285_v37, %v2898_v9  ;;  %3605 = vst [vmem:[%s6860_s24 + $0x140] sm:$0xff] %v3573_v42  ;;  %v8155_v37 = vld [vmem:[#allocation163_spill] sm:$0xff]  ;;  %v8163_v9 = vld [vmem:[#allocation157_spill] sm:$0xff]  ;;  %v8174_v4 = vld [vmem:[#allocation142_spill] sm:$0xff] }
 0x3d6   : > { %v2907_v58 = vsel %vm2904_vm15, %v2906_v43, %v2902_v19  ;;  %3669 = vst [vmem:[%s6860_s24 + $0x148] sm:$0xff] %v3637_v36  ;;  %v3414_v48 = vadd.f32 %v3382_v24, %v3089_v27  ;;  %3135 = vmatmul.f32.gmra.mxu0 %v2971_v25  ;;  %3248 = vmatmul.f32.gmra.mxu1 %v2971_v25  ;;  %v8165_v43 = vld [vmem:[#allocation73_spill] sm:$0xff] }
 0x3d7   : > { %v2940_v10 = vmul.f32 %v2907_v58, %v7206_v57  ;;  %v3314_v34 = vpop.f32.mrf.mxu2  ;;  %3361 = vmatmul.f32.gmra.mxu2 %v2971_v25  ;;  %v1479_v8 = vmul.f32 %v8155_v37, %v8154_v5  ;;  %v8162_v25 = vld [vmem:[#allocation134_spill] sm:$0xff]  ;;  %v8166_v58 = vld [vmem:[#allocation188_spill] sm:$0xff] }
 0x3d8   : > { %v3315_v41 = vadd.f32 %v3314_v34, %v6821_v14  ;;  %v3091_v29 = vpop.f32.mrf.mxu0  ;;  %v3446_v18 = vmul.f32 0.70710677, %v3414_v48  ;;  %v1095_v11 = vmul.f32 %v8163_v9, %v8162_v25  ;;  %v1481_v6 = vmul.f32 %v8167_v45, %v8166_v58  ;;  %v8178_v9 = vld [vmem:[#allocation192_spill] sm:$0xff] }
 0x3d9   : > { %v3204_v15 = vpop.f32.mrf.mxu1  ;;  %v2972_v53 = vmul.f32 1.6666666, %v2940_v10  ;;  %v3092_v23 = vadd.f32 %v3091_v29, %v6809_v12  ;;  %v1511_v20 = vadd.f32 %v1479_v8, %v1125_v21 }
 0x3da   : > { %v3510_v57 = vmul.f32 %v3315_v41, %v8138_v22  ;;  %v3574_v13 = vmul.f32 %v3315_v41, %v8136_v56  ;;  %v3638_v62 = vmul.f32 %v3315_v41, %v8140_v30  ;;  %v3205_v40 = vadd.f32 %v3204_v15, %v6798_v16  ;;  %3478 = vst [vmem:[%s6848_s20 + $0x70] sm:$0xff] %v3446_v18  ;;  %v8159_v56 = vld [vmem:[#allocation69_spill] sm:$0xff]  ;;  %v8168_v18 = vld [vmem:[#allocation138_spill] sm:$0xff] }
 0x3db   : > { %v772_v50 = vmul.f32 %v8159_v56, %v8158_v28  ;;  %v1607_v3 = vmul.f32 0.088388346, %v1511_v20 }
 0x3dc   : > { %3542 = vst [vmem:[%s6860_s24 + $0x150] sm:$0xff] %v3510_v57  ;;  %v3383_v47 = vmul.f32 %v3205_v40, %v1606_v38  ;;  %v8169_v38 = vld [vmem:[#allocation159_spill] sm:$0xff] }
 0x3dd   : > { %3606 = vst [vmem:[%s6860_s24 + $0x158] sm:$0xff] %v3574_v13  ;;  %v1126_v44 = vadd.f32 %v1094_v59, %v772_v50  ;;  %v1096_v15 = vmul.f32 %v8169_v38, %v8168_v18  ;;  %v8173_v59 = vld [vmem:[#allocation170_spill] sm:$0xff] }
 0x3de   : > { %3670 = vst [vmem:[%s6860_s24 + $0x160] sm:$0xff] %v3638_v62  ;;  %v3415_v22 = vadd.f32 %v3383_v47, %v3092_v23  ;;  %3138 = vmatmul.f32.gmra.mxu0 %v2972_v53  ;;  %3251 = vmatmul.f32.gmra.mxu1 %v2972_v53  ;;  %v8171_v62 = vld [vmem:[#allocation78_spill] sm:$0xff]  ;;  %v1482_v20 = vmul.f32 %v8173_v59, %v8172_v0 }
 0x3df   : > { %v3317_v30 = vpop.f32.mrf.mxu2  ;;  %3364 = vmatmul.f32.gmra.mxu2 %v2972_v53  ;;  %v1512_v31 = vadd.f32 %v1480_v60, %v1126_v44  ;;  %v8175_v60 = vld [vmem:[#allocation161_spill] sm:$0xff] }
 0x3e0   : > { %v3447_v52 = vmul.f32 0.70710677, %v3415_v22  ;;  %v3318_v33 = vadd.f32 %v3317_v30, %v6821_v14  ;;  %v3094_v51 = vpop.f32.mrf.mxu0 }
 0x3e1   : > { %v3207_v7 = vpop.f32.mrf.mxu1  ;;  %v3095_v36 = vadd.f32 %v3094_v51, %v6809_v12  ;;  %v1608_v10 = vmul.f32 0.088388346, %v1512_v31 }
 0x3e2   : > { %3479 = vst [vmem:[%s6848_s20 + $0x78] sm:$0xff] %v3447_v52  ;;  %v3511_v17 = vmul.f32 %v3318_v33, %v8143_v55  ;;  %v3575_v63 = vmul.f32 %v3318_v33, %v8145_v1  ;;  %v3639_v61 = vmul.f32 %v3318_v33, %v8147_v46  ;;  %v3208_v42 = vadd.f32 %v3207_v7, %v6798_v16  ;;  %v8164_v55 = vld [vmem:[#allocation90_spill] sm:$0xff] }
 0x3e3   : > { %v773_v1 = vmul.f32 %v8165_v43, %v8164_v55 }
 0x3e4   : > { %3543 = vst [vmem:[%s6860_s24 + $0x168] sm:$0xff] %v3511_v17  ;;  %v3384_v26 = vmul.f32 %v3208_v42, %v1607_v3  ;;  %v1097_v3 = vmul.f32 %v8175_v60, %v8174_v4 }
 0x3e5   : > { %3607 = vst [vmem:[%s6860_s24 + $0x170] sm:$0xff] %v3575_v63  ;;  %v1127_v24 = vadd.f32 %v1095_v11, %v773_v1  ;;  %v8177_v63 = vld [vmem:[#allocation83_spill] sm:$0xff]  ;;  %v8179_v11 = vld [vmem:[#allocation173_spill] sm:$0xff] }
 0x3e6   : > { %3671 = vst [vmem:[%s6860_s24 + $0x178] sm:$0xff] %v3639_v61  ;;  %v3416_v32 = vadd.f32 %v3384_v26, %v3095_v36  ;;  %v1483_v31 = vmul.f32 %v8179_v11, %v8178_v9  ;;  %v8192_v11 = vld [vmem:[#allocation152_spill] sm:$0xff] }
 0x3e7   : > { %v3320_v2 = vpop.f32.mrf.mxu2  ;;  %v1513_v57 = vadd.f32 %v1481_v6, %v1127_v24 }
 0x3e8   : > { %v3448_v46 = vmul.f32 0.70710677, %v3416_v32  ;;  %v3321_v19 = vadd.f32 %v3320_v2, %v6821_v14  ;;  %v3097_v27 = vpop.f32.mrf.mxu0 }
 0x3e9   : > { %v3210_v48 = vpop.f32.mrf.mxu1  ;;  %v3098_v37 = vadd.f32 %v3097_v27, %v6809_v12  ;;  %v1609_v22 = vmul.f32 0.088388346, %v1513_v57 }
 0x3ea   : > { %3480 = vst [vmem:[%s6848_s20 + $0x80] sm:$0xff] %v3448_v46  ;;  %v3512_v34 = vmul.f32 %v3321_v19, %v8152_v54  ;;  %v3576_v41 = vmul.f32 %v3321_v19, %v8150_v39  ;;  %v3640_v29 = vmul.f32 %v3321_v19, %v8154_v5  ;;  %v3211_v21 = vadd.f32 %v3210_v48, %v6798_v16  ;;  %v8170_v54 = vld [vmem:[#allocation94_spill] sm:$0xff] }
 0x3eb   : > { %v774_v39 = vmul.f32 %v8171_v62, %v8170_v54  ;;  %v8181_v48 = vld [vmem:[#allocation162_spill] sm:$0xff] }
 0x3ec   : > { %3544 = vst [vmem:[%s6860_s24 + $0x180] sm:$0xff] %v3512_v34  ;;  %v3385_v8 = vmul.f32 %v3211_v21, %v1608_v10  ;;  %v8180_v10 = vld [vmem:[#allocation146_spill] sm:$0xff]  ;;  %v8183_v21 = vld [vmem:[#allocation87_spill] sm:$0xff] }
 0x3ed   : > { %3608 = vst [vmem:[%s6860_s24 + $0x188] sm:$0xff] %v3576_v41  ;;  %v1128_v47 = vadd.f32 %v1096_v15, %v774_v39  ;;  %v1098_v34 = vmul.f32 %v8181_v48, %v8180_v10 }
 0x3ee   : > { %3672 = vst [vmem:[%s6860_s24 + $0x190] sm:$0xff] %v3640_v29  ;;  %v3417_v13 = vadd.f32 %v3385_v8, %v3098_v37  ;;  %v8182_v29 = vld [vmem:[#allocation104_spill] sm:$0xff] }
 0x3ef   : > { %v3323_v40 = vpop.f32.mrf.mxu2  ;;  %v1514_v7 = vadd.f32 %v1482_v20, %v1128_v47  ;;  %v776_v37 = vmul.f32 %v8183_v21, %v8182_v29  ;;  %v8186_v20 = vld [vmem:[#allocation150_spill] sm:$0xff] }
 0x3f0   : > { %v3449_v5 = vmul.f32 0.70710677, %v3417_v13  ;;  %v3324_v53 = vadd.f32 %v3323_v40, %v6821_v14  ;;  %v3100_v23 = vpop.f32.mrf.mxu0  ;;  %v8184_v40 = vld [vmem:[#allocation194_spill] sm:$0xff] }
 0x3f1   : > { %v3213_v56 = vpop.f32.mrf.mxu1  ;;  %v3101_v51 = vadd.f32 %v3100_v23, %v6809_v12  ;;  %v1610_v32 = vmul.f32 0.088388346, %v1514_v7  ;;  %v1130_v39 = vadd.f32 %v1098_v34, %v776_v37 }
 0x3f2   : > { %3481 = vst [vmem:[%s6848_s20 + $0x88] sm:$0xff] %v3449_v5  ;;  %v3513_v50 = vmul.f32 %v3324_v53, %v8158_v28  ;;  %v3577_v30 = vmul.f32 %v3324_v53, %v8156_v49  ;;  %v3641_v52 = vmul.f32 %v3324_v53, %v8160_v35  ;;  %v3214_v33 = vadd.f32 %v3213_v56, %v6798_v16  ;;  %v8176_v28 = vld [vmem:[#allocation99_spill] sm:$0xff]  ;;  %v8185_v5 = vld [vmem:[#allocation176_spill] sm:$0xff] }
 0x3f3   : > { %v775_v49 = vmul.f32 %v8177_v63, %v8176_v28  ;;  %v1484_v53 = vmul.f32 %v8185_v5, %v8184_v40  ;;  %v8190_v63 = vld [vmem:[#allocation196_spill] sm:$0xff] }
 0x3f4   : > { %3545 = vst [vmem:[%s6860_s24 + $0x198] sm:$0xff] %v3513_v50  ;;  %v3386_v44 = vmul.f32 %v3214_v33, %v1609_v22 }
 0x3f5   : > { %3609 = vst [vmem:[%s6860_s24 + $0x1a0] sm:$0xff] %v3577_v30  ;;  %v1129_v26 = vadd.f32 %v1097_v3, %v775_v49  ;;  %v8188_v30 = vld [vmem:[#allocation108_spill] sm:$0xff]  ;;  %v8191_v49 = vld [vmem:[#allocation179_spill] sm:$0xff] }
 0x3f6   : > { %3673 = vst [vmem:[%s6860_s24 + $0x1a8] sm:$0xff] %v3641_v52  ;;  %v3418_v17 = vadd.f32 %v3386_v44, %v3101_v51  ;;  %v8189_v52 = vld [vmem:[#allocation91_spill] sm:$0xff] }
 0x3f7   : > { %v3326_v61 = vpop.f32.mrf.mxu2  ;;  %v1515_v45 = vadd.f32 %v1483_v31, %v1129_v26  ;;  %v777_v33 = vmul.f32 %v8189_v52, %v8188_v30 }
 0x3f8   : > { %v3450_v35 = vmul.f32 0.70710677, %v3418_v17  ;;  %v3327_v42 = vadd.f32 %v3326_v61, %v6821_v14  ;;  %v3103_v36 = vpop.f32.mrf.mxu0  ;;  %v1485_v61 = vmul.f32 %v8191_v49, %v8190_v63  ;;  %v8202_v49 = vld [vmem:[#allocation185_spill] sm:$0xff] }
 0x3f9   : > { %v3216_v43 = vpop.f32.mrf.mxu1  ;;  %v3104_v27 = vadd.f32 %v3103_v36, %v6809_v12  ;;  %v1611_v8 = vmul.f32 0.088388346, %v1515_v45 }
 0x3fa   : > { %3482 = vst [vmem:[%s6848_s20 + $0x90] sm:$0xff] %v3450_v35  ;;  %v3514_v1 = vmul.f32 %v3327_v42, %v8164_v55  ;;  %v3578_v2 = vmul.f32 %v3327_v42, %v8162_v25  ;;  %v3642_v46 = vmul.f32 %v3327_v42, %v8166_v58  ;;  %v3217_v19 = vadd.f32 %v3216_v43, %v6798_v16 }
 0x3fc   : > { %3546 = vst [vmem:[%s6860_s24 + $0x1b0] sm:$0xff] %v3514_v1  ;;  %v3387_v24 = vmul.f32 %v3217_v19, %v1610_v32  ;;  %v8194_v19 = vld [vmem:[#allocation112_spill] sm:$0xff] }
 0x3fd   : > { %3610 = vst [vmem:[%s6860_s24 + $0x1b8] sm:$0xff] %v3578_v2 }
 0x3fe   : > { %3674 = vst [vmem:[%s6860_s24 + $0x1c0] sm:$0xff] %v3642_v46  ;;  %v3419_v6 = vadd.f32 %v3387_v24, %v3104_v27  ;;  %v8195_v27 = vld [vmem:[#allocation96_spill] sm:$0xff] }
 0x3ff   : > { %v3329_v55 = vpop.f32.mrf.mxu2  ;;  %v778_v24 = vmul.f32 %v8195_v27, %v8194_v19  ;;  %v8207_v27 = vld [vmem:[#allocation67_spill] sm:$0xff] }
 0x400   : > { %v3451_v41 = vmul.f32 0.70710677, %v3419_v6  ;;  %v3330_v25 = vadd.f32 %v3329_v55, %v6821_v14  ;;  %v3106_v58 = vpop.f32.mrf.mxu0 }
 0x401   : > { %v3219_v38 = vpop.f32.mrf.mxu1  ;;  %v3107_v23 = vadd.f32 %v3106_v58, %v6809_v12  ;;  %v8197_v58 = vld [vmem:[#allocation180_spill] sm:$0xff] }
 0x402   : > { %3483 = vst [vmem:[%s6848_s20 + $0x98] sm:$0xff] %v3451_v41  ;;  %v3515_v15 = vmul.f32 %v3330_v25, %v8170_v54  ;;  %v3579_v57 = vmul.f32 %v3330_v25, %v8168_v18  ;;  %v3643_v13 = vmul.f32 %v3330_v25, %v8172_v0  ;;  %v3220_v62 = vadd.f32 %v3219_v38, %v6798_v16  ;;  %v8187_v54 = vld [vmem:[#allocation164_spill] sm:$0xff]  ;;  %v8196_v25 = vld [vmem:[#allocation198_spill] sm:$0xff] }
 0x403   : > { %v1099_v22 = vmul.f32 %v8187_v54, %v8186_v20  ;;  %v1516_v0 = vadd.f32 %v1484_v53, %v1130_v39  ;;  %v1486_v21 = vmul.f32 %v8197_v58, %v8196_v25  ;;  %v8198_v39 = vld [vmem:[#allocation199_spill] sm:$0xff] }
 0x404   : > { %3547 = vst [vmem:[%s6860_s24 + $0x1c8] sm:$0xff] %v3515_v15  ;;  %v3388_v47 = vmul.f32 %v3220_v62, %v1611_v8 }
 0x405   : > { %3611 = vst [vmem:[%s6860_s24 + $0x1d0] sm:$0xff] %v3579_v57  ;;  %v1131_v17 = vadd.f32 %v1099_v22, %v777_v33  ;;  %v1612_v35 = vmul.f32 0.088388346, %v1516_v0  ;;  %v8200_v0 = vld [vmem:[#allocation169_spill] sm:$0xff] }
 0x406   : > { %3675 = vst [vmem:[%s6860_s24 + $0x1d8] sm:$0xff] %v3643_v13  ;;  %v3420_v59 = vadd.f32 %v3388_v47, %v3107_v23 }
 0x407   : > { %v3332_v18 = vpop.f32.mrf.mxu2 }
 0x408   : > { %v3452_v56 = vmul.f32 0.70710677, %v3420_v59  ;;  %v3333_v50 = vadd.f32 %v3332_v18, %v6821_v14 }
 0x40a   : > { %3484 = vst [vmem:[%s6848_s20 + $0xa0] sm:$0xff] %v3452_v56  ;;  %v3516_v51 = vmul.f32 %v3333_v50, %v8176_v28  ;;  %v3580_v44 = vmul.f32 %v3333_v50, %v8174_v4  ;;  %v3644_v60 = vmul.f32 %v3333_v50, %v8178_v9  ;;  %v3109_v3 = vpop.f32.mrf.mxu0  ;;  %v3222_v7 = vpop.f32.mrf.mxu1  ;;  %v1517_v4 = vadd.f32 %v1485_v61, %v1131_v17  ;;  %v8193_v9 = vld [vmem:[#allocation167_spill] sm:$0xff] }
 0x40b   : > { %v3223_v42 = vadd.f32 %v3222_v7, %v6798_v16  ;;  %v3110_v36 = vadd.f32 %v3109_v3, %v6809_v12  ;;  %v1100_v31 = vmul.f32 %v8193_v9, %v8192_v11 }
 0x40c   : > { %3548 = vst [vmem:[%s6860_s24 + $0x1e0] sm:$0xff] %v3516_v51  ;;  %v1613_v45 = vmul.f32 0.088388346, %v1517_v4  ;;  %v8203_v4 = vld [vmem:[#allocation171_spill] sm:$0xff] }
 0x40d   : > { %3612 = vst [vmem:[%s6860_s24 + $0x1e8] sm:$0xff] %v3580_v44  ;;  %v3389_v26 = vmul.f32 %v3223_v42, %v1612_v35  ;;  %v1132_v41 = vadd.f32 %v1100_v31, %v778_v24 }
 0x40e   : > { %3676 = vst [vmem:[%s6860_s24 + $0x1f0] sm:$0xff] %v3644_v60 }
 0x40f   : > { %v3421_v28 = vadd.f32 %v3389_v26, %v3110_v36 }
 0x411   : > { %v3453_v32 = vmul.f32 0.70710677, %v3421_v28  ;;  %v3335_v43 = vpop.f32.mrf.mxu2 }
 0x412   : > { %v3336_v1 = vadd.f32 %v3335_v43, %v6821_v14  ;;  %v3112_v2 = vpop.f32.mrf.mxu0  ;;  %v3225_v46 = vpop.f32.mrf.mxu1  ;;  %v8204_v43 = vld [vmem:[#allocation201_spill] sm:$0xff] }
 0x413   : > { %3485 = vst [vmem:[%s6848_s20 + $0xa8] sm:$0xff] %v3453_v32  ;;  %v3226_v6 = vadd.f32 %v3225_v46, %v6798_v16  ;;  %v3113_v37 = vadd.f32 %v3112_v2, %v6809_v12  ;;  %v8206_v46 = vld [vmem:[#allocation27_spill] sm:$0xff] }
 0x414   : > { %v3517_v48 = vmul.f32 %v3336_v1, %v8182_v29  ;;  %v3581_v34 = vmul.f32 %v3336_v1, %v8180_v10  ;;  %v3645_v55 = vmul.f32 %v3336_v1, %v8184_v40  ;;  %v1518_v29 = vadd.f32 %v1486_v21, %v1132_v41  ;;  %v8199_v40 = vld [vmem:[#allocation182_spill] sm:$0xff]  ;;  %v8205_v1 = vld [vmem:[#allocation187_spill] sm:$0xff] }
 0x415   : > { %v3390_v8 = vmul.f32 %v3226_v6, %v1613_v45  ;;  %v1487_v5 = vmul.f32 %v8199_v40, %v8198_v39  ;;  %v1489_v2 = vmul.f32 %v8205_v1, %v8204_v43  ;;  %v8208_v41 = vld [vmem:[#allocation174_spill] sm:$0xff] }
 0x416   : > { %3549 = vst [vmem:[%s6860_s24 + $0x1f8] sm:$0xff] %v3517_v48  ;;  %v1614_v59 = vmul.f32 0.088388346, %v1518_v29  ;;  %v8210_v29 = vld [vmem:[#allocation189_spill] sm:$0xff] }
 0x417   : > { %3613 = vst [vmem:[%s6860_s24 + $0x200] sm:$0xff] %v3581_v34  ;;  %v3422_v38 = vadd.f32 %v3390_v8, %v3113_v37  ;;  %v1519_v56 = vadd.f32 %v1487_v5, %v8200_v0  ;;  %v8212_v5 = vld [vmem:[#allocation71_spill] sm:$0xff] }
 0x418   : > { %3677 = vst [vmem:[%s6860_s24 + $0x208] sm:$0xff] %v3645_v55 }
 0x419   : > { %v3454_v15 = vmul.f32 0.70710677, %v3422_v38  ;;  %v3338_v57 = vpop.f32.mrf.mxu2  ;;  %v1615_v44 = vmul.f32 0.088388346, %v1519_v56 }
 0x41a   : > { %v3339_v10 = vadd.f32 %v3338_v57, %v6821_v14  ;;  %v8209_v57 = vld [vmem:[#allocation203_spill] sm:$0xff] }
 0x41b   : > { %3486 = vst [vmem:[%s6848_s20 + $0xb0] sm:$0xff] %v3454_v15  ;;  %v3115_v13 = vpop.f32.mrf.mxu0  ;;  %v3228_v62 = vpop.f32.mrf.mxu1 }
 0x41c   : > { %v3518_v53 = vmul.f32 %v3339_v10, %v8188_v30  ;;  %v3582_v23 = vmul.f32 %v3339_v10, %v8186_v20  ;;  %v3646_v47 = vmul.f32 %v3339_v10, %v8190_v63  ;;  %v3229_v54 = vadd.f32 %v3228_v62, %v6798_v16  ;;  %v8201_v63 = vld [vmem:[#allocation200_spill] sm:$0xff] }
 0x41d   : > { %v3116_v22 = vadd.f32 %v3115_v13, %v6809_v12  ;;  %v1488_v61 = vmul.f32 %v8202_v49, %v8201_v63  ;;  %v1490_v10 = vmul.f32 %v8210_v29, %v8209_v57 }
 0x41e   : > { %3550 = vst [vmem:[%s6860_s24 + $0x210] sm:$0xff] %v3518_v53  ;;  %v3391_v18 = vmul.f32 %v3229_v54, %v1614_v59 }
 0x41f   : > { %3614 = vst [vmem:[%s6860_s24 + $0x218] sm:$0xff] %v3582_v23  ;;  %v1520_v9 = vadd.f32 %v1488_v61, %v8203_v4 }
 0x420   : > { %3678 = vst [vmem:[%s6860_s24 + $0x220] sm:$0xff] %v3646_v47  ;;  %v3423_v50 = vadd.f32 %v3391_v18, %v3116_v22  ;;  %v8213_v22 = vld [vmem:[#allocation177_spill] sm:$0xff] }
 0x421   : > { %v1616_v6 = vmul.f32 0.088388346, %v1520_v9  ;;  %v1522_v18 = vadd.f32 %v1490_v10, %v8213_v22 }
 0x422   : > { %v3341_v30 = vpop.f32.mrf.mxu2  ;;  %v3455_v52 = vmul.f32 0.70710677, %v3423_v50 }
 0x423   : > { %v3342_v20 = vadd.f32 %v3341_v30, %v6821_v14  ;;  %v3118_v33 = vpop.f32.mrf.mxu0  ;;  %v3231_v51 = vpop.f32.mrf.mxu1 }
 0x424   : > { %v3232_v60 = vadd.f32 %v3231_v51, %v6798_v16  ;;  %3487 = vst [vmem:[%s6848_s20 + $0xb8] sm:$0xff] %v3455_v52  ;;  %v3119_v35 = vadd.f32 %v3118_v33, %v6809_v12  ;;  %v8215_v33 = vld [vmem:[#allocation191_spill] sm:$0xff] }
 0x425   : > { %v3519_v3 = vmul.f32 %v3342_v20, %v8194_v19  ;;  %v3583_v7 = vmul.f32 %v3342_v20, %v8192_v11  ;;  %v3647_v17 = vmul.f32 %v3342_v20, %v8196_v25  ;;  %v1521_v25 = vadd.f32 %v1489_v2, %v8208_v41  ;;  %v8214_v20 = vld [vmem:[#allocation205_spill] sm:$0xff]  ;;  %v8223_v41 = vld [vmem:[#allocation59_spill] sm:$0xff] }
 0x426   : > { %v3392_v42 = vmul.f32 %v3232_v60, %v1615_v44  ;;  %v1491_v51 = vmul.f32 %v8215_v33, %v8214_v20  ;;  %v1618_v44 = vmul.f32 0.088388346, %v1522_v18 }
 0x427   : > { %3551 = vst [vmem:[%s6860_s24 + $0x228] sm:$0xff] %v3519_v3  ;;  %v1617_v13 = vmul.f32 0.088388346, %v1521_v25  ;;  %v8216_v3 = vld [vmem:[#allocation33_spill] sm:$0xff] }
 0x428   : > { %3615 = vst [vmem:[%s6860_s24 + $0x230] sm:$0xff] %v3583_v7  ;;  %v3424_v36 = vadd.f32 %v3392_v42, %v3119_v35 }
 0x429   : > { %3679 = vst [vmem:[%s6860_s24 + $0x238] sm:$0xff] %v3647_v17  ;;  %v8217_v17 = vld [vmem:[#allocation75_spill] sm:$0xff] }
 0x42a   : > { %v3456_v26 = vmul.f32 0.70710677, %v3424_v36  ;;  %v3344_v28 = vpop.f32.mrf.mxu2  ;;  %v8218_v36 = vld [vmem:[#allocation56_spill] sm:$0xff] }
 0x42b   : > { %v3345_v11 = vadd.f32 %v3344_v28, %v6821_v14  ;;  %v3121_v31 = vpop.f32.mrf.mxu0  ;;  %v3234_v32 = vpop.f32.mrf.mxu1 }
 0x42c   : > { %3488 = vst [vmem:[%s6848_s20 + $0xc0] sm:$0xff] %v3456_v26  ;;  %v3235_v48 = vadd.f32 %v3234_v32, %v6798_v16  ;;  %v3122_v34 = vadd.f32 %v3121_v31, %v6809_v12  ;;  %v1523_v26 = vadd.f32 %v1491_v51, %v8218_v36  ;;  %v8219_v32 = vld [vmem:[#allocation207_spill] sm:$0xff] }
 0x42d   : > { %v3520_v19 = vmul.f32 %v3345_v11, %v8206_v46  ;;  %v3584_v24 = vmul.f32 %v3345_v11, %v8207_v27  ;;  %v3648_v45 = vmul.f32 %v3345_v11, %v8198_v39  ;;  %v8211_v39 = vld [vmem:[#allocation30_spill] sm:$0xff] }
 0x42e   : > { %v3393_v55 = vmul.f32 %v3235_v48, %v1616_v6  ;;  %v1619_v2 = vmul.f32 0.088388346, %v1523_v26 }
 0x42f   : > { %3552 = vst [vmem:[%s6860_s24 + $0x240] sm:$0xff] %v3520_v19  ;;  %v8221_v19 = vld [vmem:[#allocation36_spill] sm:$0xff] }
 0x430   : > { %3616 = vst [vmem:[%s6860_s24 + $0x248] sm:$0xff] %v3584_v24  ;;  %v3425_v58 = vadd.f32 %v3393_v55, %v3122_v34  ;;  %v8222_v24 = vld [vmem:[#allocation79_spill] sm:$0xff] }
 0x431   : > { %3680 = vst [vmem:[%s6860_s24 + $0x250] sm:$0xff] %v3648_v45 }
 0x432   : > { %v3347_v21 = vpop.f32.mrf.mxu2  ;;  %v3457_v37 = vmul.f32 0.70710677, %v3425_v58 }
 0x433   : > { %v3348_v8 = vadd.f32 %v3347_v21, %v6821_v14  ;;  %v3124_v38 = vpop.f32.mrf.mxu0  ;;  %v3237_v15 = vpop.f32.mrf.mxu1 }
 0x434   : > { %v3238_v62 = vadd.f32 %v3237_v15, %v6798_v16  ;;  %3489 = vst [vmem:[%s6848_s20 + $0xc8] sm:$0xff] %v3457_v37  ;;  %v3125_v47 = vadd.f32 %v3124_v38, %v6809_v12  ;;  %v8224_v15 = vld [vmem:[#allocation26_spill] sm:$0xff] }
 0x435   : > { %v3521_v40 = vmul.f32 %v3348_v8, %v8211_v39  ;;  %v3585_v53 = vmul.f32 %v3348_v8, %v8212_v5  ;;  %v3649_v23 = vmul.f32 %v3348_v8, %v8201_v63 }
 0x436   : > { %v3394_v59 = vmul.f32 %v3238_v62, %v1617_v13  ;;  %v8226_v62 = vld [vmem:[#allocation39_spill] sm:$0xff] }
 0x437   : > { %3553 = vst [vmem:[%s6860_s24 + $0x258] sm:$0xff] %v3521_v40  ;;  %v8227_v40 = vld [vmem:[#allocation82_spill] sm:$0xff] }
 0x438   : > { %3617 = vst [vmem:[%s6860_s24 + $0x260] sm:$0xff] %v3585_v53  ;;  %v3426_v54 = vadd.f32 %v3394_v59, %v3125_v47 }
 0x439   : > { %3681 = vst [vmem:[%s6860_s24 + $0x268] sm:$0xff] %v3649_v23 }
 0x43a   : > { %v3458_v0 = vmul.f32 0.70710677, %v3426_v54  ;;  %v3350_v56 = vpop.f32.mrf.mxu2  ;;  %v8228_v54 = vld [vmem:[#allocation181_spill] sm:$0xff] }
 0x43b   : > { %v3351_v50 = vadd.f32 %v3350_v56, %v6821_v14  ;;  %v3127_v30 = vpop.f32.mrf.mxu0  ;;  %v3240_v52 = vpop.f32.mrf.mxu1 }
 0x43c   : > { %3490 = vst [vmem:[%s6848_s20 + $0xd0] sm:$0xff] %v3458_v0  ;;  %v3241_v60 = vadd.f32 %v3240_v52, %v6798_v16  ;;  %v3128_v61 = vadd.f32 %v3127_v30, %v6809_v12  ;;  %v8229_v52 = vld [vmem:[#allocation38_spill] sm:$0xff] }
 0x43d   : > { %v3522_v7 = vmul.f32 %v3351_v50, %v8216_v3  ;;  %v3586_v63 = vmul.f32 %v3351_v50, %v8217_v17  ;;  %v3650_v49 = vmul.f32 %v3351_v50, %v8204_v43  ;;  %v8220_v43 = vld [vmem:[#allocation193_spill] sm:$0xff] }
 0x43e   : > { %v3395_v35 = vmul.f32 %v3241_v60, %v1618_v44  ;;  %v1492_v1 = vmul.f32 %v8220_v43, %v8219_v32  ;;  %v8231_v60 = vld [vmem:[#allocation42_spill] sm:$0xff]  ;;  %v8234_v43 = vld [vmem:[#allocation44_spill] sm:$0xff] }
 0x43f   : > { %3554 = vst [vmem:[%s6860_s24 + $0x270] sm:$0xff] %v3522_v7  ;;  %v8232_v7 = vld [vmem:[#allocation85_spill] sm:$0xff] }
 0x440   : > { %3618 = vst [vmem:[%s6860_s24 + $0x278] sm:$0xff] %v3586_v63  ;;  %v3427_v42 = vadd.f32 %v3395_v35, %v3128_v61  ;;  %v1524_v25 = vadd.f32 %v1492_v1, %v8223_v41 }
 0x441   : > { %3682 = vst [vmem:[%s6860_s24 + $0x280] sm:$0xff] %v3650_v49 }
 0x442   : > { %v3459_v28 = vmul.f32 0.70710677, %v3427_v42  ;;  %v3353_v4 = vpop.f32.mrf.mxu2  ;;  %v1620_v10 = vmul.f32 0.088388346, %v1524_v25  ;;  %v8233_v42 = vld [vmem:[#allocation183_spill] sm:$0xff] }
 0x443   : > { %v3354_v9 = vadd.f32 %v3353_v4, %v6821_v14  ;;  %v3130_v11 = vpop.f32.mrf.mxu0  ;;  %v3243_v31 = vpop.f32.mrf.mxu1 }
 0x444   : > { %3491 = vst [vmem:[%s6848_s20 + $0xd8] sm:$0xff] %v3459_v28  ;;  %v3244_v46 = vadd.f32 %v3243_v31, %v6798_v16  ;;  %v3131_v48 = vadd.f32 %v3130_v11, %v6809_v12 }
 0x445   : > { %v3523_v27 = vmul.f32 %v3354_v9, %v8221_v19  ;;  %v3587_v45 = vmul.f32 %v3354_v9, %v8222_v24  ;;  %v3651_v6 = vmul.f32 %v3354_v9, %v8209_v57  ;;  %v8225_v57 = vld [vmem:[#allocation195_spill] sm:$0xff] }
 0x446   : > { %v3396_v34 = vmul.f32 %v3244_v46, %v1619_v2  ;;  %v1493_v29 = vmul.f32 %v8225_v57, %v8224_v15  ;;  %v8235_v2 = vld [vmem:[#allocation89_spill] sm:$0xff] }
 0x447   : > { %3555 = vst [vmem:[%s6860_s24 + $0x288] sm:$0xff] %v3523_v27 }
 0x448   : > { %3619 = vst [vmem:[%s6860_s24 + $0x290] sm:$0xff] %v3587_v45  ;;  %v3428_v55 = vadd.f32 %v3396_v34, %v3131_v48  ;;  %v1525_v22 = vadd.f32 %v1493_v29, %v8228_v54  ;;  %v8236_v48 = vld [vmem:[#allocation47_spill] sm:$0xff] }
 0x449   : > { %3683 = vst [vmem:[%s6860_s24 + $0x298] sm:$0xff] %v3651_v6 }
 0x44a   : > { %v3460_v58 = vmul.f32 0.70710677, %v3428_v55  ;;  %v3356_v21 = vpop.f32.mrf.mxu2  ;;  %v1621_v51 = vmul.f32 0.088388346, %v1525_v22  ;;  %v8237_v55 = vld [vmem:[#allocation93_spill] sm:$0xff] }
 0x44b   : > { %v3357_v37 = vadd.f32 %v3356_v21, %v6821_v14  ;;  %v3133_v8 = vpop.f32.mrf.mxu0  ;;  %v3246_v38 = vpop.f32.mrf.mxu1 }
 0x44c   : > { %3492 = vst [vmem:[%s6848_s20 + $0xe0] sm:$0xff] %v3460_v58  ;;  %v3247_v13 = vadd.f32 %v3246_v38, %v6798_v16  ;;  %v3134_v23 = vadd.f32 %v3133_v8, %v6809_v12 }
 0x44d   : > { %v3524_v39 = vmul.f32 %v3357_v37, %v8226_v62  ;;  %v3588_v5 = vmul.f32 %v3357_v37, %v8227_v40  ;;  %v3652_v53 = vmul.f32 %v3357_v37, %v8214_v20  ;;  %v8230_v20 = vld [vmem:[#allocation197_spill] sm:$0xff] }
 0x44e   : > { %v3397_v47 = vmul.f32 %v3247_v13, %v1620_v10  ;;  %v1494_v33 = vmul.f32 %v8230_v20, %v8229_v52 }
 0x44f   : > { %3556 = vst [vmem:[%s6860_s24 + $0x2a0] sm:$0xff] %v3524_v39 }
 0x450   : > { %3620 = vst [vmem:[%s6860_s24 + $0x2a8] sm:$0xff] %v3588_v5  ;;  %v3429_v59 = vadd.f32 %v3397_v47, %v3134_v23  ;;  %v1526_v36 = vadd.f32 %v1494_v33, %v8233_v42 }
 0x451   : > { %3684 = vst [vmem:[%s6860_s24 + $0x2b0] sm:$0xff] %v3652_v53 }
 0x452   : > { %v3461_v18 = vmul.f32 0.70710677, %v3429_v59  ;;  %v3359_v0 = vpop.f32.mrf.mxu2  ;;  %v1622_v31 = vmul.f32 0.088388346, %v1526_v36 }
 0x453   : > { %v3360_v56 = vadd.f32 %v3359_v0, %v6821_v14  ;;  %v3136_v50 = vpop.f32.mrf.mxu0  ;;  %v3249_v30 = vpop.f32.mrf.mxu1 }
 0x454   : > { %3493 = vst [vmem:[%s6848_s20 + $0xe8] sm:$0xff] %v3461_v18  ;;  %v3250_v44 = vadd.f32 %v3249_v30, %v6798_v16  ;;  %v3137_v49 = vadd.f32 %v3136_v50, %v6809_v12 }
 0x455   : > { %v3525_v3 = vmul.f32 %v3360_v56, %v8231_v60  ;;  %v3589_v17 = vmul.f32 %v3360_v56, %v8232_v7  ;;  %v3653_v63 = vmul.f32 %v3360_v56, %v8219_v32 }
 0x456   : > { %v3398_v61 = vmul.f32 %v3250_v44, %v1621_v51 }
 0x457   : > { %3557 = vst [vmem:[%s6860_s24 + $0x2b8] sm:$0xff] %v3525_v3 }
 0x458   : > { %3621 = vst [vmem:[%s6860_s24 + $0x2c0] sm:$0xff] %v3589_v17  ;;  %v3430_v35 = vadd.f32 %v3398_v61, %v3137_v49 }
 0x459   : > { %3685 = vst [vmem:[%s6860_s24 + $0x2c8] sm:$0xff] %v3653_v63 }
 0x45a   : > { %v3462_v26 = vmul.f32 0.70710677, %v3430_v35  ;;  %v3362_v28 = vpop.f32.mrf.mxu2 }
 0x45b   : > { %v3363_v4 = vadd.f32 %v3362_v28, %v6821_v14  ;;  %v3139_v9 = vpop.f32.mrf.mxu0  ;;  %v3252_v11 = vpop.f32.mrf.mxu1 }
 0x45c   : > { %3494 = vst [vmem:[%s6848_s20 + $0xf0] sm:$0xff] %v3462_v26  ;;  %v3253_v32 = vadd.f32 %v3252_v11, %v6798_v16  ;;  %v3140_v27 = vadd.f32 %v3139_v9, %v6809_v12 }
 0x45d   : > { %v3526_v1 = vmul.f32 %v3363_v4, %v8234_v43  ;;  %v3590_v46 = vmul.f32 %v3363_v4, %v8235_v2  ;;  %v3654_v19 = vmul.f32 %v3363_v4, %v8224_v15 }
 0x45e   : > { %v3399_v24 = vmul.f32 %v3253_v32, %v1622_v31 }
 0x45f   : > { %3558 = vst [vmem:[%s6860_s24 + $0x2d0] sm:$0xff] %v3526_v1 }
 0x460   : > { %3622 = vst [vmem:[%s6860_s24 + $0x2d8] sm:$0xff] %v3590_v46  ;;  %v3431_v45 = vadd.f32 %v3399_v24, %v3140_v27 }
 0x461   : > { %3686 = vst [vmem:[%s6860_s24 + $0x2e0] sm:$0xff] %v3654_v19 }
 0x462   : > { %v3463_v16 = vmul.f32 0.70710677, %v3431_v45  ;;  %v3365_v12 = vpop.f32.mrf.mxu2 }
 0x463   : > { %v3366_v6 = vadd.f32 %v3365_v12, %v6821_v14 }
 0x464   : > { %3495 = vst [vmem:[%s6848_s20 + $0xf8] sm:$0xff] %v3463_v16 }
 0x465   : > { %v3527_v34 = vmul.f32 %v3366_v6, %v8236_v48  ;;  %v3591_v41 = vmul.f32 %v3366_v6, %v8237_v55  ;;  %v3655_v25 = vmul.f32 %v3366_v6, %v8229_v52 }
 0x466   : > { %4465 = shalt.err (!%p4462_p9)
}
 0x467   : > { %s4559_s29 = smov 128   ;;  %s4560_s30 = smov 8   ;;  %3559 = vst [vmem:[%s6860_s24 + $0x2e8] sm:$0xff] %v3527_v34 }
 0x468   : > { %4012 = dma.vmem_to_hbm [thread:$0]  (%p4697_p7), %s7541_s23, 4096, %s7543_s22, %s3689_s11, %s4559_s29, %s4559_s29, %s4560_s30  }
 0x469   : > { %3623 = vst [vmem:[%s6860_s24 + $0x2f0] sm:$0xff] %v3591_v41  ;;  %s3694_s3 = scalar_lea.sflag [#allocation13], %s4755_s13  ;;  %s4480_s2 = sshra.s32 %s3727_s25, 4  ;;  %s4481_s2 = int_to_ptr.hbm [resolvable:$true] %s4480_s2 }
 0x46a   : > { %3687 = vst [vmem:[%s6860_s24 + $0x2f8] sm:$0xff] %v3655_v25  ;;  %s4482_s12 = scalar_lea.hbm %s4481_s2, 768  ;;  %s4486_s16 = scalar_lea.hbm %s7606_s8, 1536 }
 0x46b   : > { %p4483_p12 = scmp.ne.s32.totalorder %s4481_s2, %s4482_s12  ;;  %p4487_p3 = scmp.lt.s32.totalorder %s4481_s2, %s7606_s8 }
 0x46c   : > { %p4488_p5 = scmp.lt.s32.totalorder %s4486_s16, %s4482_s12 }
 0x46d   : > { %p4484_p13 = pnand %p4483_p12, %p4697_p7 }
 0x46e   : > { %p4489_p1 = por %p4488_p5, %p4487_p3 }
 0x46f   : > { %p4485_p0 = pneg %p4484_p13 }
 0x471   : > { %p4490_p4 = pnand %p4489_p1, %p4485_p0 }
 0x473   : > { %4493 = shalt.err (!%p4490_p4)
}
 0x474   : > { %s4561_s13 = smov 384   ;;  %s4562_s24 = smov 24  }
 0x475   : > { %4013 = dma.vmem_to_hbm [thread:$0]  (%p4697_p7), %s3725_s10, 12288, %s3727_s25, %s3694_s3, %s4561_s13, %s4561_s13, %s4562_s24  }
 0x476 PF: > { %s8238_s23 = sld [smem:[#allocation20_spill]] }
 0x477   : > { %s8240_s11 = sld [smem:[#allocation22_spill]] }
 0x47c   : > { %s3741_s17 = sand.u32 1, %s8238_s23  }
 0x47d   : > { %p8241_p8 = scmp.ge.s32.totalorder %s8240_s11, 2  ;;  %s3742_s15 = scalar_lea.sflag [#allocation4], %s3741_s17 }
 0x47f   : > { %p4034_p2 = pnand %p8241_p8, %p4643_p6 }
 0x481   : > { %p4035_p10 = pneg %p4034_p2 }
 0x483   : > { %4527 = dma.done.wait (%p4035_p10), %s3742_s15, 4096  }
 0x484   : > { %4529 = vsyncadd (%p4035_p10), %s3742_s15, 4294963200  ;;  %s3752_s26 = scalar_lea.sflag [#allocation13], %s3741_s17 }
 0x485   : > { %4531 = dma.done.wait (%p4035_p10), %s3752_s26, 12288  }
 0x486   : > { %4533 = vsyncadd (%p4035_p10), %s3752_s26, 4294955008  ;;  %s8242_s30 = sld [smem:[#allocation24_spill]]  ;;  %s8245_s27 = smov %s4540_s28 }
 0x487   : > { %s8243_s18 = sld [smem:[#allocation21_spill]] }
 0x488   : > { %s8244_s29 = sld [smem:[#allocation25_spill]] }
 0x48c   : > { %p29_p7 = scmp.ge.s32.totalorder %s8242_s30, 4  }
 0x48d   : > { %s8246_s28 = smov %s8243_s18 }
 0x48e   :  { %31 = sbr.rel (!%p29_p7) target bundleno = 14 (0xe), region = 135 }
 0x493   :  { %3758 = vsyncpa [#allocation3], 1 }
 0x494   :  { %3760 = vsyncpa [#allocation3 + $0x1], 1 }
 0x495   :  { %3761 = vsyncpa [#allocation6], 1 }
 0x496   :  { %3763 = vsyncpa [#allocation6 + $0x1], 1 }
 0x497   :  { %3764 = vsyncpa [#allocation9], 1 }
 0x498   :  { %3765 = vsyncpa [#allocation4], 1 }
 0x499   :  { %3767 = vsyncpa [#allocation4 + $0x1], 1 }
 0x49a   :  { %3768 = vsyncpa [#allocation13], 1 }
 0x49b   :  { %3770 = vsyncpa [#allocation13 + $0x1], 1 }

</bundles_post_ra>
